<compile_context>
chip_gen: v6e
topology: v6e:2x2x1
jax: 0.10.0
libtpu: 0.0.40
codegen_flags: <defaults>
</compile_context>

<pallas_src>
import numpy as np
import jax
import jax.numpy as jnp
from jax.experimental import pallas as pl
from jax.experimental.pallas import tpu as pltpu

FEATURE_SIZE = 64
HEADS = 4
DH = FEATURE_SIZE // HEADS      # features_per_head = 16
NEG_INF = -1e9                  # same constant torch's masked_fill uses


def _ego_attention_kernel(o_ref, e_ref, m_ref,
                          wkvbd_ref, wkv_ref, wq_ref,
                          sege_ref, sego_ref, pexpe_ref, pexpo_ref,
                          colwce_ref, colwco_ref, expn_ref, bcast_ref, red_ref,
                          out_ref):
    F, H = FEATURE_SIZE, HEADS
    n_others = o_ref.shape[1] // F
    N = n_others + 1

    e2 = e_ref[...]                        # (TB, F)         bf16
    ow = o_ref[...]                        # (TB, (N-1)*F)   bf16
    msk = m_ref[...]                       # (TB, N)         bf16, exact 0/1

    # ---- K|V projections: native bf16 MXU matmuls, f32 accumulation --------
    # others go through one block-diagonal [Wk|Wv] matmul (K=(N-1)*F), ego through
    # the single (F, 2F) fused weight; each entity block is 128-lane aligned.
    ego_kv = jnp.dot(e2, wkv_ref[...], preferred_element_type=jnp.float32)    # (TB, 2F)
    oth_kv = jnp.dot(ow, wkvbd_ref[...], preferred_element_type=jnp.float32)  # (TB, (N-1)*2F)

    # ---- scaled query projection: one (TB,F)@(F,F) matmul ------------------
    q = jnp.dot(e2, wq_ref[...], preferred_element_type=jnp.float32)          # (TB, F)
    q2 = jnp.concatenate([q, q], axis=1)                                      # (TB, 2F) 128-lane block
    q_oth = jnp.concatenate([q2] * n_others, axis=1)                          # lane-aligned replicas

    # ---- per-head scores via segment-sum matmuls ----------------------------
    # q also covers the V lanes, but the seg_* constants are zero there, so the
    # garbage never reaches the score columns.
    s_all = (jnp.dot(q2 * ego_kv, sege_ref[...], preferred_element_type=jnp.float32)
             + jnp.dot(q_oth * oth_kv, sego_ref[...],
                       preferred_element_type=jnp.float32))                   # (TB, N*H)

    # masked_fill(mask == 0, -1e9); mask is expected to be exact 0/1 floats.
    mask_all = jnp.dot(msk, expn_ref[...], preferred_element_type=jnp.float32)
    s_all = jnp.where(mask_all == 0.0, NEG_INF, s_all)

    # ---- numerically stable softmax over entities, per head (f32) ----------
    mx = s_all[:, 0:H]
    for j in range(1, N):
        mx = jnp.maximum(mx, s_all[:, j * H:(j + 1) * H])                     # (TB, H)
    mx_b = jnp.dot(mx, bcast_ref[...], preferred_element_type=jnp.float32)    # (TB, N*H)
    ex = jnp.exp(s_all - mx_b)
    denom = jnp.dot(jnp.dot(ex, red_ref[...], preferred_element_type=jnp.float32),
                    bcast_ref[...], preferred_element_type=jnp.float32)       # (TB, N*H)
    p = ex * pl.reciprocal(denom, approx=True)                                # (TB, N*H)

    # ---- P @ V (block-diagonal over heads); Wc and the final /2 are folded --
    p_e = jnp.dot(p, pexpe_ref[...], preferred_element_type=jnp.float32)      # (TB, 2F)
    p_o = jnp.dot(p, pexpo_ref[...], preferred_element_type=jnp.float32)      # (TB, (N-1)*2F)
    res = (jnp.dot(p_e * ego_kv, colwce_ref[...], preferred_element_type=jnp.float32)
           + jnp.dot(p_o * oth_kv, colwco_ref[...], preferred_element_type=jnp.float32)
           + e2.astype(jnp.float32) * 0.5)                                    # (TB, F)

    # ---- one lane-dense (TB, OUT_W) writeback: [result | attention | pad] ---
    pad = out_ref.shape[1] - (F + N * H)
    pieces = [res, p]
    if pad:
        pieces.append(jnp.zeros((res.shape[0], pad), jnp.float32))
    out_ref[...] = jnp.concatenate(pieces, axis=1)


def _constants(n_entities, wk, wv, wq, wc):
    """Weights + 0/1 structure matrices (built once per call, streamed as bf16)."""
    F, H, D = FEATURE_SIZE, HEADS, DH
    N = n_entities
    W = 2 * F
    n_o = N - 1

    wk = np.asarray(wk, np.float32)
    wv = np.asarray(wv, np.float32)
    wq = np.asarray(wq, np.float32)
    wc = np.asarray(wc, np.float32)

    wkv = np.concatenate([wk, wv], axis=1)                      # (F, 2F) = [Wk | Wv]
    wkv_bd = np.zeros((n_o * F, n_o * W), np.float32)           # block-diag for others
    for j in range(n_o):
        wkv_bd[j * F:(j + 1) * F, j * W:(j + 1) * W] = wkv
    wq_s = wq * (1.0 / np.sqrt(D))                              # fold 1/sqrt(DH)

    sege = np.zeros((W, N * H), np.float32)          # ego   q*k lanes -> per-head score
    sego = np.zeros((n_o * W, N * H), np.float32)    # other q*k lanes -> per-head score
    pexpe = np.zeros((N * H, W), np.float32)         # prob -> replicated over ego V lanes
    pexpo = np.zeros((N * H, n_o * W), np.float32)   # prob -> replicated over other V lanes
    cole = np.zeros((W, F), np.float32)              # ego V lanes -> output features
    colo = np.zeros((n_o * W, F), np.float32)        # other V lanes -> output features
    expn = np.zeros((N, N * H), np.float32)          # per-entity mask -> all heads
    bcast = np.zeros((H, N * H), np.float32)         # per-head value -> all entity columns

    for f in range(F):
        h = f // D
        sege[f, h] = 1.0
        pexpe[h, F + f] = 1.0
        cole[F + f, f] = 1.0
        for j in range(n_o):
            sego[j * W + f, (j + 1) * H + h] = 1.0
            pexpo[(j + 1) * H + h, j * W + F + f] = 1.0
            colo[j * W + F + f, f] = 1.0
    for j in range(N):
        for h in range(H):
            expn[j, j * H + h] = 1.0
            bcast[h, j * H + h] = 1.0
    red = bcast.T.copy()                             # per-head sum reducer

    colwce = cole @ wc * 0.5                         # fold Wc and final /2
    colwco = colo @ wc * 0.5

    bf = lambda a: jnp.asarray(a, jnp.bfloat16)
    return (bf(wkv_bd), bf(wkv), bf(wq_s), bf(sege), bf(sego),
            bf(pexpe), bf(pexpo), bf(colwce), bf(colwco),
            bf(expn), bf(bcast), bf(red))


def _rup(x, m):
    return -(-x // m) * m


def _padded_block_bytes(shape, itemsize):
    return _rup(shape[0], 8) * _rup(max(shape[1], 1), 128) * itemsize


def ego_attention(ego, others, mask, wk, wv, wq, wc, block_b=512):
    """ego: (B,1,F), others: (B,N-1,F), mask: (B,N) exact 0/1 floats (0 = masked).
    wk/wv/wq/wc: (F,F) weights in (in,out) layout (nn.Linear weight transposed)."""
    B, n_others, F = others.shape
    assert F == FEATURE_SIZE
    assert block_b % 8 == 0 and block_b >= 8
    N = n_others + 1

    # Batch tile: always a multiple of 8; for small B pick ~ceil(B/2) so the grid has
    # at least 2 "parallel" steps (keeps both TensorCores busy on v7x).
    TB = max(8, min(block_b, _rup(_rup(B, 2) // 2, 8)))
    Bp = _rup(B, TB)
    grid = Bp // TB

    o2d = others.reshape(B, n_others * F).astype(jnp.bfloat16)   # free reshape, bf16 stream
    e2d = ego.reshape(B, F).astype(jnp.bfloat16)
    m2d = mask.reshape(B, N).astype(jnp.bfloat16)                # 0/1 is exact in bf16
    if Bp != B:
        pad = Bp - B
        o2d = jnp.pad(o2d, ((0, pad), (0, 0)))
        e2d = jnp.pad(e2d, ((0, pad), (0, 0)))
        m2d = jnp.pad(m2d, ((0, pad), (0, 0)))                   # padded rows fully masked

    consts = _constants(N, wk, wv, wq, wc)

    OUT_W = max(128, _rup(F + N * HEADS, 128))                   # lane-dense output slab

    def dspec(width):
        return pl.BlockSpec((TB, width), lambda g: (g, 0))

    def wspec(arr):
        return pl.BlockSpec(arr.shape, lambda g: (0, 0))

    in_arrays = (o2d, e2d, m2d) + consts
    in_specs = [dspec(n_others * F), dspec(F), dspec(N)] + [wspec(c) for c in consts]

    # VMEM limit sized from the double-buffered working set, capped well under the
    # 64 MiB/TensorCore budget of v7x.
    ws = sum(_padded_block_bytes(a.shape, a.dtype.itemsize) for a in consts)
    ws += _padded_block_bytes((TB, n_others * F), 2)
    ws += _padded_block_bytes((TB, F), 2) + _padded_block_bytes((TB, N), 2)
    ws += _padded_block_bytes((TB, OUT_W), 4)
    vmem_limit = int(min(40 * 2**20, max(32 * 2**20, 4 * ws)))

    slab = pl.pallas_call(
        _ego_attention_kernel,
        out_shape=jax.ShapeDtypeStruct((Bp, OUT_W), jnp.float32),
        grid_spec=pltpu.PrefetchScalarGridSpec(
            num_scalar_prefetch=0,
            grid=(grid,),
            in_specs=in_specs,
            out_specs=dspec(OUT_W),
        ),
        compiler_params=pltpu.CompilerParams(
            dimension_semantics=("parallel",),
            vmem_limit_bytes=vmem_limit),
    )(*in_arrays)

    result = slab[:B, :F]
    attention_matrix = (slab[:B, F:F + N * HEADS].reshape(B, N, HEADS)
                        .transpose(0, 2, 1)[:, :, None, :])      # (B, H, 1, N)
    return result, attention_matrix


def ref_forward(ego, others, mask, wk, wv, wq, wc):
    """Pure-JAX f32 reference mirroring the PyTorch forward."""
    B = others.shape[0]
    N = others.shape[1] + 1
    F = FEATURE_SIZE
    inp = jnp.concatenate([ego.reshape(B, 1, F), others], axis=1)
    k = (inp @ wk).reshape(B, N, HEADS, DH).transpose(0, 2, 1, 3)
    v = (inp @ wv).reshape(B, N, HEADS, DH).transpose(0, 2, 1, 3)
    q = (ego.reshape(B, 1, F) @ wq).reshape(B, 1, HEADS, DH).transpose(0, 2, 1, 3)
    s = jnp.einsum('bhqd,bhkd->bhqk', q, k) / jnp.sqrt(jnp.float32(DH))
    s = jnp.where(mask.reshape(B, 1, 1, N) == 0.0, -1e9, s)
    p = jax.nn.softmax(s, axis=-1)
    val = jnp.einsum('bhqk,bhkd->bhqd', p, v).reshape(B, F)
    res = (val @ wc + ego.reshape(B, F)) / 2.0
    return res, p


if __name__ == "__main__":
    key = jax.random.PRNGKey(0)
    B, N_OTHERS = 100, 7                     # n_entities = 8
    keys = jax.random.split(key, 6)

    bound = 1.0 / np.sqrt(FEATURE_SIZE)

    def init_w(k):
        # nn.Linear stores weight as (out,in); kernel consumes its transpose (in,out).
        w = jax.random.uniform(k, (FEATURE_SIZE, FEATURE_SIZE), jnp.float32, -bound, bound)
        return w.T

    wk, wv, wq, wc = (init_w(keys[0]), init_w(keys[1]),
                      init_w(keys[2]), init_w(keys[3]))

    ego = jax.random.normal(keys[4], (B, 1, FEATURE_SIZE), jnp.float32)
    others = jax.random.normal(keys[5], (B, N_OTHERS, FEATURE_SIZE), jnp.float32)

    # mask: 1.0 = present, 0.0 = masked
    mask = jnp.ones((B, N_OTHERS + 1), jnp.float32)
    mask = mask.at[1, -2:].set(0.0)          # partially masked row
    mask = mask.at[3, :].set(0.0)            # fully masked row (uniform attention)
    mask = mask.at[57, 1:5].set(0.0)

    # B=100 -> TB=56 (multiple of 8), padded to 112, grid of 2 "parallel" steps.
    result, attn = ego_attention(ego, others, mask, wk, wv, wq, wc)
    jax.block_until_ready((result, attn))

    ref_res, ref_attn = ref_forward(ego, others, mask, wk, wv, wq, wc)
    # bf16 streaming + approx reciprocal -> loosened tolerance vs the f32 reference.
    assert jnp.allclose(result, ref_res, rtol=3e-2, atol=3e-2), "result mismatch"
    assert jnp.allclose(attn, ref_attn, rtol=3e-2, atol=3e-2), "attention mismatch"

    print("KERNEL_OK")
</pallas_src>

<mosaic_0001>
module attributes {stable_mosaic.version = 11 : i64} {
  func.func @_ego_attention_kernel(%arg0: i32, %arg1: memref<56x448xbf16, #tpu.memory_space<vmem>>, %arg2: memref<56x64xbf16, #tpu.memory_space<vmem>>, %arg3: memref<56x8xbf16, #tpu.memory_space<vmem>>, %arg4: memref<448x896xbf16, #tpu.memory_space<vmem>>, %arg5: memref<64x128xbf16, #tpu.memory_space<vmem>>, %arg6: memref<64x64xbf16, #tpu.memory_space<vmem>>, %arg7: memref<128x32xbf16, #tpu.memory_space<vmem>>, %arg8: memref<896x32xbf16, #tpu.memory_space<vmem>>, %arg9: memref<32x128xbf16, #tpu.memory_space<vmem>>, %arg10: memref<32x896xbf16, #tpu.memory_space<vmem>>, %arg11: memref<128x64xbf16, #tpu.memory_space<vmem>>, %arg12: memref<896x64xbf16, #tpu.memory_space<vmem>>, %arg13: memref<8x32xbf16, #tpu.memory_space<vmem>>, %arg14: memref<4x32xbf16, #tpu.memory_space<vmem>>, %arg15: memref<32x4xbf16, #tpu.memory_space<vmem>>, %arg16: memref<56x128xf32, #tpu.memory_space<vmem>>) attributes {dimension_semantics = [#tpu.dimension_semantics<parallel>], iteration_bounds = array<i64: 2>, scalar_prefetch = 0 : i64, scratch_operands = 0 : i64, tpu.core_type = #tpu.core_type<tc>, window_params = [{transform_indices = @transform_0, window_bounds = array<i64: 56, 448>}, {transform_indices = @transform_1, window_bounds = array<i64: 56, 64>}, {transform_indices = @transform_2, window_bounds = array<i64: 56, 8>}, {pipeline_mode = #tpu.pipeline_mode<synchronous>, transform_indices = @transform_3, window_bounds = array<i64: 448, 896>}, {pipeline_mode = #tpu.pipeline_mode<synchronous>, transform_indices = @transform_4, window_bounds = array<i64: 64, 128>}, {pipeline_mode = #tpu.pipeline_mode<synchronous>, transform_indices = @transform_5, window_bounds = array<i64: 64, 64>}, {pipeline_mode = #tpu.pipeline_mode<synchronous>, transform_indices = @transform_6, window_bounds = array<i64: 128, 32>}, {pipeline_mode = #tpu.pipeline_mode<synchronous>, transform_indices = @transform_7, window_bounds = array<i64: 896, 32>}, {pipeline_mode = #tpu.pipeline_mode<synchronous>, transform_indices = @transform_8, window_bounds = array<i64: 32, 128>}, {pipeline_mode = #tpu.pipeline_mode<synchronous>, transform_indices = @transform_9, window_bounds = array<i64: 32, 896>}, {pipeline_mode = #tpu.pipeline_mode<synchronous>, transform_indices = @transform_10, window_bounds = array<i64: 128, 64>}, {pipeline_mode = #tpu.pipeline_mode<synchronous>, transform_indices = @transform_11, window_bounds = array<i64: 896, 64>}, {pipeline_mode = #tpu.pipeline_mode<synchronous>, transform_indices = @transform_12, window_bounds = array<i64: 8, 32>}, {pipeline_mode = #tpu.pipeline_mode<synchronous>, transform_indices = @transform_13, window_bounds = array<i64: 4, 32>}, {pipeline_mode = #tpu.pipeline_mode<synchronous>, transform_indices = @transform_14, window_bounds = array<i64: 32, 4>}, {transform_indices = @transform_15, window_bounds = array<i64: 56, 128>}]} {
    %c0 = arith.constant 0 : index
    %c0_0 = arith.constant 0 : index
    %0 = vector.load %arg2[%c0, %c0_0] : memref<56x64xbf16, #tpu.memory_space<vmem>>, vector<56x64xbf16>
    %c0_1 = arith.constant 0 : index
    %c0_2 = arith.constant 0 : index
    %1 = vector.load %arg1[%c0_1, %c0_2] : memref<56x448xbf16, #tpu.memory_space<vmem>>, vector<56x448xbf16>
    %c0_3 = arith.constant 0 : index
    %c0_4 = arith.constant 0 : index
    %2 = vector.load %arg3[%c0_3, %c0_4] : memref<56x8xbf16, #tpu.memory_space<vmem>>, vector<56x8xbf16>
    %c0_5 = arith.constant 0 : index
    %c0_6 = arith.constant 0 : index
    %3 = vector.load %arg5[%c0_5, %c0_6] : memref<64x128xbf16, #tpu.memory_space<vmem>>, vector<64x128xbf16>
    %cst = arith.constant dense<0.000000e+00> : vector<56x128xf32>
    %4 = tpu.matmul %0, %3, %cst {dimension_numbers = #tpu.dot_dimension_numbers<[1], [0], [0], [1], [0, 0, 1, 1], [], []>} : vector<56x64xbf16>, vector<64x128xbf16>, vector<56x128xf32> -> vector<56x128xf32>
    %c0_7 = arith.constant 0 : index
    %c0_8 = arith.constant 0 : index
    %5 = vector.load %arg4[%c0_7, %c0_8] : memref<448x896xbf16, #tpu.memory_space<vmem>>, vector<448x896xbf16>
    %cst_9 = arith.constant dense<0.000000e+00> : vector<56x896xf32>
    %6 = tpu.matmul %1, %5, %cst_9 {dimension_numbers = #tpu.dot_dimension_numbers<[1], [0], [0], [1], [0, 0, 1, 1], [], []>} : vector<56x448xbf16>, vector<448x896xbf16>, vector<56x896xf32> -> vector<56x896xf32>
    %c0_10 = arith.constant 0 : index
    %c0_11 = arith.constant 0 : index
    %7 = vector.load %arg6[%c0_10, %c0_11] : memref<64x64xbf16, #tpu.memory_space<vmem>>, vector<64x64xbf16>
    %cst_12 = arith.constant dense<0.000000e+00> : vector<56x64xf32>
    %8 = tpu.matmul %0, %7, %cst_12 {dimension_numbers = #tpu.dot_dimension_numbers<[1], [0], [0], [1], [0, 0, 1, 1], [], []>} : vector<56x64xbf16>, vector<64x64xbf16>, vector<56x64xf32> -> vector<56x64xf32>
    %9 = tpu.concatenate %8, %8 in 1 : vector<56x64xf32>, vector<56x64xf32> -> vector<56x128xf32>
    %10 = tpu.concatenate %9, %9, %9, %9, %9, %9, %9 in 1 : vector<56x128xf32>, vector<56x128xf32>, vector<56x128xf32>, vector<56x128xf32>, vector<56x128xf32>, vector<56x128xf32>, vector<56x128xf32> -> vector<56x896xf32>
    %11 = arith.mulf %9, %4 : vector<56x128xf32>
    %c0_13 = arith.constant 0 : index
    %c0_14 = arith.constant 0 : index
    %12 = vector.load %arg7[%c0_13, %c0_14] : memref<128x32xbf16, #tpu.memory_space<vmem>>, vector<128x32xbf16>
    %cst_15 = arith.constant dense<0.000000e+00> : vector<56x32xf32>
    %13 = tpu.matmul %11, %12, %cst_15 {dimension_numbers = #tpu.dot_dimension_numbers<[1], [0], [0], [1], [0, 0, 1, 1], [], []>} : vector<56x128xf32>, vector<128x32xbf16>, vector<56x32xf32> -> vector<56x32xf32>
    %14 = arith.mulf %10, %6 : vector<56x896xf32>
    %c0_16 = arith.constant 0 : index
    %c0_17 = arith.constant 0 : index
    %15 = vector.load %arg8[%c0_16, %c0_17] : memref<896x32xbf16, #tpu.memory_space<vmem>>, vector<896x32xbf16>
    %cst_18 = arith.constant dense<0.000000e+00> : vector<56x32xf32>
    %16 = tpu.matmul %14, %15, %cst_18 {dimension_numbers = #tpu.dot_dimension_numbers<[1], [0], [0], [1], [0, 0, 1, 1], [], []>} : vector<56x896xf32>, vector<896x32xbf16>, vector<56x32xf32> -> vector<56x32xf32>
    %17 = arith.addf %13, %16 : vector<56x32xf32>
    %c0_19 = arith.constant 0 : index
    %c0_20 = arith.constant 0 : index
    %18 = vector.load %arg13[%c0_19, %c0_20] : memref<8x32xbf16, #tpu.memory_space<vmem>>, vector<8x32xbf16>
    %cst_21 = arith.constant dense<0.000000e+00> : vector<56x32xf32>
    %19 = tpu.matmul %2, %18, %cst_21 {dimension_numbers = #tpu.dot_dimension_numbers<[1], [0], [0], [1], [0, 0, 1, 1], [], []>} : vector<56x8xbf16>, vector<8x32xbf16>, vector<56x32xf32> -> vector<56x32xf32>
    %cst_22 = arith.constant 0.000000e+00 : f32
    %20 = vector.broadcast %cst_22 : f32 to vector<56x32xf32>
    %21 = arith.cmpf oeq, %19, %20 : vector<56x32xf32>
    %cst_23 = arith.constant -1.000000e+09 : f32
    %22 = vector.broadcast %cst_23 : f32 to vector<56x32xf32>
    %23 = arith.select %21, %22, %17 : vector<56x32xi1>, vector<56x32xf32>
    %24 = vector.extract_strided_slice %23 {offsets = [0, 0], sizes = [56, 4], strides = [1, 1]} : vector<56x32xf32> to vector<56x4xf32>
    %25 = vector.extract_strided_slice %23 {offsets = [0, 4], sizes = [56, 4], strides = [1, 1]} : vector<56x32xf32> to vector<56x4xf32>
    %26 = arith.maximumf %24, %25 : vector<56x4xf32>
    %27 = vector.extract_strided_slice %23 {offsets = [0, 8], sizes = [56, 4], strides = [1, 1]} : vector<56x32xf32> to vector<56x4xf32>
    %28 = arith.maximumf %26, %27 : vector<56x4xf32>
    %29 = vector.extract_strided_slice %23 {offsets = [0, 12], sizes = [56, 4], strides = [1, 1]} : vector<56x32xf32> to vector<56x4xf32>
    %30 = arith.maximumf %28, %29 : vector<56x4xf32>
    %31 = vector.extract_strided_slice %23 {offsets = [0, 16], sizes = [56, 4], strides = [1, 1]} : vector<56x32xf32> to vector<56x4xf32>
    %32 = arith.maximumf %30, %31 : vector<56x4xf32>
    %33 = vector.extract_strided_slice %23 {offsets = [0, 20], sizes = [56, 4], strides = [1, 1]} : vector<56x32xf32> to vector<56x4xf32>
    %34 = arith.maximumf %32, %33 : vector<56x4xf32>
    %35 = vector.extract_strided_slice %23 {offsets = [0, 24], sizes = [56, 4], strides = [1, 1]} : vector<56x32xf32> to vector<56x4xf32>
    %36 = arith.maximumf %34, %35 : vector<56x4xf32>
    %37 = vector.extract_strided_slice %23 {offsets = [0, 28], sizes = [56, 4], strides = [1, 1]} : vector<56x32xf32> to vector<56x4xf32>
    %38 = arith.maximumf %36, %37 : vector<56x4xf32>
    %c0_24 = arith.constant 0 : index
    %c0_25 = arith.constant 0 : index
    %39 = vector.load %arg14[%c0_24, %c0_25] : memref<4x32xbf16, #tpu.memory_space<vmem>>, vector<4x32xbf16>
    %cst_26 = arith.constant dense<0.000000e+00> : vector<56x32xf32>
    %40 = tpu.matmul %38, %39, %cst_26 {dimension_numbers = #tpu.dot_dimension_numbers<[1], [0], [0], [1], [0, 0, 1, 1], [], []>} : vector<56x4xf32>, vector<4x32xbf16>, vector<56x32xf32> -> vector<56x32xf32>
    %41 = arith.subf %23, %40 : vector<56x32xf32>
    %42 = math.exp %41 : vector<56x32xf32>
    %c0_27 = arith.constant 0 : index
    %c0_28 = arith.constant 0 : index
    %43 = vector.load %arg15[%c0_27, %c0_28] : memref<32x4xbf16, #tpu.memory_space<vmem>>, vector<32x4xbf16>
    %cst_29 = arith.constant dense<0.000000e+00> : vector<56x4xf32>
    %44 = tpu.matmul %42, %43, %cst_29 {dimension_numbers = #tpu.dot_dimension_numbers<[1], [0], [0], [1], [0, 0, 1, 1], [], []>} : vector<56x32xf32>, vector<32x4xbf16>, vector<56x4xf32> -> vector<56x4xf32>
    %c0_30 = arith.constant 0 : index
    %c0_31 = arith.constant 0 : index
    %45 = vector.load %arg14[%c0_30, %c0_31] : memref<4x32xbf16, #tpu.memory_space<vmem>>, vector<4x32xbf16>
    %cst_32 = arith.constant dense<0.000000e+00> : vector<56x32xf32>
    %46 = tpu.matmul %44, %45, %cst_32 {dimension_numbers = #tpu.dot_dimension_numbers<[1], [0], [0], [1], [0, 0, 1, 1], [], []>} : vector<56x4xf32>, vector<4x32xbf16>, vector<56x32xf32> -> vector<56x32xf32>
    %47 = tpu.reciprocal %46 {approx = true} : vector<56x32xf32> -> vector<56x32xf32>
    %48 = arith.mulf %42, %47 : vector<56x32xf32>
    %c0_33 = arith.constant 0 : index
    %c0_34 = arith.constant 0 : index
    %49 = vector.load %arg9[%c0_33, %c0_34] : memref<32x128xbf16, #tpu.memory_space<vmem>>, vector<32x128xbf16>
    %cst_35 = arith.constant dense<0.000000e+00> : vector<56x128xf32>
    %50 = tpu.matmul %48, %49, %cst_35 {dimension_numbers = #tpu.dot_dimension_numbers<[1], [0], [0], [1], [0, 0, 1, 1], [], []>} : vector<56x32xf32>, vector<32x128xbf16>, vector<56x128xf32> -> vector<56x128xf32>
    %c0_36 = arith.constant 0 : index
    %c0_37 = arith.constant 0 : index
    %51 = vector.load %arg10[%c0_36, %c0_37] : memref<32x896xbf16, #tpu.memory_space<vmem>>, vector<32x896xbf16>
    %cst_38 = arith.constant dense<0.000000e+00> : vector<56x896xf32>
    %52 = tpu.matmul %48, %51, %cst_38 {dimension_numbers = #tpu.dot_dimension_numbers<[1], [0], [0], [1], [0, 0, 1, 1], [], []>} : vector<56x32xf32>, vector<32x896xbf16>, vector<56x896xf32> -> vector<56x896xf32>
    %53 = arith.mulf %50, %4 : vector<56x128xf32>
    %c0_39 = arith.constant 0 : index
    %c0_40 = arith.constant 0 : index
    %54 = vector.load %arg11[%c0_39, %c0_40] : memref<128x64xbf16, #tpu.memory_space<vmem>>, vector<128x64xbf16>
    %cst_41 = arith.constant dense<0.000000e+00> : vector<56x64xf32>
    %55 = tpu.matmul %53, %54, %cst_41 {dimension_numbers = #tpu.dot_dimension_numbers<[1], [0], [0], [1], [0, 0, 1, 1], [], []>} : vector<56x128xf32>, vector<128x64xbf16>, vector<56x64xf32> -> vector<56x64xf32>
    %56 = arith.mulf %52, %6 : vector<56x896xf32>
    %c0_42 = arith.constant 0 : index
    %c0_43 = arith.constant 0 : index
    %57 = vector.load %arg12[%c0_42, %c0_43] : memref<896x64xbf16, #tpu.memory_space<vmem>>, vector<896x64xbf16>
    %cst_44 = arith.constant dense<0.000000e+00> : vector<56x64xf32>
    %58 = tpu.matmul %56, %57, %cst_44 {dimension_numbers = #tpu.dot_dimension_numbers<[1], [0], [0], [1], [0, 0, 1, 1], [], []>} : vector<56x896xf32>, vector<896x64xbf16>, vector<56x64xf32> -> vector<56x64xf32>
    %59 = arith.addf %55, %58 : vector<56x64xf32>
    %60 = arith.extf %0 : vector<56x64xbf16> to vector<56x64xf32>
    %cst_45 = arith.constant 5.000000e-01 : f32
    %61 = vector.broadcast %cst_45 : f32 to vector<56x64xf32>
    %62 = arith.mulf %60, %61 : vector<56x64xf32>
    %63 = arith.addf %59, %62 : vector<56x64xf32>
    %cst_46 = arith.constant 0.000000e+00 : f32
    %64 = vector.broadcast %cst_46 : f32 to vector<56x32xf32>
    %65 = tpu.concatenate %63, %48, %64 in 1 : vector<56x64xf32>, vector<56x32xf32>, vector<56x32xf32> -> vector<56x128xf32>
    %c0_47 = arith.constant 0 : index
    %c0_48 = arith.constant 0 : index
    %66 = vector.load %arg16[%c0_47, %c0_48] : memref<56x128xf32, #tpu.memory_space<vmem>>, vector<56x128xf32>
    tpu.vector_store %arg16[%c0_47, %c0_48], %65 {strides = array<i32>} : memref<56x128xf32, #tpu.memory_space<vmem>>, vector<56x128xf32>,
    return
  }
  func.func @transform_0(%arg0: i32) -> (i32, i32) {
    %c0_i32 = arith.constant 0 : i32
    %c0_i32_0 = arith.constant 0 : i32
    return %arg0, %c0_i32 : i32, i32
  }
  func.func @transform_1(%arg0: i32) -> (i32, i32) {
    %c0_i32 = arith.constant 0 : i32
    %c0_i32_0 = arith.constant 0 : i32
    return %arg0, %c0_i32 : i32, i32
  }
  func.func @transform_2(%arg0: i32) -> (i32, i32) {
    %c0_i32 = arith.constant 0 : i32
    %c0_i32_0 = arith.constant 0 : i32
    return %arg0, %c0_i32 : i32, i32
  }
  func.func @transform_3(%arg0: i32) -> (i32, i32) {
    %c0_i32 = arith.constant 0 : i32
    %c0_i32_0 = arith.constant 0 : i32
    %c0_i32_1 = arith.constant 0 : i32
    return %c0_i32, %c0_i32_0 : i32, i32
  }
  func.func @transform_4(%arg0: i32) -> (i32, i32) {
    %c0_i32 = arith.constant 0 : i32
    %c0_i32_0 = arith.constant 0 : i32
    %c0_i32_1 = arith.constant 0 : i32
    return %c0_i32, %c0_i32_0 : i32, i32
  }
  func.func @transform_5(%arg0: i32) -> (i32, i32) {
    %c0_i32 = arith.constant 0 : i32
    %c0_i32_0 = arith.constant 0 : i32
    %c0_i32_1 = arith.constant 0 : i32
    return %c0_i32, %c0_i32_0 : i32, i32
  }
  func.func @transform_6(%arg0: i32) -> (i32, i32) {
    %c0_i32 = arith.constant 0 : i32
    %c0_i32_0 = arith.constant 0 : i32
    %c0_i32_1 = arith.constant 0 : i32
    return %c0_i32, %c0_i32_0 : i32, i32
  }
  func.func @transform_7(%arg0: i32) -> (i32, i32) {
    %c0_i32 = arith.constant 0 : i32
    %c0_i32_0 = arith.constant 0 : i32
    %c0_i32_1 = arith.constant 0 : i32
    return %c0_i32, %c0_i32_0 : i32, i32
  }
  func.func @transform_8(%arg0: i32) -> (i32, i32) {
    %c0_i32 = arith.constant 0 : i32
    %c0_i32_0 = arith.constant 0 : i32
    %c0_i32_1 = arith.constant 0 : i32
    return %c0_i32, %c0_i32_0 : i32, i32
  }
  func.func @transform_9(%arg0: i32) -> (i32, i32) {
    %c0_i32 = arith.constant 0 : i32
    %c0_i32_0 = arith.constant 0 : i32
    %c0_i32_1 = arith.constant 0 : i32
    return %c0_i32, %c0_i32_0 : i32, i32
  }
  func.func @transform_10(%arg0: i32) -> (i32, i32) {
    %c0_i32 = arith.constant 0 : i32
    %c0_i32_0 = arith.constant 0 : i32
    %c0_i32_1 = arith.constant 0 : i32
    return %c0_i32, %c0_i32_0 : i32, i32
  }
  func.func @transform_11(%arg0: i32) -> (i32, i32) {
    %c0_i32 = arith.constant 0 : i32
    %c0_i32_0 = arith.constant 0 : i32
    %c0_i32_1 = arith.constant 0 : i32
    return %c0_i32, %c0_i32_0 : i32, i32
  }
  func.func @transform_12(%arg0: i32) -> (i32, i32) {
    %c0_i32 = arith.constant 0 : i32
    %c0_i32_0 = arith.constant 0 : i32
    %c0_i32_1 = arith.constant 0 : i32
    return %c0_i32, %c0_i32_0 : i32, i32
  }
  func.func @transform_13(%arg0: i32) -> (i32, i32) {
    %c0_i32 = arith.constant 0 : i32
    %c0_i32_0 = arith.constant 0 : i32
    %c0_i32_1 = arith.constant 0 : i32
    return %c0_i32, %c0_i32_0 : i32, i32
  }
  func.func @transform_14(%arg0: i32) -> (i32, i32) {
    %c0_i32 = arith.constant 0 : i32
    %c0_i32_0 = arith.constant 0 : i32
    %c0_i32_1 = arith.constant 0 : i32
    return %c0_i32, %c0_i32_0 : i32, i32
  }
  func.func @transform_15(%arg0: i32) -> (i32, i32) {
    %c0_i32 = arith.constant 0 : i32
    %c0_i32_0 = arith.constant 0 : i32
    return %arg0, %c0_i32 : i32, i32
  }
}

</mosaic_0001>

<bundles_post_ra>
// kernel: tpu_custom_call.1
= control target key start
LH: loop header
LB: loop body
LE: loop exit
PB: predicated region body
PF: predicated region fallthrough
CT: control target
= control target key end

     0   :  { %s10527_s0 = inlined_call_operand.hbm [shape: bf16[112,448], index: 0, kind: input, shape index: {}]   ;;  %s10528_s1 = inlined_call_operand.vmem [shape: bf16[112,64], index: 1, kind: input, shape index: {}]   ;;  %s10529_s2 = inlined_call_operand.vmem [shape: bf16[112,8], index: 2, kind: input, shape index: {}]   ;;  %s10530_s3 = inlined_call_operand.vmem [shape: bf16[448,896], index: 3, kind: input, shape index: {}]   ;;  %s10531_s4 = inlined_call_operand.hbm [shape: bf16[64,128], index: 4, kind: input, shape index: {}]   ;;  %s10532_s5 = inlined_call_operand.hbm [shape: bf16[64,64], index: 5, kind: input, shape index: {}]   ;;  %s10533_s6 = inlined_call_operand.vmem [shape: bf16[128,32], index: 6, kind: input, shape index: {}]   ;;  %s10534_s7 = inlined_call_operand.vmem [shape: bf16[896,32], index: 7, kind: input, shape index: {}]   ;;  %s10535_s8 = inlined_call_operand.hbm [shape: bf16[32,128], index: 8, kind: input, shape index: {}]   ;;  %s10536_s9 = inlined_call_operand.hbm [shape: bf16[32,896], index: 9, kind: input, shape index: {}]   ;;  %s10537_s10 = inlined_call_operand.vmem [shape: bf16[128,64], index: 10, kind: input, shape index: {}]   ;;  %s10538_s11 = inlined_call_operand.vmem [shape: bf16[896,64], index: 11, kind: input, shape index: {}]   ;;  %s10539_s12 = inlined_call_operand.vmem [shape: bf16[8,32], index: 12, kind: input, shape index: {}]   ;;  %s10540_s13 = inlined_call_operand.vmem [shape: bf16[4,32], index: 13, kind: input, shape index: {}]   ;;  %s10541_s14 = inlined_call_operand.vmem [shape: bf16[32,4], index: 14, kind: input, shape index: {}]   ;;  %s10542_s15 = inlined_call_operand.hbm [shape: f32[112,128], index: 15, kind: output, shape index: {}]  }
   0x1   :  { %10596 = sst [smem:[#allocation74_spill]] %s10531_s4 }
   0x2   :  { %10597 = sst [smem:[#allocation75_spill]] %s10532_s5 }
   0x3   :  { %10598 = sst [smem:[#allocation76_spill]] %s10535_s8 }
   0x4   :  { %10599 = sst [smem:[#allocation77_spill]] %s10536_s9 }
   0x5   :  { %10600 = sst [smem:[#allocation78_spill]] %s10537_s10 }
   0x6   :  { %10601 = sst [smem:[#allocation79_spill]] %s10542_s15 }
   0x7   :  { %20 = vsyncpa [#allocation3], 0 }
   0x8   :  { %22 = vsyncpa [#allocation3 + $0x1], 0 }
   0x9   :  { %23 = vsyncpa [#allocation6], 0 }
   0xa   :  { %24 = vsyncpa [#allocation9], 0 }
   0xb   :  { %25 = vsyncpa [#allocation4], 0 }
   0xc   :  { %27 = vsyncpa [#allocation4 + $0x1], 0  ;;  %s8046_s18 = smov 0   ;;  %s8048_s19 = smov 0  }
   0xd   :  { %s8050_s20 = smov 0   ;;  %s8052_s21 = smov 0  }
   0xe LB: > { %10602 = sst [smem:[#allocation16_spill]] %s7927_s18  ;;  %s8067_s22 = sadd.s32 4294967295, %s7939_s21   ;;  %s7939_s21 = sphi %s8052_s21, %s10777_s21   ;;  %s7935_s20 = sphi %s8050_s20, %s10776_s20   ;;  %s7931_s19 = sphi %s8048_s19, %s10775_s19   ;;  %s7927_s18 = sphi %s8046_s18, %s10774_s18  }
   0xf   : > { %s5930_s23 = sadd.s32 4294967294, %s7939_s21   ;;  %p53_p0 = scmp.ne.s32.totalorder %s7931_s19, %s7927_s18 }
  0x10   : > { %p10546_p1 = scmp.eq.s32.totalorder %s8067_s22, 0  ;;  %p387_p3 = scmp.eq.s32.totalorder %s5930_s23, 1 }
  0x11   : > { %p5931_p5 = scmp.ge.s32.totalorder %s7939_s21, 1  ;;  %p394_p7 = scmp.lt.s32.totalorder %s7939_s21, 3 }
  0x12   : > { %p8076_p4 = por %p10546_p1, %p53_p0  ;;  %p8081_p6 = por %p387_p3, %p53_p0 }
  0x13   : > { %p8086_p8 = pnand %p5931_p5, %p394_p7  ;;  %s7941_s27 = smov [#allocation5]  }
  0x14   : > { %s10603_s24 = scalar_select %p8076_p4, 1, 0 }
  0x15   : > { %s10604_s25 = scalar_select %p8081_p6, 1, 0 }
  0x16   : > { %s10606_s26 = scalar_select %p8086_p8, 1, 0 }
  0x17   : > { %10605 = sst [smem:[#allocation17_spill]] %s10604_s25  ;;  %s409_s28 = sshll.u32 %s7941_s27, 4  ;;  %s410_s28 = int_to_ptr.vmem [resolvable:$true] %s409_s28 }
  0x18   : > { %p7132_p9 = pneg %p8086_p8  ;;  %s7942_s30 = smov [#allocation8]  }
  0x19   : > { %s441_s16 = sshll.u32 %s7942_s30, 4  ;;  %s7943_s17 = smov [#allocation7]   ;;  %s442_s16 = int_to_ptr.vmem [resolvable:$true] %s441_s16 }
  0x1a   : > { %p8095_p11 = pnand %p7132_p9, %p10546_p1  ;;  %s422_s23 = sshll.u32 %s7943_s17, 4  ;;  %s423_s23 = int_to_ptr.vmem [resolvable:$true] %s422_s23 }
  0x1b   : > { %s7746_s25 = scalar_lea.vmem %s410_s28, 512  ;;  %p7754_p5 = scmp.lt.s32.totalorder %s410_s28, %s410_s28 }
  0x1c   : > { %p7737_p12 = pneg %p8095_p11  ;;  %p7747_p13 = scmp.ne.s32.totalorder %s410_s28, %s7746_s25 }
  0x1d   : > { %p7755_p7 = scmp.lt.s32.totalorder %s7746_s25, %s7746_s25 }
  0x1e   : > { %p7749_p0 = pnand %p7747_p13, %p7737_p12 }
  0x1f   : > { %p7756_p9 = por %p7755_p7, %p7754_p5 }
  0x20   : > { %p7750_p3 = pneg %p7749_p0 }
  0x22   : > { %p7757_p10 = pnand %p7756_p9, %p7750_p3 }
  0x24   : > { %7760 = shalt.err (!%p7757_p10)
}
  0x25   : > { %s7944_s27 = smov 64   ;;  %s7945_s30 = smov 4  }
  0x26   : > { %s10608_s4 = sld [smem:[#allocation74_spill]]  ;;  %s7772_s15 = scalar_lea.vmem %s442_s16, 256 }
  0x27   : > { %p7773_p1 = scmp.ne.s32.totalorder %s442_s16, %s7772_s15  ;;  %p7780_p2 = scmp.lt.s32.totalorder %s442_s16, %s442_s16 }
  0x28   : > { %p7781_p6 = scmp.lt.s32.totalorder %s7772_s15, %s7772_s15 }
  0x29   : > { %p7775_p13 = pnand %p7773_p1, %p7737_p12 }
  0x2a   : > { %p7782_p5 = por %p7781_p6, %p7780_p2 }
  0x2b   : > { %p7776_p0 = pneg %p7775_p13 }
  0x2c   : > { %7135 = dma.hbm_to_vmem [thread:$0]  (!%p8095_p11), %s10608_s4, 512, %s410_s28, [#allocation6], %s7944_s27, %s7944_s27, %s7945_s30  }
  0x2d   : > { %p7783_p3 = pnand %p7782_p5, %p7776_p0 }
  0x2f   : > { %7786 = shalt.err (!%p7783_p3)
}
  0x30   : > { %s10609_s8 = sld [smem:[#allocation76_spill]]  ;;  %s7798_s18 = scalar_lea.vmem %s423_s23, 512 }
  0x31   : > { %p7799_p10 = scmp.ne.s32.totalorder %s423_s23, %s7798_s18  ;;  %p7806_p9 = scmp.lt.s32.totalorder %s423_s23, %s423_s23 }
  0x32   : > { %p7807_p13 = scmp.lt.s32.totalorder %s7798_s18, %s7798_s18 }
  0x33   : > { %p7801_p7 = pnand %p7799_p10, %p7737_p12 }
  0x34   : > { %p7808_p4 = por %p7807_p13, %p7806_p9 }
  0x35   : > { %p7802_p1 = pneg %p7801_p7 }
  0x36   : > { %7141 = dma.hbm_to_vmem [thread:$0]  (!%p8095_p11), %s10609_s8, 256, %s442_s16, [#allocation9], %s7944_s27, %s7944_s27, %s7945_s30  }
  0x37   : > { %p7809_p2 = pnand %p7808_p4, %p7802_p1 }
  0x39   : > { %7812 = shalt.err (!%p7809_p2)
}
  0x3a   : > { %s10610_s5 = sld [smem:[#allocation75_spill]]  ;;  %s7946_s10 = smov [#allocation10]  }
  0x3b   : > { %s454_s16 = sshll.u32 %s7946_s10, 4  ;;  %s455_s16 = int_to_ptr.vmem [resolvable:$true] %s454_s16 }
  0x3c   : > { %s7824_s17 = scalar_lea.vmem %s455_s16, 1792  ;;  %p7832_p3 = scmp.lt.s32.totalorder %s455_s16, %s455_s16 }
  0x3d   : > { %p7825_p6 = scmp.ne.s32.totalorder %s455_s16, %s7824_s17  ;;  %p7833_p10 = scmp.lt.s32.totalorder %s7824_s17, %s7824_s17 }
  0x3f   : > { %p7827_p0 = pnand %p7825_p6, %p7737_p12  ;;  %p7834_p4 = por %p7833_p10, %p7832_p3 }
  0x40   : > { %7138 = dma.hbm_to_vmem [thread:$0]  (!%p8095_p11), %s10610_s5, 512, %s423_s23, [#allocation6], %s7944_s27, %s7944_s27, %s7945_s30  }
  0x41   : > { %p7828_p5 = pneg %p7827_p0 }
  0x43   : > { %p7835_p7 = pnand %p7834_p4, %p7828_p5 }
  0x45   : > { %7838 = shalt.err (!%p7835_p7)
}
  0x46   : > { %s7947_s25 = smov 448   ;;  %s7948_s23 = smov 28  }
  0x47   : > { %s10611_s9 = sld [smem:[#allocation77_spill]]  ;;  %s8134_s18 = sadd.s32 1, %s7939_s21  }
  0x48   : > { %s37_s15 = ssub.s32 %s7939_s21, %s8134_s18  ;;  %s40_s28 = sadd.s32 1, %s7935_s20 }
  0x49   : > { %p38_p12 = scmp.eq.s32.totalorder %s37_s15, 0  ;;  %p47_p1 = scmp.ne.s32.totalorder %s7935_s20, %s7931_s19 }
  0x4a   : > { %p48_p9 = scmp.eq.s32.totalorder %s7939_s21, 0  ;;  %p10613_p2 = scmp.eq.s32.totalorder %s8067_s22, 1 }
  0x4b   : > { %s8143_s10 = scalar_select %p38_p12, %s7935_s20, %s40_s28  }
  0x4c   : > { %p49_p13 = por %p48_p9, %p47_p1  ;;  %p8147_p6 = por %p10613_p2, %p47_p1 }
  0x4d   : > { %7144 = dma.hbm_to_vmem [thread:$0]  (!%p8095_p11), %s10611_s9, 1792, %s455_s16, [#allocation9], %s7947_s25, %s7947_s25, %s7948_s23  }
  0x4e   : > { %10612 = sst [smem:[#allocation18_spill]] %s8143_s10  ;;  %p7157_p0 = scmp.lt.s32.totalorder %s7939_s21, 2 }
  0x4f   : > { %s10614_s17 = scalar_select %p8147_p6, 1, 0 }
  0x50   : > { %s483_s29 = sand.u32 1, %s7935_s20   ;;  %s6410_s16 = smul.u32 1792, %s7939_s21 }
  0x51   : > { %s7109_s27 = smul.u32 112, %s483_s29  ;;  %p8154_p11 = pnand %p7157_p0, %p49_p13 }
  0x52   : > { %s8161_s15 = scalar_lea.hbm %s10527_s0, %s6410_s16  ;;  %s8165_s5 = scalar_lea.sflag [#allocation3], %s483_s29 }
  0x53   : > { %s487_s28 = scalar_lea.vmem [#allocation2], %s7109_s27  ;;  %s7839_s8 = scalar_lea.hbm %s8161_s15, 1792 }
  0x54   : > { %s495_s4 = sshll.u32 %s487_s28, 4  ;;  %p7840_p5 = scmp.ne.s32.totalorder %s8161_s15, %s7839_s8  ;;  %s8163_s4 = int_to_ptr.vmem [resolvable:$true] %s495_s4 }
  0x55   : > { %p7841_p3 = pneg %p8154_p11  ;;  %s7844_s16 = scalar_lea.hbm %s10527_s0, 3584 }
  0x56   : > { %p7845_p7 = scmp.lt.s32.totalorder %s8161_s15, %s10527_s0  ;;  %p7846_p12 = scmp.lt.s32.totalorder %s7844_s16, %s7839_s8 }
  0x57   : > { %p7842_p10 = pnand %p7841_p3, %p7840_p5 }
  0x58   : > { %p7847_p1 = por %p7846_p12, %p7845_p7 }
  0x59   : > { %p7843_p4 = pneg %p7842_p10 }
  0x5b   : > { %p7848_p9 = pnand %p7847_p1, %p7843_p4 }
  0x5d   : > { %7851 = shalt.err (!%p7848_p9)
}
  0x5e   : > { %s7852_s29 = scalar_lea.vmem %s8163_s4, 1792  ;;  %s7949_s27 = smov [#allocation2]  }
  0x5f   : > { %p7853_p13 = scmp.ne.s32.totalorder %s8163_s4, %s7852_s29  ;;  %s7857_s28 = sshll.u32 %s7949_s27, 4  ;;  %s7858_s28 = int_to_ptr.vmem [resolvable:$false] %s7857_s28 }
  0x60   : > { %s7859_s9 = scalar_lea.vmem %s7858_s28, 3584  ;;  %p7860_p5 = scmp.lt.s32.totalorder %s8163_s4, %s7858_s28 }
  0x61   : > { %p7855_p2 = pnand %p7853_p13, %p7841_p3  ;;  %p7861_p10 = scmp.lt.s32.totalorder %s7859_s9, %s7852_s29 }
  0x63   : > { %p7856_p0 = pneg %p7855_p2  ;;  %p7862_p6 = por %p7861_p10, %p7860_p5 }
  0x65   : > { %p7863_p8 = pnand %p7862_p6, %p7856_p0 }
  0x67   : > { %7866 = shalt.err (!%p7863_p8)
}
  0x68   : > { %s7950_s8 = smov 256   ;;  %s7951_s10 = smov 16  }
  0x69   : > { %7148 = dma.hbm_to_vmem [thread:$0]  (!%p8154_p11), %s8161_s15, 1792, %s8163_s4, %s8165_s5, %s7950_s8, %s7950_s8, %s7951_s10  }
  0x6a   : > { %p10616_p3 = scmp.ne.s32.totalorder %s10606_s26, 0 }
  0x6c   : > { %525 = sbr.rel (%p10616_p3) target bundleno = 2223 (0x8af), region = 80 }
  0x71   : > { %s8189_s23 = sand.u32 1, %s7931_s19   ;;  %p10617_p8 = scmp.ne.s32.totalorder %s10603_s24, 0 }
  0x72   : > { %s7110_s16 = smul.u32 112, %s8189_s23  ;;  %s528_s30 = scalar_lea.sflag [#allocation3], %s8189_s23 }
  0x74   : > { %s8193_s29 = scalar_lea.vmem [#allocation2], %s7110_s16 }
  0x75   : > { %7910 = dma.done.wait (%p10617_p8), %s528_s30, 1792  }
  0x76   : > { %7912 = vsyncadd (%p10617_p8), %s528_s30, 4294965504  ;;  %p10618_p6 = scmp.eq.s32.totalorder %s8067_s22, 0 }
  0x78   : > { %7914 = dma.done.wait (%p10618_p6), [#allocation6], 1024   ;;  %p10619_p11 = pmov %p10618_p6 }
  0x79   : > { %p10620_p4 = pmov %p10618_p6 }
  0x7a   : > { %7916 = vsyncadd (%p10619_p11), [#allocation6], 4294966272 }
  0x7b   : > { %7918 = dma.done.wait (%p10620_p4), [#allocation9], 2048   ;;  %p10621_p7 = pmov %p10620_p4 }
  0x7c   : > { %s605_s4 = smul.u32 7, %s8067_s22  ;;  %v7218_v0 = vld [vmem:[#allocation5 + $0x18] sm:$0xff]   ;;  %v7219_v1 = vld [vmem:[%s10530_s3 + $0x50c] ss:$28 sps:$4 sm:$0xff]   ;;  %v7222_v3 = vld [vmem:[#allocation5 + $0x10] sm:$0xff]   ;;  %vm697_vm0 = vcmask 523264  }
  0x7d   : > { %7920 = vsyncadd (%p10621_p7), [#allocation9], 4294965248  ;;  %6797 = vmatprep.subr.bf16.mxu1 %v7218_v0  ;;  %v7221_v2 = vld [vmem:[%s10530_s3 + $0x508] ss:$28 sps:$4 sm:$0xff]   ;;  %2159 = vmatprep.subr.bf16.mxu0 %v7219_v1  ;;  %v7223_v4 = vld [vmem:[%s10530_s3 + $0x4d4] ss:$28 sps:$4 sm:$0xff]  }
  0x7e   : > { %p606_p12 = scmp.lt.s32.totalorder %s605_s4, 13  ;;  %6798 = vmatpush3.bf16.msra.mxu1 %v7218_v0  ;;  %2160 = vmatpush1.bf16.msra.mxu0 %v7221_v2  ;;  %v7225_v5 = vld [vmem:[%s10530_s3 + $0x4d0] ss:$28 sps:$4 sm:$0xff]   ;;  %v7227_v7 = vld [vmem:[%s10530_s3 + $0x49c] ss:$28 sps:$4 sm:$0xff]   ;;  %v7230_v9 = vld [vmem:[#allocation5] sm:$0xff]  }
  0x7f   : > { %6799 = vmatprep.subr.bf16.mxu1 %v7222_v3  ;;  %v7226_v6 = vld [vmem:[#allocation5 + $0x8] sm:$0xff]   ;;  %2161 = vmatprep.subr.bf16.mxu0 %v7223_v4  ;;  %v7229_v8 = vld [vmem:[%s10530_s3 + $0x498] ss:$28 sps:$4 sm:$0xff]   ;;  %v7231_v10 = vld [vmem:[%s10530_s3 + $0x464] ss:$28 sps:$4 sm:$0xff]   ;;  %s7954_s30 = smov 64  }
  0x80   : > { %s10779_s4 = smov (!%p606_p12, %s605_s4), 13  ;;  %v7233_v12 = vld [vmem:[%s10530_s3 + $0x460] ss:$28 sps:$4 sm:$0xff]   ;;  %v7237_v13 = vld [vmem:[%s10530_s3 + $0x18c] ss:$28 sps:$4 sm:$0xff]   ;;  %vm7955_vm1 = vmmov 0  }
  0x81   : > { %s5944_s15 = sshll.u32 %s10779_s4, 2  ;;  %v7238_v15 = vld [vmem:[%s10530_s3 + $0x42c] ss:$28 sps:$4 sm:$0xff]   ;;  %v7244_v18 = vld [vmem:[%s10530_s3 + $0x154] ss:$28 sps:$4 sm:$0xff]   ;;  %vm3713_vm2 = vcmask 1043456  }
  0x82   : > { %s8231_s24 = scalar_lea.vmem %s10528_s1, %s5944_s15  ;;  %6800 = vmatpush3.bf16.msra.mxu1 %v7222_v3  ;;  %2162 = vmatpush1.bf16.msra.mxu0 %v7225_v5  ;;  %v7235_v16 = vld [vmem:[%s10530_s3 + $0x188] ss:$28 sps:$4 sm:$0xff]   ;;  %v7245_v19 = vld [vmem:[%s10530_s3 + $0x3f4] ss:$28 sps:$4 sm:$0xff]   ;;  %v7250_v22 = vld [vmem:[%s10530_s3 + $0x11c] ss:$28 sps:$4 sm:$0xff]   ;;  %s8908_s10 = scalar_lea.vmem %s10529_s2, %s5944_s15 }
  0x83   : > { %6801 = vmatprep.subr.bf16.mxu1 %v7226_v6  ;;  %2163 = vmatprep.subr.bf16.mxu0 %v7227_v7  ;;  %v8240_v11 = vld [vmem:[%s8231_s24] sm:$0xff]   ;;  %v8249_v14 = vld [vmem:[%s8231_s24 + $0x8] sm:$0xff]   ;;  %v7251_v23 = vld [vmem:[%s10530_s3 + $0x3bc] ss:$28 sps:$4 sm:$0xff]   ;;  %vm3700_vm3 = vcmask 64512   ;;  %vm4021_vm5 = vcmask 1041408  }
  0x84   : > { %6805 = vmatprep.mubr.msk.bf16.mxu1 %vm697_vm0, %v8240_v11  ;;  %v7241_v17 = vld [vmem:[%s10530_s3 + $0x428] ss:$28 sps:$4 sm:$0xff]   ;;  %v7242_v20 = vld [vmem:[%s10530_s3 + $0x150] ss:$28 sps:$4 sm:$0xff]   ;;  %v7248_v24 = vld [vmem:[%s10530_s3 + $0x118] ss:$28 sps:$4 sm:$0xff]  }
  0x85   : > { %v7247_v21 = vld [vmem:[%s10530_s3 + $0x3f0] ss:$28 sps:$4 sm:$0xff]   ;;  %v7253_v25 = vld [vmem:[%s10530_s3 + $0x3b8] ss:$28 sps:$4 sm:$0xff]   ;;  %v7256_v26 = vld [vmem:[%s10530_s3 + $0xe4] ss:$28 sps:$4 sm:$0xff]  }
  0x86   : > { %6802 = vmatpush3.bf16.msra.mxu1 %v7226_v6  ;;  %2164 = vmatpush1.bf16.msra.mxu0 %v7229_v8  ;;  %v7257_v27 = vld [vmem:[%s10530_s3 + $0x384] ss:$28 sps:$4 sm:$0xff]   ;;  %v7262_v30 = vld [vmem:[%s10530_s3 + $0xac] ss:$28 sps:$4 sm:$0xff]   ;;  %v7268_v34 = vld [vmem:[%s10530_s3 + $0x74] ss:$28 sps:$4 sm:$0xff]  }
  0x87   : > { %6803 = vmatprep.subr.bf16.mxu1 %v7230_v9  ;;  %2165 = vmatprep.subr.bf16.mxu0 %v7231_v10  ;;  %v7254_v28 = vld [vmem:[%s10530_s3 + $0xe0] ss:$28 sps:$4 sm:$0xff]   ;;  %v7260_v31 = vld [vmem:[%s10530_s3 + $0xa8] ss:$28 sps:$4 sm:$0xff]   ;;  %v7269_v36 = vld [vmem:[%s10530_s3 + $0x5b4] ss:$28 sps:$4 sm:$0xff]  }
  0x88   : > { %v7259_v29 = vld [vmem:[%s10530_s3 + $0x380] ss:$28 sps:$4 sm:$0xff]   ;;  %v7263_v32 = vld [vmem:[%s10530_s3 + $0x5ec] ss:$28 sps:$4 sm:$0xff]   ;;  %v7272_v41 = vld [vmem:[%s10530_s3 + $0x38] ss:$28 sps:$4 sm:$0xff]  }
  0x89   : > { %v7265_v33 = vld [vmem:[%s10530_s3 + $0x5e8] ss:$28 sps:$4 sm:$0xff]   ;;  %v8316_v35 = vld [vmem:[%s8193_s29 + $0xc] ss:$16 sps:$4 sm:$0xff]   ;;  %v7277_v42 = vld [vmem:[%s10530_s3 + $0x578] ss:$28 sps:$4 sm:$0xff]  }
  0x8a   : > { %6804 = vmatpush3.bf16.msra.mxu1 %v7230_v9  ;;  %2166 = vmatpush1.bf16.msra.mxu0 %v7233_v12  ;;  %v7266_v37 = vld [vmem:[%s10530_s3 + $0x70] ss:$28 sps:$4 sm:$0xff]   ;;  %v7274_v39 = vld [vmem:[%s10530_s3 + $0x3c] ss:$28 sps:$4 sm:$0xff]   ;;  %v7280_v43 = vld [vmem:[%s10530_s3 + $0x4] ss:$28 sps:$4 sm:$0xff]  }
  0x8b   : > { %2088 = vmatprep.subr.bf16.mxu1 %v7237_v13  ;;  %2167 = vmatprep.subr.bf16.mxu0 %v7238_v15  ;;  %v7271_v38 = vld [vmem:[%s10530_s3 + $0x5b0] ss:$28 sps:$4 sm:$0xff]   ;;  %v7275_v40 = vld [vmem:[%s10530_s3 + $0x57c] ss:$28 sps:$4 sm:$0xff]   ;;  %v7281_v44 = vld [vmem:[%s10530_s3 + $0x544] ss:$28 sps:$4 sm:$0xff]  }
  0x8c   : > { %6170 = vmatprep.mubr.msk.bf16.mxu0 %vm697_vm0, %v8316_v35  ;;  %v7278_v45 = vld [vmem:[%s10530_s3] ss:$28 sps:$4 sm:$0xff]   ;;  %v7288_v47 = vld [vmem:[%s10530_s3 + $0x34c] ss:$28 sps:$4 sm:$0xff]   ;;  %v7292_v49 = vld [vmem:[%s10530_s3 + $0x194] ss:$28 sps:$4 sm:$0xff]  }
  0x8d   : > { %6806 = vmatmul.mubr.msk.bf16.vlgmr.msra.gmra.mxu1 %vm697_vm0, %v8249_v14  ;;  %v7283_v46 = vld [vmem:[%s10530_s3 + $0x540] ss:$28 sps:$4 sm:$0xff]   ;;  %v7286_v48 = vld [vmem:[%s10530_s3 + $0x348] ss:$28 sps:$4 sm:$0xff]   ;;  %v7290_v51 = vld [vmem:[%s10530_s3 + $0x190] ss:$28 sps:$4 sm:$0xff]  }
  0x8e   : > { %2089 = vmatpush1.bf16.msra.mxu1 %v7235_v16  ;;  %2168 = vmatpush1.bf16.msra.mxu0 %v7241_v17  ;;  %v8363_v50 = vld [vmem:[%s8193_s29 + $0x8] ss:$16 sps:$4 sm:$0xff]   ;;  %v7295_v52 = vld [vmem:[%s10530_s3 + $0x314] ss:$28 sps:$4 sm:$0xff]   ;;  %v7304_v60 = vld [vmem:[%s10530_s3 + $0x124] ss:$28 sps:$4 sm:$0xff]  }
  0x8f   : > { %2090 = vmatprep.subr.bf16.mxu1 %v7244_v18  ;;  %2169 = vmatprep.subr.bf16.mxu0 %v7245_v19  ;;  %v7298_v53 = vld [vmem:[%s10530_s3 + $0x15c] ss:$28 sps:$4 sm:$0xff]   ;;  %v8375_v54 = vld [vmem:[%s8231_s24 + $0x10] sm:$0xff]   ;;  %v7307_v0 = vld [vmem:[%s10530_s3 + $0x2a4] ss:$28 sps:$4 sm:$0xff]   ;;  %s7956_s16 = smov 120  }
  0x90   : > { %v625_v55 = vld [vmem:[%s8231_s24 + $0x18] sm:$0xf]  ;;  %v7293_v57 = vld [vmem:[%s10530_s3 + $0x310] ss:$28 sps:$4 sm:$0xff]   ;;  %6809 = vmatprep.mubr.msk.bf16.mxu1 %vm697_vm0, %v8375_v54  ;;  %v7302_v62 = vld [vmem:[%s10530_s3 + $0x120] ss:$28 sps:$4 sm:$0xff]  }
  0x91   : > { %v8378_v56 = vcombine.low %v625_v55, %v625_v55  ;;  %v7296_v58 = vld [vmem:[%s10530_s3 + $0x158] ss:$28 sps:$4 sm:$0xff]   ;;  %v7310_v1 = vld [vmem:[%s10530_s3 + $0xec] ss:$28 sps:$4 sm:$0xff]   ;;  %v7305_v2 = vld [vmem:[%s10530_s3 + $0x2a0] ss:$28 sps:$4 sm:$0xff]  }
  0x92   : > { %2091 = vmatpush1.bf16.msra.mxu1 %v7242_v20  ;;  %2170 = vmatpush1.bf16.msra.mxu0 %v7247_v21  ;;  %v7301_v59 = vld [vmem:[%s10530_s3 + $0x2dc] ss:$28 sps:$4 sm:$0xff]   ;;  %v8404_v63 = vld [vmem:[%s8193_s29 + $0x4] ss:$16 sps:$4 sm:$0xff]   ;;  %v7313_v6 = vld [vmem:[%s10530_s3 + $0x26c] ss:$28 sps:$4 sm:$0xff]  }
  0x93   : > { %2092 = vmatprep.subr.bf16.mxu1 %v7250_v22  ;;  %2171 = vmatprep.subr.bf16.mxu0 %v7251_v23  ;;  %v7299_v61 = vld [vmem:[%s10530_s3 + $0x2d8] ss:$28 sps:$4 sm:$0xff]   ;;  %v7308_v3 = vld [vmem:[%s10530_s3 + $0xe8] ss:$28 sps:$4 sm:$0xff]   ;;  %v8420_v4 = vld [vmem:[%s8193_s29 + $0x2c] ss:$16 sps:$4 sm:$0xff]  }
  0x94   : > { %v8423_v5 = vld [vmem:[%s8193_s29 + $0x28] ss:$16 sps:$4 sm:$0xff]   ;;  %v7316_v7 = vld [vmem:[%s10530_s3 + $0xb4] ss:$28 sps:$4 sm:$0xff]   ;;  %v8453_v16 = vld [vmem:[%s8193_s29 + $0x4c] ss:$16 sps:$4 sm:$0xff]  }
  0x95   : > { %6810 = vmatmul.mubr.msk.bf16.gmra.mxu1 %vm697_vm0, %v8378_v56  ;;  %v7311_v8 = vld [vmem:[%s10530_s3 + $0x268] ss:$28 sps:$4 sm:$0xff]   ;;  %v7314_v9 = vld [vmem:[%s10530_s3 + $0xb0] ss:$28 sps:$4 sm:$0xff]   ;;  %v7322_v12 = vld [vmem:[%s10530_s3 + $0x7c] ss:$28 sps:$4 sm:$0xff]  }
  0x96   : > { %2093 = vmatpush1.bf16.msra.mxu1 %v7248_v24  ;;  %2172 = vmatpush1.bf16.msra.mxu0 %v7253_v25  ;;  %v7319_v10 = vld [vmem:[%s10530_s3 + $0x234] ss:$28 sps:$4 sm:$0xff]   ;;  %v8456_v17 = vld [vmem:[%s8193_s29 + $0x48] ss:$16 sps:$4 sm:$0xff]   ;;  %v7330_v19 = vld [vmem:[%s10530_s3 + $0x44] ss:$28 sps:$4 sm:$0xff]  }
  0x97   : > { %2094 = vmatprep.subr.bf16.mxu1 %v7256_v26  ;;  %2173 = vmatprep.subr.bf16.mxu0 %v7257_v27  ;;  %v7317_v13 = vld [vmem:[%s10530_s3 + $0x230] ss:$28 sps:$4 sm:$0xff]   ;;  %v7320_v15 = vld [vmem:[%s10530_s3 + $0x78] ss:$28 sps:$4 sm:$0xff]   ;;  %v7328_v21 = vld [vmem:[%s10530_s3 + $0x40] ss:$28 sps:$4 sm:$0xff]  }
  0x98   : > { %2120 = vmatprep.mubr.bf16.mxu1 %v8404_v63  ;;  %v7327_v18 = vld [vmem:[%s10530_s3 + $0x1fc] ss:$28 sps:$4 sm:$0xff]   ;;  %v7333_v22 = vld [vmem:[%s10530_s3 + $0x1c4] ss:$28 sps:$4 sm:$0xff]   ;;  %v7336_v23 = vld [vmem:[%s10530_s3 + $0xc] ss:$28 sps:$4 sm:$0xff]  }
  0x99   : > { %v7325_v20 = vld [vmem:[%s10530_s3 + $0x1f8] ss:$28 sps:$4 sm:$0xff]   ;;  %v7331_v24 = vld [vmem:[%s10530_s3 + $0x1c0] ss:$28 sps:$4 sm:$0xff]   ;;  %v7334_v26 = vld [vmem:[%s10530_s3 + $0x8] ss:$28 sps:$4 sm:$0xff]  }
  0x9a   : > { %2095 = vmatpush1.bf16.msra.mxu1 %v7254_v28  ;;  %2174 = vmatpush1.bf16.msra.mxu0 %v7259_v29  ;;  %v639_v25 = vld [vmem:[%s8193_s29 + $0x68] sm:$0xff]  ;;  %v7345_v29 = vld [vmem:[%s10530_s3 + $0x514] ss:$28 sps:$4 sm:$0xff]   ;;  %s7957_s4 = smov 124   ;;  %s7958_s15 = smov 104   ;;  %vm3999_vm12 = vcmask 31744  }
  0x9b   : > { %2096 = vmatprep.subr.bf16.mxu1 %v7262_v30  ;;  %2183 = vmatprep.subr.bf16.mxu0 %v7263_v32  ;;  %v8486_v27 = vcombine.high %v639_v25, %v639_v25  ;;  %v8488_v28 = vcombine.low %v639_v25, %v639_v25  ;;  %v8494_v30 = vld [vmem:[%s8193_s29] ss:$16 sps:$4 sm:$0xff]   ;;  %v7421_v25 = vld [vmem:[%s10530_s3 + $0x4ac] ss:$28 sps:$4 sm:$0xff]   ;;  %s7959_s5 = smov 116   ;;  %s7960_s26 = smov 112  }
  0x9c   : > { %v7343_v32 = vld [vmem:[%s10530_s3 + $0x510] ss:$28 sps:$4 sm:$0xff]   ;;  %s7961_s25 = smov 108   ;;  %vm4130_vm13 = vcmask 261120   ;;  %s10727_s27 = sld [smem:[#allocation78_spill]]  ;;  %vm5766_vm14 = vcmask 785408  }
  0x9d   : > { %v8566_v55 = vld [vmem:[%s8193_s29 + $0x40] ss:$16 sps:$4 sm:$0xff]   ;;  %p10767_p9 = scmp.ne.s32.totalorder %s10614_s17, 0  ;;  %s7963_s28 = smov [#allocation11]  }
  0x9e   : > { %2097 = vmatpush1.bf16.msra.mxu1 %v7260_v31  ;;  %2184 = vmatpush2.bf16.msra.mxu0 %v7265_v33  ;;  %v7342_v31 = vld [vmem:[%s10530_s3 + $0x354] ss:$28 sps:$4 sm:$0xff]   ;;  %s7871_s9 = sshll.u32 %s7963_s28, 4  ;;  %s7872_s9 = int_to_ptr.vmem [resolvable:$false] %s7871_s9 }
  0x9f   : > { %2098 = vmatprep.subr.bf16.mxu1 %v7268_v34  ;;  %2185 = vmatprep.subr.bf16.mxu0 %v7269_v36  ;;  %v8506_v33 = vld [vmem:[%s8193_s29 + $0x24] ss:$16 sps:$4 sm:$0xff]   ;;  %v7340_v34 = vld [vmem:[%s10530_s3 + $0x350] ss:$28 sps:$4 sm:$0xff]   ;;  %v7354_v36 = vld [vmem:[%s10530_s3 + $0x4dc] ss:$28 sps:$4 sm:$0xff]  }
  0xa2   : > { %2099 = vmatpush1.bf16.msra.mxu1 %v7266_v37  ;;  %2186 = vmatpush2.bf16.msra.mxu0 %v7271_v38  ;;  %v7351_v37 = vld [vmem:[%s10530_s3 + $0x31c] ss:$28 sps:$4 sm:$0xff]  }
  0xa3   : > { %2100 = vmatprep.subr.bf16.mxu1 %v7274_v39  ;;  %2187 = vmatprep.subr.bf16.mxu0 %v7275_v40  ;;  %v7352_v38 = vld [vmem:[%s10530_s3 + $0x4d8] ss:$28 sps:$4 sm:$0xff]   ;;  %v7363_v40 = vld [vmem:[%s10530_s3 + $0x4a4] ss:$28 sps:$4 sm:$0xff]  }
  0xa4   : > { %v7349_v39 = vld [vmem:[%s10530_s3 + $0x318] ss:$28 sps:$4 sm:$0xff]  }
  0xa6   : > { %2101 = vmatpush1.bf16.msra.mxu1 %v7272_v41  ;;  %2188 = vmatpush2.bf16.msra.mxu0 %v7277_v42  ;;  %v8530_v41 = vld [vmem:[%s8193_s29 + $0x20] ss:$16 sps:$4 sm:$0xff]  }
  0xa7   : > { %2102 = vmatprep.subr.bf16.mxu1 %v7280_v43  ;;  %2189 = vmatprep.subr.bf16.mxu0 %v7281_v44  ;;  %v7360_v42 = vld [vmem:[%s10530_s3 + $0x2e4] ss:$28 sps:$4 sm:$0xff]  }
  0xa8   : > { %v7361_v43 = vld [vmem:[%s10530_s3 + $0x4a0] ss:$28 sps:$4 sm:$0xff]   ;;  %v8539_v44 = vld [vmem:[%s8193_s29 + $0x44] ss:$16 sps:$4 sm:$0xff]  }
  0xaa   : > { %2103 = vmatpush1.bf16.msra.mxu1 %v7278_v45  ;;  %2190 = vmatpush2.bf16.msra.mxu0 %v7283_v46  ;;  %v7358_v45 = vld [vmem:[%s10530_s3 + $0x2e0] ss:$28 sps:$4 sm:$0xff]   ;;  %v7372_v46 = vld [vmem:[%s10530_s3 + $0x46c] ss:$28 sps:$4 sm:$0xff]  }
  0xab   : > { %2104 = vmatprep.subr.bf16.mxu1 %v7288_v47  ;;  %2230 = vmatprep.subr.bf16.mxu0 %v7292_v49  ;;  %v7369_v47 = vld [vmem:[%s10530_s3 + $0x2ac] ss:$28 sps:$4 sm:$0xff]  }
  0xac   : > { %v7370_v49 = vld [vmem:[%s10530_s3 + $0x468] ss:$28 sps:$4 sm:$0xff]  }
  0xad   : > { %2192 = vmatmul.mubr.bf16.vlgmr.msra.gmra.mxu0 %v8363_v50 }
  0xae   : > { %2105 = vmatpush2.bf16.msra.mxu1 %v7286_v48  ;;  %2231 = vmatpush1.bf16.msra.mxu0 %v7290_v51  ;;  %v7367_v48 = vld [vmem:[%s10530_s3 + $0x2a8] ss:$28 sps:$4 sm:$0xff]   ;;  %v7381_v51 = vld [vmem:[%s10530_s3 + $0x434] ss:$28 sps:$4 sm:$0xff]  }
  0xaf   : > { %2106 = vmatprep.subr.bf16.mxu1 %v7295_v52  ;;  %2232 = vmatprep.subr.bf16.mxu0 %v7298_v53  ;;  %v638_v52 = vld [vmem:[%s8193_s29 + $0x60] sm:$0xff] }
  0xb0   : > { %6171 = vmatprep.mubr.msk.bf16.mxu0 %vm697_vm0, %v8420_v4  ;;  %v7378_v53 = vld [vmem:[%s10530_s3 + $0x274] ss:$28 sps:$4 sm:$0xff]  }
  0xb2   : > { %2107 = vmatpush2.bf16.msra.mxu1 %v7293_v57  ;;  %2233 = vmatpush1.bf16.msra.mxu0 %v7296_v58  ;;  %v7379_v57 = vld [vmem:[%s10530_s3 + $0x430] ss:$28 sps:$4 sm:$0xff]   ;;  %v8571_v58 = vcombine.high %v638_v52, %v638_v52 }
  0xb3   : > { %2108 = vmatprep.subr.bf16.mxu1 %v7301_v59  ;;  %2234 = vmatprep.subr.bf16.mxu0 %v7304_v60  ;;  %v7376_v59 = vld [vmem:[%s10530_s3 + $0x270] ss:$28 sps:$4 sm:$0xff]   ;;  %v7389_v60 = vld [vmem:[%s10530_s3 + $0x3fc] ss:$28 sps:$4 sm:$0xff]  }
  0xb5   : > { %2202 = vmatmul.mubr.bf16.gmra.mxu0 %v8423_v5 }
  0xb6   : > { %2109 = vmatpush2.bf16.msra.mxu1 %v7299_v61  ;;  %2235 = vmatpush1.bf16.msra.mxu0 %v7302_v62  ;;  %v7386_v61 = vld [vmem:[%s10530_s3 + $0x23c] ss:$28 sps:$4 sm:$0xff]  }
  0xb7   : > { %2110 = vmatprep.subr.bf16.mxu1 %v7307_v0  ;;  %2236 = vmatprep.subr.bf16.mxu0 %v7310_v1  ;;  %v7387_v62 = vld [vmem:[%s10530_s3 + $0x3f8] ss:$28 sps:$4 sm:$0xff]   ;;  %v7397_v1 = vld [vmem:[%s10530_s3 + $0x3c4] ss:$28 sps:$4 sm:$0xff]  }
  0xb8   : > { %6172 = vmatprep.mubr.msk.bf16.mxu0 %vm697_vm0, %v8453_v16  ;;  %v7384_v0 = vld [vmem:[%s10530_s3 + $0x238] ss:$28 sps:$4 sm:$0xff]  }
  0xba   : > { %2111 = vmatpush2.bf16.msra.mxu1 %v7305_v2  ;;  %2237 = vmatpush1.bf16.msra.mxu0 %v7308_v3  ;;  %v7394_v2 = vld [vmem:[%s10530_s3 + $0x204] ss:$28 sps:$4 sm:$0xff]   ;;  %v8596_v3 = vcombine.low %v638_v52, %v638_v52  ;;  %v7454_v52 = vld [vmem:[%s10530_s3 + $0xbc] ss:$28 sps:$4 sm:$0xff]  }
  0xbb   : > { %2112 = vmatprep.subr.bf16.mxu1 %v7313_v6  ;;  %2238 = vmatprep.subr.bf16.mxu0 %v7316_v7  ;;  %v7395_v6 = vld [vmem:[%s10530_s3 + $0x3c0] ss:$28 sps:$4 sm:$0xff]  }
  0xbc   : > { %v7392_v7 = vld [vmem:[%s10530_s3 + $0x200] ss:$28 sps:$4 sm:$0xff]  }
  0xbd   : > { %2212 = vmatmul.mubr.bf16.gmra.mxu0 %v8456_v17 }
  0xbe   : > { %2113 = vmatpush2.bf16.msra.mxu1 %v7311_v8  ;;  %2239 = vmatpush1.bf16.msra.mxu0 %v7314_v9  ;;  %v7403_v8 = vld [vmem:[%s10530_s3 + $0x38c] ss:$28 sps:$4 sm:$0xff]  }
  0xbf   : > { %2114 = vmatprep.subr.bf16.mxu1 %v7319_v10  ;;  %2240 = vmatprep.subr.bf16.mxu0 %v7322_v12  ;;  %v7400_v9 = vld [vmem:[%s10530_s3 + $0x1cc] ss:$28 sps:$4 sm:$0xff]  }
  0xc0   : > { %6173 = vmatprep.mubr.msk.bf16.mxu0 %vm697_vm0, %v8486_v27  ;;  %v7401_v10 = vld [vmem:[%s10530_s3 + $0x388] ss:$28 sps:$4 sm:$0xff]  }
  0xc1   : > { %v7398_v12 = vld [vmem:[%s10530_s3 + $0x1c8] ss:$28 sps:$4 sm:$0xff]  }
  0xc2   : > { %2115 = vmatpush2.bf16.msra.mxu1 %v7317_v13  ;;  %2241 = vmatpush1.bf16.msra.mxu0 %v7320_v15  ;;  %v7406_v13 = vld [vmem:[%s10530_s3 + $0x5f4] ss:$28 sps:$4 sm:$0xff]   ;;  %v7409_v15 = vld [vmem:[%s10530_s3 + $0x51c] ss:$28 sps:$4 sm:$0xff]  }
  0xc3   : > { %2116 = vmatprep.subr.bf16.mxu1 %v7327_v18  ;;  %2242 = vmatprep.subr.bf16.mxu0 %v7330_v19  ;;  %v7404_v18 = vld [vmem:[%s10530_s3 + $0x5f0] ss:$28 sps:$4 sm:$0xff]   ;;  %v7407_v19 = vld [vmem:[%s10530_s3 + $0x518] ss:$28 sps:$4 sm:$0xff]  }
  0xc5   : > { %2222 = vmatmul.mubr.bf16.gmra.mxu0 %v8488_v28 }
  0xc6   : > { %2117 = vmatpush2.bf16.msra.mxu1 %v7325_v20  ;;  %2243 = vmatpush1.bf16.msra.mxu0 %v7328_v21  ;;  %v7412_v20 = vld [vmem:[%s10530_s3 + $0x5bc] ss:$28 sps:$4 sm:$0xff]   ;;  %v7415_v21 = vld [vmem:[%s10530_s3 + $0x4e4] ss:$28 sps:$4 sm:$0xff]  }
  0xc7   : > { %2118 = vmatprep.subr.bf16.mxu1 %v7333_v22  ;;  %2244 = vmatprep.subr.bf16.mxu0 %v7336_v23  ;;  %v7410_v22 = vld [vmem:[%s10530_s3 + $0x5b8] ss:$28 sps:$4 sm:$0xff]   ;;  %v7413_v23 = vld [vmem:[%s10530_s3 + $0x4e0] ss:$28 sps:$4 sm:$0xff]  }
  0xc8   : > { %2262 = vmatprep.mubr.bf16.mxu0 %v8404_v63 }
  0xca   : > { %2119 = vmatpush2.bf16.msra.mxu1 %v7331_v24  ;;  %2245 = vmatpush1.bf16.msra.mxu0 %v7334_v26  ;;  %v7418_v24 = vld [vmem:[%s10530_s3 + $0x584] ss:$28 sps:$4 sm:$0xff]  }
  0xcb   : > { %2301 = vmatprep.subr.bf16.mxu1 %v7345_v29  ;;  %2246 = vmatprep.subr.bf16.mxu0 %v7342_v31  ;;  %v7416_v26 = vld [vmem:[%s10530_s3 + $0x580] ss:$28 sps:$4 sm:$0xff]   ;;  %v7419_v29 = vld [vmem:[%s10530_s3 + $0x4a8] ss:$28 sps:$4 sm:$0xff]   ;;  %v7427_v31 = vld [vmem:[%s10530_s3 + $0x474] ss:$28 sps:$4 sm:$0xff]  }
  0xcd   : > { %2121 = vmatmul.mubr.bf16.vlgmr.msra.gmra.mxu1 %v8494_v30 }
  0xce   : > { %2302 = vmatpush1.bf16.msra.mxu1 %v7343_v32  ;;  %2130 = vmatprep.mubr.bf16.mxu1 %v8506_v33  ;;  %v7422_v32 = vld [vmem:[%s10530_s3 + $0x548] ss:$28 sps:$4 sm:$0xff]  }
  0xcf   : > { %2247 = vmatpush2.bf16.msra.mxu0 %v7340_v34  ;;  %2303 = vmatprep.subr.bf16.mxu1 %v7354_v36  ;;  %v7430_v34 = vld [vmem:[%s10530_s3 + $0x19c] ss:$28 sps:$4 sm:$0xff]  }
  0xd0   : > { %2248 = vmatprep.subr.bf16.mxu0 %v7351_v37  ;;  %v7433_v36 = vld [vmem:[%s10530_s3 + $0x43c] ss:$28 sps:$4 sm:$0xff]  }
  0xd1   : > { %v7428_v37 = vld [vmem:[%s10530_s3 + $0x198] ss:$28 sps:$4 sm:$0xff]  }
  0xd2   : > { %2304 = vmatpush1.bf16.msra.mxu1 %v7352_v38  ;;  %v7431_v38 = vld [vmem:[%s10530_s3 + $0x438] ss:$28 sps:$4 sm:$0xff]  }
  0xd3   : > { %2249 = vmatpush2.bf16.msra.mxu0 %v7349_v39  ;;  %2305 = vmatprep.subr.bf16.mxu1 %v7363_v40  ;;  %v7436_v39 = vld [vmem:[%s10530_s3 + $0x164] ss:$28 sps:$4 sm:$0xff]  }
  0xd4   : > { %2250 = vmatprep.subr.bf16.mxu0 %v7360_v42  ;;  %v7439_v40 = vld [vmem:[%s10530_s3 + $0x404] ss:$28 sps:$4 sm:$0xff]  }
  0xd5   : > { %2131 = vmatmul.mubr.bf16.gmra.mxu1 %v8530_v41  ;;  %v7437_v42 = vld [vmem:[%s10530_s3 + $0x400] ss:$28 sps:$4 sm:$0xff]  }
  0xd6   : > { %2306 = vmatpush1.bf16.msra.mxu1 %v7361_v43  ;;  %2140 = vmatprep.mubr.bf16.mxu1 %v8539_v44  ;;  %v7442_v43 = vld [vmem:[%s10530_s3 + $0x12c] ss:$28 sps:$4 sm:$0xff]  }
  0xd7   : > { %2251 = vmatpush2.bf16.msra.mxu0 %v7358_v45  ;;  %2307 = vmatprep.subr.bf16.mxu1 %v7372_v46  ;;  %v7440_v45 = vld [vmem:[%s10530_s3 + $0x128] ss:$28 sps:$4 sm:$0xff]  }
  0xd8   : > { %2252 = vmatprep.subr.bf16.mxu0 %v7369_v47  ;;  %v7443_v46 = vld [vmem:[%s10530_s3 + $0x3c8] ss:$28 sps:$4 sm:$0xff]   ;;  %v7448_v47 = vld [vmem:[%s10530_s3 + $0xf4] ss:$28 sps:$4 sm:$0xff]  }
  0xda   : > { %2308 = vmatpush1.bf16.msra.mxu1 %v7370_v49  ;;  %v7446_v49 = vld [vmem:[%s10530_s3 + $0xf0] ss:$28 sps:$4 sm:$0xff]  }
  0xdb   : > { %2253 = vmatpush2.bf16.msra.mxu0 %v7367_v48  ;;  %2309 = vmatprep.subr.bf16.mxu1 %v7381_v51  ;;  %v7451_v48 = vld [vmem:[%s10530_s3 + $0x394] ss:$28 sps:$4 sm:$0xff]  }
  0xdc   : > { %2254 = vmatprep.subr.bf16.mxu0 %v7378_v53  ;;  %v7449_v51 = vld [vmem:[%s10530_s3 + $0x390] ss:$28 sps:$4 sm:$0xff]   ;;  %v7457_v53 = vld [vmem:[%s10530_s3 + $0x5fc] ss:$28 sps:$4 sm:$0xff]  }
  0xdd   : > { %2141 = vmatmul.mubr.bf16.gmra.mxu1 %v8566_v55 }
  0xde   : > { %2310 = vmatpush1.bf16.msra.mxu1 %v7379_v57  ;;  %2150 = vmatprep.mubr.bf16.mxu1 %v8571_v58  ;;  %v7455_v57 = vld [vmem:[%s10530_s3 + $0x5f8] ss:$28 sps:$4 sm:$0xff]  }
  0xdf   : > { %2255 = vmatpush2.bf16.msra.mxu0 %v7376_v59  ;;  %2311 = vmatprep.subr.bf16.mxu1 %v7389_v60  ;;  %v7460_v59 = vld [vmem:[%s10530_s3 + $0x84] ss:$28 sps:$4 sm:$0xff]  }
  0xe0   : > { %2256 = vmatprep.subr.bf16.mxu0 %v7386_v61  ;;  %v7463_v60 = vld [vmem:[%s10530_s3 + $0x5c4] ss:$28 sps:$4 sm:$0xff]  }
  0xe1   : > { %v7461_v61 = vld [vmem:[%s10530_s3 + $0x5c0] ss:$28 sps:$4 sm:$0xff]  }
  0xe2   : > { %2312 = vmatpush1.bf16.msra.mxu1 %v7387_v62  ;;  %v7466_v62 = vld [vmem:[%s10530_s3 + $0x4c] ss:$28 sps:$4 sm:$0xff]  }
  0xe3   : > { %2257 = vmatpush2.bf16.msra.mxu0 %v7384_v0  ;;  %2313 = vmatprep.subr.bf16.mxu1 %v7397_v1  ;;  %v7469_v0 = vld [vmem:[%s10530_s3 + $0x58c] ss:$28 sps:$4 sm:$0xff]  }
  0xe4   : > { %2258 = vmatprep.subr.bf16.mxu0 %v7394_v2  ;;  %v7464_v1 = vld [vmem:[%s10530_s3 + $0x48] ss:$28 sps:$4 sm:$0xff]  }
  0xe5   : > { %2151 = vmatmul.mubr.bf16.gmra.mxu1 %v8596_v3  ;;  %v7467_v2 = vld [vmem:[%s10530_s3 + $0x588] ss:$28 sps:$4 sm:$0xff]  }
  0xe6   : > { %2314 = vmatpush1.bf16.msra.mxu1 %v7395_v6  ;;  %6174 = vmatprep.mubr.msk.bf16.mxu1 %vm697_vm0, %v8316_v35  ;;  %v7472_v6 = vld [vmem:[%s10530_s3 + $0x14] ss:$28 sps:$4 sm:$0xff]  }
  0xe7   : > { %2259 = vmatpush2.bf16.msra.mxu0 %v7392_v7  ;;  %2315 = vmatprep.subr.bf16.mxu1 %v7403_v8  ;;  %v7475_v7 = vld [vmem:[%s10530_s3 + $0x554] ss:$28 sps:$4 sm:$0xff]  }
  0xe8   : > { %2260 = vmatprep.subr.bf16.mxu0 %v7400_v9  ;;  %v7470_v8 = vld [vmem:[%s10530_s3 + $0x10] ss:$28 sps:$4 sm:$0xff]  }
  0xe9   : > { %v7473_v9 = vld [vmem:[%s10530_s3 + $0x550] ss:$28 sps:$4 sm:$0xff]  }
  0xea   : > { %2316 = vmatpush1.bf16.msra.mxu1 %v7401_v10  ;;  %v7478_v10 = vld [vmem:[%s10530_s3 + $0x35c] ss:$28 sps:$4 sm:$0xff]  }
  0xeb   : > { %2261 = vmatpush2.bf16.msra.mxu0 %v7398_v12  ;;  %2325 = vmatprep.subr.bf16.mxu1 %v7406_v13  ;;  %v7476_v12 = vld [vmem:[%s10530_s3 + $0x358] ss:$28 sps:$4 sm:$0xff]   ;;  %v7479_v13 = vld [vmem:[%s10530_s3 + $0x360] ss:$28 sps:$4 sm:$0xff]  }
  0xec   : > { %2443 = vmatprep.subr.bf16.mxu0 %v7409_v15  ;;  %v7480_v15 = vld [vmem:[%s10530_s3 + $0x1a0] ss:$28 sps:$4 sm:$0xff]  }
  0xee   : > { %2263 = vmatmul.mubr.bf16.vlgmr.msra.gmra.mxu0 %v8494_v30  ;;  %2326 = vmatpush2.bf16.msra.mxu1 %v7404_v18  ;;  %v7424_v30 = vld [vmem:[%s10530_s3 + $0x54c] ss:$28 sps:$4 sm:$0xff]  }
  0xef   : > { %2444 = vmatpush1.bf16.msra.mxu0 %v7407_v19  ;;  %2327 = vmatprep.subr.bf16.mxu1 %v7412_v20  ;;  %v7484_v18 = vld [vmem:[%s10530_s3 + $0x328] ss:$28 sps:$4 sm:$0xff]   ;;  %v7481_v19 = vld [vmem:[%s10530_s3 + $0x320] ss:$28 sps:$4 sm:$0xff]  }
  0xf0   : > { %2445 = vmatprep.subr.bf16.mxu0 %v7415_v21  ;;  %2272 = vmatprep.mubr.bf16.mxu0 %v8506_v33  ;;  %v7425_v33 = vld [vmem:[%s10530_s3 + $0x470] ss:$28 sps:$4 sm:$0xff]   ;;  %v7485_v20 = vld [vmem:[%s10530_s3 + $0x168] ss:$28 sps:$4 sm:$0xff]  }
  0xf1   : > { %v7488_v21 = vld [vmem:[%s10530_s3 + $0x2ec] ss:$28 sps:$4 sm:$0xff]  }
  0xf2   : > { %2328 = vmatpush2.bf16.msra.mxu1 %v7410_v22  ;;  %v7489_v22 = vld [vmem:[%s10530_s3 + $0x2f0] ss:$28 sps:$4 sm:$0xff]  }
  0xf3   : > { %2446 = vmatpush1.bf16.msra.mxu0 %v7413_v23  ;;  %2329 = vmatprep.subr.bf16.mxu1 %v7418_v24  ;;  %v7486_v23 = vld [vmem:[%s10530_s3 + $0x2e8] ss:$28 sps:$4 sm:$0xff]   ;;  %v7490_v24 = vld [vmem:[%s10530_s3 + $0x130] ss:$28 sps:$4 sm:$0xff]  }
  0xf4   : > { %2447 = vmatprep.subr.bf16.mxu0 %v7421_v25  ;;  %v7494_v25 = vld [vmem:[%s10530_s3 + $0x2b8] ss:$28 sps:$4 sm:$0xff]  }
  0xf6   : > { %2330 = vmatpush2.bf16.msra.mxu1 %v7416_v26  ;;  %2273 = vmatmul.mubr.bf16.gmra.mxu0 %v8530_v41  ;;  %v7434_v41 = vld [vmem:[%s10530_s3 + $0x160] ss:$28 sps:$4 sm:$0xff]   ;;  %v7495_v26 = vld [vmem:[%s10530_s3 + $0xf8] ss:$28 sps:$4 sm:$0xff]  }
  0xf7   : > { %2448 = vmatpush1.bf16.msra.mxu0 %v7419_v29  ;;  %2331 = vmatprep.subr.bf16.mxu1 %v7424_v30  ;;  %v7498_v29 = vld [vmem:[%s10530_s3 + $0x27c] ss:$28 sps:$4 sm:$0xff]  }
  0xf8   : > { %2449 = vmatprep.subr.bf16.mxu0 %v7427_v31  ;;  %2282 = vmatprep.mubr.bf16.mxu0 %v8539_v44  ;;  %v7445_v44 = vld [vmem:[%s10530_s3 + $0x3cc] ss:$28 sps:$4 sm:$0xff]   ;;  %v7499_v30 = vld [vmem:[%s10530_s3 + $0x280] ss:$28 sps:$4 sm:$0xff]   ;;  %v7496_v31 = vld [vmem:[%s10530_s3 + $0x278] ss:$28 sps:$4 sm:$0xff]  }
  0xfa   : > { %2332 = vmatpush2.bf16.msra.mxu1 %v7422_v32  ;;  %v7500_v32 = vld [vmem:[%s10530_s3 + $0xc0] ss:$28 sps:$4 sm:$0xff]  }
  0xfb   : > { %2450 = vmatpush1.bf16.msra.mxu0 %v7425_v33  ;;  %2372 = vmatprep.subr.bf16.mxu1 %v7430_v34  ;;  %v7504_v33 = vld [vmem:[%s10530_s3 + $0x248] ss:$28 sps:$4 sm:$0xff]  }
  0xfc   : > { %2451 = vmatprep.subr.bf16.mxu0 %v7433_v36  ;;  %v7505_v34 = vld [vmem:[%s10530_s3 + $0x88] ss:$28 sps:$4 sm:$0xff]  }
  0xfd   : > { %2334 = vmatmul.mubr.bf16.vlgmr.msra.gmra.mxu1 %v8363_v50  ;;  %v7508_v36 = vld [vmem:[%s10530_s3 + $0x20c] ss:$28 sps:$4 sm:$0xff]  }
  0xfe   : > { %2373 = vmatpush1.bf16.msra.mxu1 %v7428_v37  ;;  %6175 = vmatprep.mubr.msk.bf16.mxu1 %vm697_vm0, %v8420_v4  ;;  %v7509_v37 = vld [vmem:[%s10530_s3 + $0x210] ss:$28 sps:$4 sm:$0xff]  }
  0xff   : > { %2452 = vmatpush1.bf16.msra.mxu0 %v7431_v38  ;;  %2374 = vmatprep.subr.bf16.mxu1 %v7436_v39  ;;  %v7506_v38 = vld [vmem:[%s10530_s3 + $0x208] ss:$28 sps:$4 sm:$0xff]   ;;  %v7513_v39 = vld [vmem:[%s10530_s3 + $0x1d4] ss:$28 sps:$4 sm:$0xff]  }
 0x100   : > { %2453 = vmatprep.subr.bf16.mxu0 %v7439_v40  ;;  %2283 = vmatmul.mubr.bf16.gmra.mxu0 %v8566_v55  ;;  %v7452_v55 = vld [vmem:[%s10530_s3 + $0xb8] ss:$28 sps:$4 sm:$0xff]  }
 0x101   : > { %2292 = vmatprep.mubr.bf16.mxu0 %v8571_v58  ;;  %v7514_v40 = vld [vmem:[%s10530_s3 + $0x1d8] ss:$28 sps:$4 sm:$0xff]  }
 0x102   : > { %2375 = vmatpush1.bf16.msra.mxu1 %v7434_v41  ;;  %v7511_v41 = vld [vmem:[%s10530_s3 + $0x1d0] ss:$28 sps:$4 sm:$0xff]  }
 0x103   : > { %2454 = vmatpush1.bf16.msra.mxu0 %v7437_v42  ;;  %2376 = vmatprep.subr.bf16.mxu1 %v7442_v43  ;;  %v7515_v42 = vld [vmem:[%s10530_s3 + $0x18] ss:$28 sps:$4 sm:$0xff]  }
 0x104   : > { %2455 = vmatprep.subr.bf16.mxu0 %v7445_v44  ;;  %v7516_v43 = vld [vmem:[#allocation7 + $0x18] sm:$0xff]   ;;  %v7719_v44 = vld [vmem:[%s8193_s29 + $0x4] ss:$16 sps:$4 sm:$0xff]  }
 0x105   : > { %2344 = vmatmul.mubr.bf16.gmra.mxu1 %v8423_v5 }
 0x106   : > { %2377 = vmatpush1.bf16.msra.mxu1 %v7440_v45  ;;  %6176 = vmatprep.mubr.msk.bf16.mxu1 %vm697_vm0, %v8453_v16  ;;  %v7517_v45 = vld [vmem:[%s10530_s3 + $0x520] ss:$28 sps:$4 sm:$0xff]  }
 0x107   : > { %2456 = vmatpush1.bf16.msra.mxu0 %v7443_v46  ;;  %2378 = vmatprep.subr.bf16.mxu1 %v7448_v47  ;;  %v7952_v46 = vmov 0   ;;  %v7519_v47 = vld [vmem:[#allocation7 + $0x10] sm:$0xff]  }
 0x108   : > { %2457 = vmatprep.subr.bf16.mxu0 %v7451_v48  ;;  %2293 = vmatmul.mubr.bf16.gmra.mxu0 %v8596_v3  ;;  %v7518_v48 = vld [vmem:[%s10530_s3 + $0x4e8] ss:$28 sps:$4 sm:$0xff]  }
 0x109   : > { %6178 = vmatprep.mubr.msk.bf16.mxu0 %vm697_vm0, %v8316_v35  ;;  %v7458_v35 = vld [vmem:[%s10530_s3 + $0x80] ss:$28 sps:$4 sm:$0xff]  }
 0x10a   : > { %2379 = vmatpush1.bf16.msra.mxu1 %v7446_v49  ;;  %v7720_v49 = vld [vmem:[%s8193_s29] ss:$16 sps:$4 sm:$0xff]  }
 0x10b   : > { %2458 = vmatpush1.bf16.msra.mxu0 %v7449_v51  ;;  %2380 = vmatprep.subr.bf16.mxu1 %v7454_v52  ;;  %v7522_v51 = vld [vmem:[#allocation7 + $0x8] sm:$0xff]   ;;  %v7721_v52 = vld [vmem:[%s8193_s29 + $0x24] ss:$16 sps:$4 sm:$0xff]  }
 0x10c   : > { %2467 = vmatprep.subr.bf16.mxu0 %v7457_v53  ;;  %v7520_v53 = vld [vmem:[%s10530_s3 + $0x4b0] ss:$28 sps:$4 sm:$0xff]  }
 0x10d   : > { %2354 = vmatmul.mubr.bf16.gmra.mxu1 %v8456_v17 }
 0x10e   : > { %2381 = vmatpush1.bf16.msra.mxu1 %v7452_v55  ;;  %6177 = vmatprep.mubr.msk.bf16.mxu1 %vm697_vm0, %v8486_v27  ;;  %v7525_v55 = vld [vmem:[#allocation7] sm:$0xff]  }
 0x10f   : > { %2468 = vmatpush2.bf16.msra.mxu0 %v7455_v57  ;;  %2382 = vmatprep.subr.bf16.mxu1 %v7460_v59  ;;  %v7521_v57 = vld [vmem:[%s10530_s3 + $0x478] ss:$28 sps:$4 sm:$0xff]   ;;  %v7722_v59 = vld [vmem:[%s8193_s29 + $0x20] ss:$16 sps:$4 sm:$0xff]  }
 0x110   : > { %2469 = vmatprep.subr.bf16.mxu0 %v7463_v60  ;;  %v7723_v60 = vld [vmem:[%s8193_s29 + $0x44] ss:$16 sps:$4 sm:$0xff]  }
 0x112   : > { %2383 = vmatpush1.bf16.msra.mxu1 %v7458_v35  ;;  %v7523_v35 = vld [vmem:[%s10530_s3 + $0x440] ss:$28 sps:$4 sm:$0xff]  }
 0x113   : > { %2470 = vmatpush2.bf16.msra.mxu0 %v7461_v61  ;;  %2384 = vmatprep.subr.bf16.mxu1 %v7466_v62  ;;  %v7524_v61 = vld [vmem:[%s10530_s3 + $0x408] ss:$28 sps:$4 sm:$0xff]   ;;  %v7724_v62 = vld [vmem:[%s8193_s29 + $0x40] ss:$16 sps:$4 sm:$0xff]  }
 0x114   : > { %2471 = vmatprep.subr.bf16.mxu0 %v7469_v0  ;;  %v7526_v0 = vld [vmem:[%s10530_s3 + $0x3d0] ss:$28 sps:$4 sm:$0xff]  }
 0x115   : > { %2364 = vmatmul.mubr.bf16.gmra.mxu1 %v8488_v28 }
 0x116   : > { %2385 = vmatpush1.bf16.msra.mxu1 %v7464_v1  ;;  %2404 = vmatprep.mubr.bf16.mxu1 %v8404_v63  ;;  %v7483_v63 = vld [vmem:[%s10530_s3 + $0x324] ss:$28 sps:$4 sm:$0xff]   ;;  %v7527_v1 = vld [vmem:[%s10530_s3 + $0x398] ss:$28 sps:$4 sm:$0xff]  }
 0x117   : > { %2472 = vmatpush2.bf16.msra.mxu0 %v7467_v2  ;;  %2386 = vmatprep.subr.bf16.mxu1 %v7472_v6  ;;  %v7725_v2 = vld [vmem:[%s8193_s29 + $0xc] ss:$16 sps:$4 sm:$0xff]  }
 0x118   : > { %2473 = vmatprep.subr.bf16.mxu0 %v7475_v7 }
 0x11a   : > { %2387 = vmatpush1.bf16.msra.mxu1 %v7470_v8  ;;  %v7726_v8 = vld [vmem:[%s8193_s29 + $0x8] ss:$16 sps:$4 sm:$0xff]  }
 0x11b   : > { %2474 = vmatpush2.bf16.msra.mxu0 %v7473_v9  ;;  %2388 = vmatprep.subr.bf16.mxu1 %v7478_v10 }
 0x11c   : > { %6419 = vmatprep.subr.bf16.mxu0 %v7479_v13 }
 0x11e   : > { %2476 = vmatmul.mubr.bf16.vlgmr.msra.gmra.mxu0 %v8363_v50  ;;  %2389 = vmatpush2.bf16.msra.mxu1 %v7476_v12  ;;  %v7493_v50 = vld [vmem:[%s10530_s3 + $0x2b4] ss:$28 sps:$4 sm:$0xff]   ;;  %v7727_v12 = vld [vmem:[%s8193_s29 + $0x2c] ss:$16 sps:$4 sm:$0xff]  }
 0x11f   : > { %6420 = vmatpush3.bf16.msra.mxu0 %v7480_v15  ;;  %2390 = vmatprep.subr.bf16.mxu1 %v7483_v63 }
 0x120   : > { %6421 = vmatprep.subr.bf16.mxu0 %v7484_v18  ;;  %6179 = vmatprep.mubr.msk.bf16.mxu0 %vm697_vm0, %v8420_v4  ;;  %v7491_v4 = vld [vmem:[%s10530_s3 + $0x2b0] ss:$28 sps:$4 sm:$0xff]   ;;  %v7728_v18 = vld [vmem:[%s8193_s29 + $0x28] ss:$16 sps:$4 sm:$0xff]  }
 0x122   : > { %2391 = vmatpush2.bf16.msra.mxu1 %v7481_v19 }
 0x123   : > { %6422 = vmatpush3.bf16.msra.mxu0 %v7485_v20  ;;  %2392 = vmatprep.subr.bf16.mxu1 %v7488_v21  ;;  %v7729_v20 = vld [vmem:[%s8193_s29 + $0x4c] ss:$16 sps:$4 sm:$0xff]  }
 0x124   : > { %6423 = vmatprep.subr.bf16.mxu0 %v7489_v22 }
 0x126   : > { %2486 = vmatmul.mubr.bf16.gmra.mxu0 %v8423_v5  ;;  %2393 = vmatpush2.bf16.msra.mxu1 %v7486_v23  ;;  %v7503_v5 = vld [vmem:[%s10530_s3 + $0x244] ss:$28 sps:$4 sm:$0xff]  }
 0x127   : > { %6424 = vmatpush3.bf16.msra.mxu0 %v7490_v24  ;;  %2394 = vmatprep.subr.bf16.mxu1 %v7493_v50  ;;  %v7730_v24 = vld [vmem:[%s8193_s29 + $0x48] ss:$16 sps:$4 sm:$0xff]   ;;  %s7962_s29 = smov 100  }
 0x128   : > { %6425 = vmatprep.subr.bf16.mxu0 %v7494_v25  ;;  %6180 = vmatprep.mubr.msk.bf16.mxu0 %vm697_vm0, %v8453_v16  ;;  %v7501_v16 = vld [vmem:[%s10530_s3 + $0x240] ss:$28 sps:$4 sm:$0xff]  }
 0x12a   : > { %2395 = vmatpush2.bf16.msra.mxu1 %v7491_v4 }
 0x12b   : > { %6426 = vmatpush3.bf16.msra.mxu0 %v7495_v26  ;;  %2396 = vmatprep.subr.bf16.mxu1 %v7498_v29 }
 0x12c   : > { %6427 = vmatprep.subr.bf16.mxu0 %v7499_v30 }
 0x12e   : > { %2496 = vmatmul.mubr.bf16.gmra.mxu0 %v8456_v17  ;;  %2397 = vmatpush2.bf16.msra.mxu1 %v7496_v31  ;;  %v7510_v17 = vld [vmem:[%s10530_s3 + $0x50] ss:$28 sps:$4 sm:$0xff]  }
 0x12f   : > { %6428 = vmatpush3.bf16.msra.mxu0 %v7500_v32  ;;  %2398 = vmatprep.subr.bf16.mxu1 %v7503_v5 }
 0x130   : > { %6429 = vmatprep.subr.bf16.mxu0 %v7504_v33  ;;  %6181 = vmatprep.mubr.msk.bf16.mxu0 %vm697_vm0, %v8486_v27 }
 0x132   : > { %2399 = vmatpush2.bf16.msra.mxu1 %v7501_v16 }
 0x133   : > { %6430 = vmatpush3.bf16.msra.mxu0 %v7505_v34  ;;  %2400 = vmatprep.subr.bf16.mxu1 %v7508_v36 }
 0x134   : > { %6431 = vmatprep.subr.bf16.mxu0 %v7509_v37 }
 0x136   : > { %2506 = vmatmul.mubr.bf16.gmra.mxu0 %v8488_v28  ;;  %2401 = vmatpush2.bf16.msra.mxu1 %v7506_v38 }
 0x137   : > { %6432 = vmatpush3.bf16.msra.mxu0 %v7510_v17  ;;  %2402 = vmatprep.subr.bf16.mxu1 %v7513_v39 }
 0x138   : > { %6433 = vmatprep.subr.bf16.mxu0 %v7514_v40  ;;  %2546 = vmatprep.mubr.bf16.mxu0 %v7719_v44 }
 0x13a   : > { %2403 = vmatpush2.bf16.msra.mxu1 %v7511_v41 }
 0x13b   : > { %6434 = vmatpush3.bf16.msra.mxu0 %v7515_v42  ;;  %2578 = vmatprep.subr.bf16.mxu1 %v7952_v46 }
 0x13c   : > { %6813 = vmatprep.subr.bf16.mxu0 %v7516_v43 }
 0x13d   : > { %2405 = vmatmul.mubr.bf16.vlgmr.msra.gmra.mxu1 %v7720_v49 }
 0x13e   : > { %2547 = vmatmul.mubr.bf16.vlgmr.msra.gmra.mxu0 %v7720_v49  ;;  %2579 = vmatpush1.bf16.msra.mxu1 %v7517_v45 }
 0x13f   : > { %6814 = vmatpush3.bf16.msra.mxu0 %v7516_v43  ;;  %2580 = vmatprep.subr.bf16.mxu1 %v7952_v46 }
 0x140   : > { %2414 = vmatprep.mubr.bf16.mxu1 %v7721_v52  ;;  %2554 = vmatprep.mubr.bf16.mxu0 %v7721_v52 }
 0x141   : > { %6815 = vmatprep.subr.bf16.mxu0 %v7519_v47 }
 0x142   : > { %2581 = vmatpush1.bf16.msra.mxu1 %v7518_v48 }
 0x143   : > { %2582 = vmatprep.subr.bf16.mxu1 %v7952_v46  ;;  %6816 = vmatpush3.bf16.msra.mxu0 %v7519_v47 }
 0x144   : > { %6817 = vmatprep.subr.bf16.mxu0 %v7522_v51 }
 0x145   : > { %2415 = vmatmul.mubr.bf16.gmra.mxu1 %v7722_v59 }
 0x146   : > { %2555 = vmatmul.mubr.bf16.gmra.mxu0 %v7722_v59  ;;  %2583 = vmatpush1.bf16.msra.mxu1 %v7520_v53 }
 0x147   : > { %2584 = vmatprep.subr.bf16.mxu1 %v7952_v46  ;;  %2424 = vmatprep.mubr.bf16.mxu1 %v7723_v60 }
 0x148   : > { %2562 = vmatprep.mubr.bf16.mxu0 %v7723_v60  ;;  %6818 = vmatpush3.bf16.msra.mxu0 %v7522_v51 }
 0x149   : > { %6819 = vmatprep.subr.bf16.mxu0 %v7525_v55 }
 0x14a   : > { %2585 = vmatpush1.bf16.msra.mxu1 %v7521_v57 }
 0x14b   : > { %2586 = vmatprep.subr.bf16.mxu1 %v7952_v46 }
 0x14c   : > { %6820 = vmatpush3.bf16.msra.mxu0 %v7525_v55 }
 0x14d   : > { %2425 = vmatmul.mubr.bf16.gmra.mxu1 %v7724_v62  ;;  %v8957_v6 = vpop.f32.mrf.mxu1 }
 0x14e   : > { %2563 = vmatmul.mubr.bf16.gmra.mxu0 %v7724_v62  ;;  %2587 = vmatpush1.bf16.msra.mxu1 %v7523_v35  ;;  %10622 = vst [vmem:[#allocation19_spill] sm:$0xff] %v8957_v6 }
 0x14f   : > { %2588 = vmatprep.subr.bf16.mxu1 %v7952_v46  ;;  %2434 = vmatprep.mubr.bf16.mxu1 %v8571_v58  ;;  %v8963_v7 = vpop.f32.mrf.mxu1 }
 0x150   : > { %2570 = vmatprep.mubr.bf16.mxu0 %v8571_v58  ;;  %v7528_v58 = vld [vmem:[%s10530_s3 + $0x600] ss:$28 sps:$4 sm:$0xff]   ;;  %10623 = vst [vmem:[#allocation20_spill] sm:$0xff] %v8963_v7 }
 0x152   : > { %2589 = vmatpush1.bf16.msra.mxu1 %v7524_v61 }
 0x153   : > { %2590 = vmatprep.subr.bf16.mxu1 %v7952_v46 }
 0x155   : > { %2435 = vmatmul.mubr.bf16.gmra.mxu1 %v8596_v3 }
 0x156   : > { %2571 = vmatmul.mubr.bf16.gmra.mxu0 %v8596_v3  ;;  %2591 = vmatpush1.bf16.msra.mxu1 %v7526_v0  ;;  %v7529_v3 = vld [vmem:[%s10530_s3 + $0x5c8] ss:$28 sps:$4 sm:$0xff]  }
 0x157   : > { %2592 = vmatprep.subr.bf16.mxu1 %v7952_v46  ;;  %6821 = vmatprep.mubr.msk.bf16.mxu0 %vm697_vm0, %v8240_v11  ;;  %v7530_v11 = vld [vmem:[%s10530_s3 + $0x590] ss:$28 sps:$4 sm:$0xff]  }
 0x158   : > { %6182 = vmatprep.mubr.msk.bf16.mxu1 %vm697_vm0, %v7725_v2 }
 0x15a   : > { %2593 = vmatpush1.bf16.msra.mxu1 %v7527_v1 }
 0x15b   : > { %2602 = vmatprep.subr.bf16.mxu1 %v7952_v46 }
 0x15e   : > { %6822 = vmatmul.mubr.msk.bf16.vlgmr.msra.gmra.mxu0 %vm697_vm0, %v8249_v14  ;;  %2603 = vmatpush2.bf16.msra.mxu1 %v7528_v58  ;;  %v7531_v14 = vld [vmem:[%s10530_s3 + $0x558] ss:$28 sps:$4 sm:$0xff]  }
 0x15f   : > { %2604 = vmatprep.subr.bf16.mxu1 %v7952_v46  ;;  %6825 = vmatprep.mubr.msk.bf16.mxu0 %vm697_vm0, %v8375_v54  ;;  %v8968_v54 = vpop.f32.mrf.mxu1 }
 0x160   : > { %10624 = vst [vmem:[#allocation21_spill] sm:$0xff] %v8968_v54 }
 0x161   : > { %v8971_v9 = vpop.f32.mrf.mxu1 }
 0x162   : > { %2605 = vmatpush2.bf16.msra.mxu1 %v7529_v3  ;;  %10625 = vst [vmem:[#allocation22_spill] sm:$0xff] %v8971_v9 }
 0x163   : > { %2606 = vmatprep.subr.bf16.mxu1 %v7952_v46  ;;  %v8977_v15 = vpop.f32.mrf.mxu1 }
 0x164   : > { %10626 = vst [vmem:[#allocation23_spill] sm:$0xff] %v8977_v15 }
 0x165   : > { %v8979_v63 = vpop.f32.mrf.mxu1 }
 0x166   : > { %6826 = vmatmul.mubr.msk.bf16.gmra.mxu0 %vm697_vm0, %v8378_v56  ;;  %2607 = vmatpush2.bf16.msra.mxu1 %v7530_v11  ;;  %10627 = vst [vmem:[#allocation24_spill] sm:$0xff] %v8979_v63 }
 0x167   : > { %2608 = vmatprep.subr.bf16.mxu1 %v7952_v46  ;;  %v6812_v19 = vpop.f32.mrf.mxu1 }
 0x169   : > { %v8998_v31 = vpop.f32.mrf.mxu1 }
 0x16a   : > { %2609 = vmatpush2.bf16.msra.mxu1 %v7531_v14  ;;  %10628 = vst [vmem:[#allocation25_spill] sm:$0xff] %v8998_v31 }
 0x16d   : > { %2611 = vmatmul.mubr.bf16.vlgmr.msra.gmra.mxu1 %v7726_v8  ;;  %v2193_v10 = vpop.f32.mrf.mxu0 }
 0x16e   : > { %6183 = vmatprep.mubr.msk.bf16.mxu1 %vm697_vm0, %v7727_v12 }
 0x16f   : > { %v8975_v13 = vpop.f32.mrf.mxu0 }
 0x171   : > { %v2197_v56 = vpop.f32.mrf.mxu0 }
 0x173   : > { %v8984_v21 = vpop.f32.mrf.mxu0 }
 0x175   : > { %2619 = vmatmul.mubr.bf16.gmra.mxu1 %v7728_v18  ;;  %v2203_v22 = vpop.f32.mrf.mxu0 }
 0x176   : > { %6184 = vmatprep.mubr.msk.bf16.mxu1 %vm697_vm0, %v7729_v20 }
 0x177   : > { %v8986_v23 = vpop.f32.mrf.mxu0 }
 0x179   : > { %v2207_v50 = vpop.f32.mrf.mxu0 }
 0x17b   : > { %v8991_v25 = vpop.f32.mrf.mxu0 }
 0x17d   : > { %2627 = vmatmul.mubr.bf16.gmra.mxu1 %v7730_v24  ;;  %v2213_v4 = vpop.f32.mrf.mxu0  ;;  %v7532_v24 = vld [vmem:[%s10534_s7 + $0x78] sm:$0xff]  }
 0x17e   : > { %6185 = vmatprep.mubr.msk.bf16.mxu1 %vm697_vm0, %v8486_v27  ;;  %6467 = vmatprep.subr.bf16.mxu1 %v7532_v24  ;;  %v7545_v24 = vld [vmem:[%s10534_s7 + $0xe0] sm:$0xff]  }
 0x17f   : > { %v8993_v26 = vpop.f32.mrf.mxu0 }
 0x181   : > { %v2217_v29 = vpop.f32.mrf.mxu0 }
 0x183   : > { %v8996_v30 = vpop.f32.mrf.mxu0 }
 0x185   : > { %2635 = vmatmul.mubr.bf16.gmra.mxu1 %v8488_v28  ;;  %v2223_v32 = vpop.f32.mrf.mxu0 }
 0x187   : > { %v9000_v5 = vpop.f32.mrf.mxu0 }
 0x188   : > { %10629 = vst [vmem:[#allocation26_spill] sm:$0xff] %v9000_v5 }
 0x189   : > { %v2227_v16 = vpop.f32.mrf.mxu0 }
 0x18a   : > { %v7537_v16 = vld [vmem:[%s10534_s7 + $0xf0] sm:$0xff]  }
 0x18b   : > { %v2228_v36 = vpop.f32.mrf.mxu0 }
 0x18d   : > { %v2122_v33 = vpop.f32.mrf.mxu1 }
 0x18e   : > { %v9002_v34 = vadd.f32 %v2193_v10, %v2122_v33  ;;  %v7536_v33 = vld [vmem:[%s10534_s7 + $0x70] sm:$0xff]  }
 0x18f   : > { %v9004_v27 = vpop.f32.mrf.mxu1 }
 0x191   : > { %v2126_v37 = vpop.f32.mrf.mxu1 }
 0x192   : > { %v9006_v38 = vadd.f32 %v2197_v56, %v2126_v37 }
 0x193   : > { %v9008_v17 = vpop.f32.mrf.mxu1 }
 0x195   : > { %v2132_v28 = vpop.f32.mrf.mxu1 }
 0x196   : > { %v9010_v39 = vadd.f32 %v2203_v22, %v2132_v28  ;;  %v7538_v28 = vld [vmem:[%s10534_s7 + $0x30] sm:$0xff]  }
 0x197   : > { %v9012_v40 = vpop.f32.mrf.mxu1 }
 0x199   : > { %v2136_v41 = vpop.f32.mrf.mxu1 }
 0x19a   : > { %v9014_v42 = vadd.f32 %v2207_v50, %v2136_v41  ;;  %v7533_v50 = vld [vmem:[%s10534_s7 + $0xf8] sm:$0xff]   ;;  %v7539_v41 = vld [vmem:[%s10534_s7 + $0xb0] sm:$0xff]  }
 0x19b   : > { %v9016_v43 = vpop.f32.mrf.mxu1  ;;  %6504 = vmatprep.subr.bf16.mxu0 %v7533_v50 }
 0x19d   : > { %v2142_v44 = vpop.f32.mrf.mxu1 }
 0x19e   : > { %v9018_v45 = vadd.f32 %v2213_v4, %v2142_v44  ;;  %v7534_v4 = vld [vmem:[%s10534_s7 + $0x38] sm:$0xff]  }
 0x19f   : > { %v9020_v46 = vpop.f32.mrf.mxu1  ;;  %6468 = vmatpush3.bf16.msra.mxu1 %v7534_v4 }
 0x1a0   : > { %10630 = vst [vmem:[#allocation27_spill] sm:$0xff] %v9018_v45  ;;  %6469 = vmatprep.subr.bf16.mxu1 %v7536_v33 }
 0x1a1   : > { %v2146_v47 = vpop.f32.mrf.mxu1 }
 0x1a2   : > { %v9022_v48 = vadd.f32 %v2217_v29, %v2146_v47 }
 0x1a3   : > { %v9024_v49 = vpop.f32.mrf.mxu1  ;;  %6470 = vmatpush3.bf16.msra.mxu1 %v7538_v28 }
 0x1a4   : > { %10631 = vst [vmem:[#allocation28_spill] sm:$0xff] %v9022_v48 }
 0x1a5   : > { %v2152_v51 = vpop.f32.mrf.mxu1 }
 0x1a6   : > { %v9026_v52 = vadd.f32 %v2223_v32, %v2152_v51  ;;  %v7535_v32 = vld [vmem:[%s10534_s7 + $0xb8] sm:$0xff]   ;;  %v7540_v51 = vld [vmem:[%s10534_s7 + $0x68] sm:$0xff]  }
 0x1a7   : > { %v9028_v53 = vpop.f32.mrf.mxu1  ;;  %6505 = vmatpush3.bf16.msra.mxu0 %v7535_v32  ;;  %6471 = vmatprep.subr.bf16.mxu1 %v7540_v51  ;;  %v7547_v32 = vld [vmem:[%s10534_s7 + $0xa0] sm:$0xff]   ;;  %v7551_v51 = vld [vmem:[%s10534_s7 + $0x98] sm:$0xff]  }
 0x1a8   : > { %10632 = vst [vmem:[#allocation29_spill] sm:$0xff] %v9026_v52  ;;  %10633 = vst [vmem:[#allocation30_spill] sm:$0xff] %v9028_v53  ;;  %6506 = vmatprep.subr.bf16.mxu0 %v7537_v16  ;;  %v7548_v16 = vld [vmem:[%s10534_s7 + $0x58] sm:$0xff]  }
 0x1a9   : > { %v2156_v55 = vpop.f32.mrf.mxu1 }
 0x1aa   : > { %v7541_v55 = vld [vmem:[%s10534_s7 + $0xe8] sm:$0xff]  }
 0x1ab   : > { %v2157_v57 = vpop.f32.mrf.mxu1  ;;  %6507 = vmatpush3.bf16.msra.mxu0 %v7539_v41 }
 0x1ac   : > { %6508 = vmatprep.subr.bf16.mxu0 %v7541_v55 }
 0x1ae   : > { %v2264_v59 = vpop.f32.mrf.mxu0 }
 0x1b0   : > { %v9030_v60 = vpop.f32.mrf.mxu0 }
 0x1b2   : > { %v2268_v35 = vpop.f32.mrf.mxu0 }
 0x1b4   : > { %v9032_v61 = vpop.f32.mrf.mxu0 }
 0x1b6   : > { %v2274_v62 = vpop.f32.mrf.mxu0 }
 0x1b8   : > { %v9034_v0 = vpop.f32.mrf.mxu0 }
 0x1ba   : > { %v2278_v1 = vpop.f32.mrf.mxu0 }
 0x1bc   : > { %v9036_v58 = vpop.f32.mrf.mxu0 }
 0x1bd   : > { %v2335_v2 = vpop.f32.mrf.mxu1 }
 0x1be   : > { %v9038_v3 = vadd.f32 %v2335_v2, %v2264_v59 }
 0x1bf   : > { %v9040_v11 = vpop.f32.mrf.mxu1 }
 0x1c0   : > { %v2284_v14 = vpop.f32.mrf.mxu0 }
 0x1c1   : > { %v2339_v8 = vpop.f32.mrf.mxu1 }
 0x1c2   : > { %v9042_v10 = vadd.f32 %v2339_v8, %v2268_v35  ;;  %v9044_v12 = vpop.f32.mrf.mxu0 }
 0x1c3   : > { %v9046_v56 = vpop.f32.mrf.mxu1 }
 0x1c4   : > { %10634 = vst [vmem:[#allocation31_spill] sm:$0xff] %v9042_v10  ;;  %v2288_v18 = vpop.f32.mrf.mxu0 }
 0x1c5   : > { %v2345_v19 = vpop.f32.mrf.mxu1 }
 0x1c6   : > { %v9048_v20 = vadd.f32 %v2345_v19, %v2274_v62  ;;  %v9050_v22 = vpop.f32.mrf.mxu0  ;;  %v7542_v62 = vld [vmem:[%s10534_s7 + $0x28] sm:$0xff]   ;;  %v7544_v19 = vld [vmem:[%s10534_s7 + $0x60] sm:$0xff]  }
 0x1c7   : > { %10636 = vst [vmem:[#allocation33_spill] sm:$0xff] %v9050_v22  ;;  %v9061_v29 = vpop.f32.mrf.mxu1  ;;  %6472 = vmatpush3.bf16.msra.mxu1 %v7542_v62 }
 0x1c8   : > { %10635 = vst [vmem:[#allocation32_spill] sm:$0xff] %v9048_v20  ;;  %v2294_v36 = vpop.f32.mrf.mxu0  ;;  %6473 = vmatprep.subr.bf16.mxu1 %v7544_v19  ;;  %v7556_v19 = vld [vmem:[%s10534_s7 + $0x48] sm:$0xff]  }
 0x1c9   : > { %v2349_v37 = vpop.f32.mrf.mxu1 }
 0x1ca   : > { %v9078_v44 = vadd.f32 %v2349_v37, %v2278_v1  ;;  %v9080_v47 = vpop.f32.mrf.mxu0  ;;  %v7543_v1 = vld [vmem:[%s10534_s7 + $0xa8] sm:$0xff]   ;;  %v7549_v37 = vld [vmem:[%s10534_s7 + $0xd8] sm:$0xff]  }
 0x1cb   : > { %10638 = vst [vmem:[#allocation35_spill] sm:$0xff] %v9080_v47  ;;  %v9088_v57 = vpop.f32.mrf.mxu1  ;;  %6509 = vmatpush3.bf16.msra.mxu0 %v7543_v1 }
 0x1cc   : > { %10637 = vst [vmem:[#allocation34_spill] sm:$0xff] %v9078_v44  ;;  %v2298_v59 = vpop.f32.mrf.mxu0  ;;  %6510 = vmatprep.subr.bf16.mxu0 %v7545_v24  ;;  %v7557_v24 = vld [vmem:[%s10534_s7 + $0xc8] sm:$0xff]  }
 0x1cd   : > { %v2355_v35 = vpop.f32.mrf.mxu1  ;;  %v7552_v59 = vld [vmem:[%s10534_s7 + $0x50] sm:$0xff]  }
 0x1ce   : > { %v9096_v2 = vadd.f32 %v2355_v35, %v2284_v14  ;;  %v2299_v8 = vpop.f32.mrf.mxu0  ;;  %v7546_v14 = vld [vmem:[%s10534_s7 + $0x20] sm:$0xff]   ;;  %v7553_v35 = vld [vmem:[%s10534_s7 + $0xd0] sm:$0xff]  }
 0x1cf   : > { %v9104_v50 = vpop.f32.mrf.mxu1  ;;  %6474 = vmatpush3.bf16.msra.mxu1 %v7546_v14  ;;  %6511 = vmatpush3.bf16.msra.mxu0 %v7547_v32  ;;  %v7555_v8 = vld [vmem:[%s10534_s7 + $0x90] sm:$0xff]   ;;  %v7558_v14 = vld [vmem:[%s10534_s7 + $0x8] sm:$0xff]  }
 0x1d0   : > { %10639 = vst [vmem:[#allocation36_spill] sm:$0xff] %v9096_v2  ;;  %6475 = vmatprep.subr.bf16.mxu1 %v7548_v16  ;;  %6512 = vmatprep.subr.bf16.mxu0 %v7549_v37  ;;  %v7559_v32 = vld [vmem:[%s10534_s7 + $0x88] sm:$0xff]  }
 0x1d1   : > { %v2359_v4 = vpop.f32.mrf.mxu1 }
 0x1d2   : > { %v9112_v33 = vadd.f32 %v2359_v4, %v2288_v18  ;;  %v7550_v18 = vld [vmem:[%s10534_s7 + $0x18] sm:$0xff]  }
 0x1d3   : > { %v9120_v28 = vpop.f32.mrf.mxu1  ;;  %6476 = vmatpush3.bf16.msra.mxu1 %v7550_v18  ;;  %6513 = vmatpush3.bf16.msra.mxu0 %v7551_v51 }
 0x1d4   : > { %10640 = vst [vmem:[#allocation37_spill] sm:$0xff] %v9112_v33  ;;  %10641 = vst [vmem:[#allocation38_spill] sm:$0xff] %v9120_v28  ;;  %6477 = vmatprep.subr.bf16.mxu1 %v7552_v59  ;;  %6514 = vmatprep.subr.bf16.mxu0 %v7553_v35 }
 0x1d5   : > { %v2365_v41 = vpop.f32.mrf.mxu1 }
 0x1d6   : > { %v9128_v55 = vadd.f32 %v2365_v41, %v2294_v36  ;;  %v7554_v36 = vld [vmem:[%s10534_s7 + $0x10] sm:$0xff]  }
 0x1d7   : > { %v9136_v62 = vpop.f32.mrf.mxu1  ;;  %6478 = vmatpush3.bf16.msra.mxu1 %v7554_v36  ;;  %6515 = vmatpush3.bf16.msra.mxu0 %v7555_v8 }
 0x1d8   : > { %10642 = vst [vmem:[#allocation39_spill] sm:$0xff] %v9128_v55  ;;  %10643 = vst [vmem:[#allocation40_spill] sm:$0xff] %v9136_v62  ;;  %6479 = vmatprep.subr.bf16.mxu1 %v7556_v19  ;;  %6516 = vmatprep.subr.bf16.mxu0 %v7557_v24 }
 0x1d9   : > { %v2369_v1 = vpop.f32.mrf.mxu1 }
 0x1db   : > { %v2370_v4 = vpop.f32.mrf.mxu1  ;;  %6480 = vmatpush3.bf16.msra.mxu1 %v7558_v14  ;;  %6517 = vmatpush3.bf16.msra.mxu0 %v7559_v32 }
 0x1de   : > { %v2477_v16 = vpop.f32.mrf.mxu0 }
 0x1e0   : > { %v9156_v37 = vpop.f32.mrf.mxu0 }
 0x1e1   : > { %10644 = vst [vmem:[#allocation41_spill] sm:$0xff] %v9156_v37 }
 0x1e2   : > { %v2481_v41 = vpop.f32.mrf.mxu0 }
 0x1e4   : > { %v9158_v18 = vpop.f32.mrf.mxu0 }
 0x1e5   : > { %10645 = vst [vmem:[#allocation42_spill] sm:$0xff] %v9158_v18 }
 0x1e6   : > { %v2487_v51 = vpop.f32.mrf.mxu0 }
 0x1e8   : > { %v9160_v59 = vpop.f32.mrf.mxu0 }
 0x1e9   : > { %10646 = vst [vmem:[#allocation43_spill] sm:$0xff] %v9160_v59 }
 0x1ea   : > { %v2491_v35 = vpop.f32.mrf.mxu0 }
 0x1ec   : > { %v9162_v1 = vpop.f32.mrf.mxu0 }
 0x1ed   : > { %10647 = vst [vmem:[#allocation44_spill] sm:$0xff] %v9162_v1 }
 0x1ee   : > { %v2497_v36 = vpop.f32.mrf.mxu0 }
 0x1f0   : > { %v9164_v8 = vpop.f32.mrf.mxu0 }
 0x1f1   : > { %10648 = vst [vmem:[#allocation45_spill] sm:$0xff] %v9164_v8 }
 0x1f2   : > { %v2501_v4 = vpop.f32.mrf.mxu0 }
 0x1f4   : > { %v9166_v15 = vpop.f32.mrf.mxu0 }
 0x1f5   : > { %10649 = vst [vmem:[#allocation46_spill] sm:$0xff] %v9166_v15 }
 0x1f6   : > { %v2507_v19 = vpop.f32.mrf.mxu0 }
 0x1f8   : > { %v9168_v24 = vpop.f32.mrf.mxu0 }
 0x1f9   : > { %10650 = vst [vmem:[#allocation47_spill] sm:$0xff] %v9168_v24 }
 0x1fa   : > { %v2511_v14 = vpop.f32.mrf.mxu0 }
 0x1fc   : > { %v2512_v32 = vpop.f32.mrf.mxu0 }
 0x1fd   : > { %v2406_v31 = vpop.f32.mrf.mxu1 }
 0x1fe   : > { %v9170_v63 = vadd.f32 %v2477_v16, %v2406_v31  ;;  %v6435_v54 = vpop.f32.mrf.mxu0 }
 0x1ff   : > { %v9172_v6 = vpop.f32.mrf.mxu1 }
 0x200   : > { %10651 = vst [vmem:[#allocation48_spill] sm:$0xff] %v9170_v63  ;;  %10652 = vst [vmem:[#allocation49_spill] sm:$0xff] %v9172_v6  ;;  %v6436_v9 = vpop.f32.mrf.mxu0  ;;  %v10567_v6 = vmov 0.0  }
 0x201   : > { %v2410_v7 = vpop.f32.mrf.mxu1 }
 0x202   : > { %v9174_v1 = vadd.f32 %v2481_v41, %v2410_v7  ;;  %v9176_v59 = vpop.f32.mrf.mxu0 }
 0x203   : > { %v9178_v8 = vpop.f32.mrf.mxu1 }
 0x204   : > { %10653 = vst [vmem:[#allocation50_spill] sm:$0xff] %v9174_v1  ;;  %10654 = vst [vmem:[#allocation51_spill] sm:$0xff] %v9178_v8  ;;  %v6439_v15 = vpop.f32.mrf.mxu0 }
 0x205   : > { %v2416_v18 = vpop.f32.mrf.mxu1  ;;  %v6440_v62 = vadd.f32 %v6439_v15, %v9176_v59 }
 0x206   : > { %v9180_v55 = vadd.f32 %v2487_v51, %v2416_v18  ;;  %v9182_v14 = vpop.f32.mrf.mxu0 }
 0x207   : > { %v9184_v32 = vpop.f32.mrf.mxu1 }
 0x208   : > { %10655 = vst [vmem:[#allocation52_spill] sm:$0xff] %v9180_v55  ;;  %10656 = vst [vmem:[#allocation53_spill] sm:$0xff] %v9184_v32  ;;  %v6442_v31 = vpop.f32.mrf.mxu0  ;;  %v7560_v55 = vld [vmem:[%s10534_s7 + $0xc0] sm:$0xff]  }
 0x209   : > { %v2420_v16 = vpop.f32.mrf.mxu1  ;;  %6518 = vmatprep.subr.bf16.mxu0 %v7560_v55 }
 0x20a   : > { %v9186_v24 = vadd.f32 %v2491_v35, %v2420_v16  ;;  %v6444_v63 = vpop.f32.mrf.mxu0  ;;  %v7561_v35 = vld [vmem:[%s10534_s7 + $0x40] sm:$0xff]  }
 0x20b   : > { %v9188_v52 = vpop.f32.mrf.mxu1  ;;  %6481 = vmatprep.subr.bf16.mxu1 %v7561_v35 }
 0x20c   : > { %10657 = vst [vmem:[#allocation54_spill] sm:$0xff] %v9186_v24  ;;  %10658 = vst [vmem:[#allocation55_spill] sm:$0xff] %v9188_v52  ;;  %v6445_v7 = vpop.f32.mrf.mxu0 }
 0x20d   : > { %v2426_v41 = vpop.f32.mrf.mxu1 }
 0x20e   : > { %v9190_v1 = vadd.f32 %v2497_v36, %v2426_v41  ;;  %v6447_v8 = vpop.f32.mrf.mxu0  ;;  %v7562_v36 = vld [vmem:[%s10534_s7] sm:$0xff]  }
 0x20f   : > { %v9192_v37 = vpop.f32.mrf.mxu1  ;;  %v7563_v41 = vld [vmem:[%s10534_s7 + $0x80] sm:$0xff]   ;;  %6482 = vmatpush3.bf16.msra.mxu1 %v7562_v36 }
 0x210   : > { %10659 = vst [vmem:[#allocation56_spill] sm:$0xff] %v9190_v1  ;;  %10660 = vst [vmem:[#allocation57_spill] sm:$0xff] %v9192_v37  ;;  %v6448_v18 = vpop.f32.mrf.mxu0  ;;  %6519 = vmatpush3.bf16.msra.mxu0 %v7563_v41 }
 0x211   : > { %v2430_v51 = vpop.f32.mrf.mxu1  ;;  %6829 = vmatprep.subr.bf16.mxu0 %v10567_v6 }
 0x212   : > { %v9200_v16 = vadd.f32 %v2501_v4, %v2430_v51  ;;  %v6450_v24 = vpop.f32.mrf.mxu0  ;;  %v7564_v4 = vld [vmem:[%s10534_s7 + $0x178] sm:$0xff]  }
 0x213   : > { %v9208_v1 = vpop.f32.mrf.mxu1  ;;  %6541 = vmatprep.subr.bf16.mxu1 %v7564_v4 }
 0x214   : > { %10661 = vst [vmem:[#allocation58_spill] sm:$0xff] %v9200_v16  ;;  %10662 = vst [vmem:[#allocation59_spill] sm:$0xff] %v9208_v1  ;;  %v6451_v37 = vpop.f32.mrf.mxu0 }
 0x215   : > { %v2436_v52 = vpop.f32.mrf.mxu1  ;;  %v6452_v59 = vadd.f32 %v6451_v37, %v6450_v24 }
 0x216   : > { %v9213_v51 = vadd.f32 %v2507_v19, %v2436_v52  ;;  %v6453_v16 = vpop.f32.mrf.mxu0 }
 0x217   : > { %v9215_v32 = vpop.f32.mrf.mxu1 }
 0x218   : > { %10663 = vst [vmem:[#allocation60_spill] sm:$0xff] %v9213_v51  ;;  %10664 = vst [vmem:[#allocation61_spill] sm:$0xff] %v9215_v32  ;;  %v6454_v1 = vpop.f32.mrf.mxu0 }
 0x219   : > { %v2440_v55 = vpop.f32.mrf.mxu1 }
 0x21a   : > { %v6456_v35 = vpop.f32.mrf.mxu0 }
 0x21b   : > { %v2441_v33 = vpop.f32.mrf.mxu1 }
 0x21c   : > { %v6457_v36 = vpop.f32.mrf.mxu0 }
 0x21d   : > { %v6437_v36 = vadd.f32 %v6436_v9, %v6435_v54  ;;  %v6443_v54 = vadd.f32 %v6442_v31, %v9182_v14  ;;  %v6455_v14 = vadd.f32 %v6454_v1, %v6453_v16 }
 0x21e   : > { %v9218_v41 = vpop.f32.mrf.mxu0 }
 0x21f   : > { %2749 = vrot.lane.b32.xlu1 %v9218_v41, %s7954_s30 }
 0x220   : > { %v2708_v52 = vpop.f32.mrf.mxu0 }
 0x221   : > { %2745 = vrot.lane.b32.xlu0 %v2708_v52, %s7954_s30 }
 0x222   : > { %v9223_v19 = vpop.f32.mrf.mxu0 }
 0x223   : > { %2751 = vrot.lane.b32.xlu1 %v9223_v19, %s7954_s30 }
 0x224   : > { %v2711_v4 = vpop.f32.mrf.mxu0 }
 0x225   : > { %2747 = vrot.lane.b32.xlu0 %v2711_v4, %s7954_s30 }
 0x226   : > { %v9228_v55 = vpop.f32.mrf.mxu0 }
 0x227   : > { %10665 = vst [vmem:[#allocation62_spill] sm:$0xff] %v9228_v55 }
 0x228   : > { %v9230_v33 = vpop.f32.mrf.mxu0 }
 0x229   : > { %2753 = vrot.lane.b32.xlu0 %v9230_v33, %s7954_s30 }
 0x22a   : > { %v6828_v35 = vpop.f32.mrf.mxu0 }
 0x22c   : > { %v9234_v6 = vpop.f32.mrf.mxu0 }
 0x22d   : > { %2757 = vrot.lane.b32.xlu0 %v9228_v55, %s7954_s30  ;;  %2755 = vrot.lane.b32.xlu1 %v9234_v6, %s7954_s30  ;;  %v2612_v51 = vpop.f32.mrf.mxu1  ;;  %v6446_v55 = vadd.f32 %v6445_v7, %v6444_v63 }
 0x22e   : > { %v9240_v32 = vadd.f32 %v6437_v36, %v2612_v51  ;;  %v6449_v51 = vadd.f32 %v6448_v18, %v6447_v8 }
 0x22f   : > { %v2614_v48 = vpop.f32.mrf.mxu1 }
 0x230   : > { %10666 = vst [vmem:[#allocation63_spill] sm:$0xff] %v9240_v32 }
 0x231   : > { %v2615_v47 = vpop.f32.mrf.mxu1 }
 0x232   : > { %v9243_v5 = vadd.f32 %v6440_v62, %v2615_v47 }
 0x233   : > { %v2617_v53 = vpop.f32.mrf.mxu1 }
 0x234   : > { %10667 = vst [vmem:[#allocation64_spill] sm:$0xff] %v9243_v5 }
 0x235   : > { %v2620_v9 = vpop.f32.mrf.mxu1 }
 0x236   : > { %v9246_v35 = vadd.f32 %v6443_v54, %v2620_v9 }
 0x237   : > { %v2622_v2 = vpop.f32.mrf.mxu1 }
 0x238   : > { %10668 = vst [vmem:[#allocation65_spill] sm:$0xff] %v9246_v35 }
 0x239   : > { %v2623_v45 = vpop.f32.mrf.mxu1 }
 0x23a   : > { %v9248_v28 = vadd.f32 %v6446_v55, %v2623_v45  ;;  %v9258_v45 = vadd.f32 %v8975_v13, %v9004_v27  ;;  %v7565_v27 = vld [vmem:[%s10534_s7 + $0x138] sm:$0xff]   ;;  %v9290_v55 = vadd.f32 %v9046_v56, %v9032_v61  ;;  %v7568_v56 = vld [vmem:[%s10534_s7 + $0x130] sm:$0xff]  }
 0x23b   : > { %v2625_v22 = vpop.f32.mrf.mxu1 }
 0x23c   : > { %10669 = vst [vmem:[#allocation66_spill] sm:$0xff] %v9248_v28  ;;  %v9262_v22 = vadd.f32 %v9040_v11, %v9030_v60  ;;  %v7566_v60 = vld [vmem:[%s10534_s7 + $0x1b8] sm:$0xff]   ;;  %v7567_v11 = vld [vmem:[%s10534_s7 + $0x170] sm:$0xff]   ;;  %10673 = vst [vmem:[#allocation70_spill] sm:$0xff] %v9290_v55 }
 0x23d   : > { %v2628_v36 = vpop.f32.mrf.mxu1 }
 0x23e   : > { %v9250_v48 = vadd.f32 %v6449_v51, %v2628_v36 }
 0x23f   : > { %v2630_v15 = vpop.f32.mrf.mxu1 }
 0x240   : > { %10670 = vst [vmem:[#allocation67_spill] sm:$0xff] %v9250_v48  ;;  %v9317_v15 = vadd.f32 %v9061_v29, %v9034_v0  ;;  %v9331_v0 = vadd.f32 %v8991_v25, %v9016_v43 }
 0x241   : > { %v2631_v47 = vpop.f32.mrf.mxu1 }
 0x242   : > { %v9252_v62 = vadd.f32 %v6452_v59, %v2631_v47  ;;  %10674 = vst [vmem:[#allocation71_spill] sm:$0xff] %v9317_v15  ;;  %v10675_v47 = vmov 0.0  }
 0x243   : > { %v2633_v53 = vpop.f32.mrf.mxu1 }
 0x244   : > { %10671 = vst [vmem:[#allocation68_spill] sm:$0xff] %v9252_v62 }
 0x245   : > { %v2636_v31 = vpop.f32.mrf.mxu1 }
 0x246   : > { %v9254_v54 = vadd.f32 %v6455_v14, %v2636_v31  ;;  %v7570_v14 = vld [vmem:[%s10534_s7 + $0x168] sm:$0xff]  }
 0x247   : > { %v2638_v2 = vpop.f32.mrf.mxu1  ;;  %v7571_v31 = vld [vmem:[%s10534_s7 + $0x128] sm:$0xff]  }
 0x248   : > { %10672 = vst [vmem:[#allocation69_spill] sm:$0xff] %v9254_v54  ;;  %v7572_v2 = vld [vmem:[%s10534_s7 + $0x1a8] sm:$0xff]  }
 0x249   : > { %v2639_v63 = vpop.f32.mrf.mxu1 }
 0x24a   : > { %v9345_v63 = vadd.f32 %v9088_v57, %v9036_v58 }
 0x24b   : > { %v2640_v7 = vpop.f32.mrf.mxu1 }
 0x24c   : > { %10676 = vst [vmem:[#allocation72_spill] sm:$0xff] %v9345_v63  ;;  %v7573_v7 = vld [vmem:[%s10534_s7 + $0x160] sm:$0xff]  }
 0x291   : > { %v2750_v8 = vpop.permute.xlu1 %2749 }
 0x292   : > { %v9294_v51 = vsel %vm697_vm0, %v9218_v41, %v2750_v8  ;;  %v7569_v41 = vld [vmem:[%s10534_s7 + $0x1b0] sm:$0xff]  }
 0x293   : > { %v2746_v37 = vpop.permute.xlu0 %2745  ;;  %v2810_v43 = vmul.f32 %v9294_v51, %v9010_v39 }
 0x294   : > { %v9265_v24 = vsel %vm697_vm0, %v2708_v52, %v2746_v37  ;;  %v9286_v52 = vadd.f32 %v8984_v21, %v9008_v17  ;;  %v9361_v37 = vadd.f32 %v8993_v26, %v9020_v46 }
 0x295   : > { %v2797_v1 = vmul.f32 %v9265_v24, %v9258_v45  ;;  %v2799_v18 = vmul.f32 %v9265_v24, %v9262_v22  ;;  %v2796_v16 = vmul.f32 %v9265_v24, %v9002_v34  ;;  %v2798_v13 = vmul.f32 %v9265_v24, %v9038_v3  ;;  %v2752_v59 = vpop.permute.xlu1 %2751 }
 0x296   : > { %v9335_v29 = vsel %vm697_vm0, %v9223_v19, %v2752_v59  ;;  %v2812_v19 = vmul.f32 %v9294_v51, %v9048_v20  ;;  %v7579_v59 = vld [vmem:[%s10534_s7 + $0x150] sm:$0xff]  }
 0x297   : > { %v2748_v9 = vpop.permute.xlu0 %2747  ;;  %3325 = vmatprep.mubr.f32.mxu1 %v2797_v1  ;;  %3393 = vmatprep.mubr.f32.mxu0 %v2799_v18  ;;  %v2818_v58 = vmul.f32 %v9335_v29, %v9331_v0  ;;  %v2820_v57 = vmul.f32 %v9335_v29, %v9345_v63  ;;  %v7574_v1 = vld [vmem:[%s10534_s7 + $0x120] sm:$0xff]   ;;  %v2817_v46 = vmul.f32 %v9335_v29, %v9014_v42 }
 0x298   : > { %v9297_v36 = vsel %vm697_vm0, %v2711_v4, %v2748_v9  ;;  %3326 = vmatmul.mubr.f32.vlgmr.msra.gmra.mxu1 %v2796_v16  ;;  %3394 = vmatmul.mubr.f32.vlgmr.msra.gmra.mxu0 %v2798_v13  ;;  %v9313_v4 = vadd.f32 %v8986_v23, %v9012_v40  ;;  %v2813_v40 = vmul.f32 %v9294_v51, %v9317_v15  ;;  %v7575_v18 = vld [vmem:[%s10534_s7 + $0x1a0] sm:$0xff]   ;;  %v7576_v13 = vld [vmem:[%s10534_s7 + $0x158] sm:$0xff]  }
 0x299   : > { %6542 = vmatpush3.bf16.msra.mxu1 %v7565_v27  ;;  %6830 = vmatpush3.bf16.msra.mxu0 %v7566_v60  ;;  %v2804_v21 = vmul.f32 %v9297_v36, %v9286_v52  ;;  %v2806_v17 = vmul.f32 %v9297_v36, %v9290_v55  ;;  %v2803_v61 = vmul.f32 %v9297_v36, %v9006_v38  ;;  %v7578_v9 = vld [vmem:[%s10534_s7 + $0x198] sm:$0xff]  }
 0x29a   : > { %6543 = vmatprep.subr.bf16.mxu1 %v7567_v11  ;;  %6831 = vmatprep.subr.bf16.mxu0 %v10675_v47  ;;  %v2805_v53 = vmul.f32 %v9297_v36, %v9042_v10  ;;  %v2811_v23 = vmul.f32 %v9294_v51, %v9313_v4  ;;  %v9375_v16 = vadd.f32 %v9104_v50, %v9044_v12  ;;  %v7577_v11 = vld [vmem:[%s10534_s7 + $0x118] sm:$0xff]  }
 0x29b   : > { %3330 = vmatprep.mubr.f32.mxu1 %v2804_v21  ;;  %3398 = vmatprep.mubr.f32.mxu0 %v2806_v17  ;;  %v2754_v25 = vpop.permute.xlu0 %2753  ;;  %v9391_v27 = vadd.f32 %v8996_v30, %v9024_v49  ;;  %v10678_v21 = vld [vmem:[#allocation33_spill] sm:$0xff]  ;;  %v10679_v17 = vld [vmem:[#allocation38_spill] sm:$0xff]  ;;  %v10681_v49 = vld [vmem:[#allocation27_spill] sm:$0xff] }
 0x29c   : > { %3331 = vmatmul.mubr.f32.gmra.mxu1 %v2803_v61  ;;  %3399 = vmatmul.mubr.f32.gmra.mxu0 %v2805_v53  ;;  %v9365_v8 = vsel %vm697_vm0, %v9230_v33, %v2754_v25  ;;  %10677 = vst [vmem:[#allocation73_spill] sm:$0xff] %v9375_v16  ;;  %v2819_v33 = vmul.f32 %v9335_v29, %v9078_v44 }
 0x29d   : > { %6544 = vmatpush3.bf16.msra.mxu1 %v7568_v56  ;;  %6832 = vmatpush3.bf16.msra.mxu0 %v7569_v41  ;;  %v2825_v12 = vmul.f32 %v9365_v8, %v9361_v37  ;;  %v2827_v50 = vmul.f32 %v9365_v8, %v9375_v16  ;;  %v9405_v61 = vadd.f32 %v10679_v17, %v10678_v21  ;;  %v10682_v56 = vld [vmem:[#allocation36_spill] sm:$0xff]  ;;  %v10692_v21 = vld [vmem:[#allocation41_spill] sm:$0xff] }
 0x29e   : > { %3335 = vmatprep.mubr.f32.mxu1 %v2811_v23  ;;  %3403 = vmatprep.mubr.f32.mxu0 %v2813_v40  ;;  %v2826_v41 = vmul.f32 %v9365_v8, %v10682_v56  ;;  %v10683_v23 = vld [vmem:[#allocation30_spill] sm:$0xff] }
 0x29f   : > { %6545 = vmatprep.subr.bf16.mxu1 %v7570_v14  ;;  %6833 = vmatprep.subr.bf16.mxu0 %v10675_v47  ;;  %v2756_v26 = vpop.permute.xlu1 %2755  ;;  %10680 = vst [vmem:[#allocation33_spill] sm:$0xff] %v9405_v61  ;;  %v2758_v30 = vpop.permute.xlu0 %2757  ;;  %v10684_v40 = vld [vmem:[#allocation26_spill] sm:$0xff] }
 0x2a0   : > { %3336 = vmatmul.mubr.f32.gmra.mxu1 %v2810_v43  ;;  %3404 = vmatmul.mubr.f32.gmra.mxu0 %v2812_v19  ;;  %v9395_v60 = vsel %vm697_vm0, %v9234_v6, %v2756_v26  ;;  %v2824_v6 = vmul.f32 %v9365_v8, %v10681_v49  ;;  %v7580_v43 = vld [vmem:[%s10534_s7 + $0x110] sm:$0xff]   ;;  %v10690_v26 = vld [vmem:[#allocation37_spill] sm:$0xff] }
 0x2a1   : > { %6546 = vmatpush3.bf16.msra.mxu1 %v7571_v31  ;;  %6834 = vmatpush3.bf16.msra.mxu0 %v7572_v2  ;;  %v2832_v53 = vmul.f32 %v9395_v60, %v9391_v27  ;;  %v2834_v14 = vmul.f32 %v9395_v60, %v9405_v61  ;;  %v9421_v31 = vadd.f32 %v10684_v40, %v10683_v23  ;;  %v10685_v2 = vld [vmem:[#allocation62_spill] sm:$0xff]  ;;  %v7581_v19 = vld [vmem:[%s10534_s7 + $0x190] sm:$0xff]   ;;  %v7586_v23 = vld [vmem:[%s10534_s7 + $0x100] sm:$0xff]  }
 0x2a2   : > { %3340 = vmatprep.mubr.f32.mxu1 %v2818_v58  ;;  %3408 = vmatprep.mubr.f32.mxu0 %v2820_v57  ;;  %v9425_v25 = vsel %vm697_vm0, %v10685_v2, %v2758_v30  ;;  %v10687_v58 = vld [vmem:[#allocation40_spill] sm:$0xff]  ;;  %v10693_v30 = vld [vmem:[#allocation29_spill] sm:$0xff] }
 0x2a3   : > { %6547 = vmatprep.subr.bf16.mxu1 %v7573_v7  ;;  %6835 = vmatprep.subr.bf16.mxu0 %v10675_v47  ;;  %v10686_v7 = vld [vmem:[#allocation35_spill] sm:$0xff]  ;;  %v7587_v40 = vld [vmem:[%s10534_s7 + $0x180] sm:$0xff]  }
 0x2a4   : > { %3341 = vmatmul.mubr.f32.gmra.mxu1 %v2817_v46  ;;  %3409 = vmatmul.mubr.f32.gmra.mxu0 %v2819_v33  ;;  %v9435_v57 = vadd.f32 %v10687_v58, %v10686_v7  ;;  %v2833_v46 = vmul.f32 %v9395_v60, %v10690_v26  ;;  %v7582_v33 = vld [vmem:[%s10534_s7 + $0x148] sm:$0xff]   ;;  %v3681_v2 = vld [vmem:[%s10539_s12] sm:$0xf]  ;;  %v7588_v58 = vld [vmem:[%s10533_s6 + $0x38] sm:$0xff]  }
 0x2a5   : > { %6548 = vmatpush3.bf16.msra.mxu1 %v7574_v1  ;;  %6836 = vmatpush3.bf16.msra.mxu0 %v7575_v18  ;;  %v10689_v1 = vld [vmem:[#allocation28_spill] sm:$0xff] }
 0x2a6   : > { %3345 = vmatprep.mubr.f32.mxu1 %v2825_v12  ;;  %3413 = vmatprep.mubr.f32.mxu0 %v2827_v50  ;;  %10688 = vst [vmem:[#allocation38_spill] sm:$0xff] %v9435_v57  ;;  %v2831_v18 = vmul.f32 %v9395_v60, %v10689_v1  ;;  %v2841_v12 = vmul.f32 %v9425_v25, %v9435_v57  ;;  %v7583_v50 = vld [vmem:[%s10534_s7 + $0x108] sm:$0xff]  }
 0x2a7   : > { %6549 = vmatprep.subr.bf16.mxu1 %v7576_v13  ;;  %6837 = vmatprep.subr.bf16.mxu0 %v10675_v47  ;;  %v2839_v13 = vmul.f32 %v9425_v25, %v9421_v31 }
 0x2a8   : > { %3346 = vmatmul.mubr.f32.gmra.mxu1 %v2824_v6  ;;  %3414 = vmatmul.mubr.f32.gmra.mxu0 %v2826_v41  ;;  %v2838_v6 = vmul.f32 %v9425_v25, %v10693_v30  ;;  %v10694_v41 = vld [vmem:[#allocation39_spill] sm:$0xff] }
 0x2a9   : > { %6550 = vmatpush3.bf16.msra.mxu1 %v7577_v11  ;;  %6838 = vmatpush3.bf16.msra.mxu0 %v7578_v9  ;;  %v7584_v11 = vld [vmem:[%s10534_s7 + $0x188] sm:$0xff]   ;;  %v10691_v9 = vld [vmem:[#allocation49_spill] sm:$0xff] }
 0x2aa   : > { %3350 = vmatprep.mubr.f32.mxu1 %v2832_v53  ;;  %3418 = vmatprep.mubr.f32.mxu0 %v2834_v14  ;;  %v9457_v17 = vadd.f32 %v10692_v21, %v10691_v9  ;;  %v7585_v53 = vld [vmem:[%s10534_s7 + $0x140] sm:$0xff]   ;;  %v7589_v21 = vld [vmem:[%s10533_s6 + $0x30] sm:$0xff]  }
 0x2ab   : > { %6551 = vmatprep.subr.bf16.mxu1 %v7579_v59  ;;  %6839 = vmatprep.subr.bf16.mxu0 %v10675_v47  ;;  %v2840_v59 = vmul.f32 %v9425_v25, %v10694_v41 }
 0x2ac   : > { %3351 = vmatmul.mubr.f32.gmra.mxu1 %v2831_v18  ;;  %3419 = vmatmul.mubr.f32.gmra.mxu0 %v2833_v46  ;;  %v2801_v14 = vmul.f32 %v9265_v24, %v9457_v17  ;;  %v10698_v18 = vld [vmem:[#allocation48_spill] sm:$0xff] }
 0x2ad   : > { %6552 = vmatpush3.bf16.msra.mxu1 %v7580_v43  ;;  %6840 = vmatpush3.bf16.msra.mxu0 %v7581_v19  ;;  %v10695_v43 = vld [vmem:[#allocation51_spill] sm:$0xff]  ;;  %v10696_v19 = vld [vmem:[#allocation42_spill] sm:$0xff]  ;;  %v2800_v46 = vmul.f32 %v9265_v24, %v10698_v18 }
 0x2ae   : > { %3355 = vmatprep.mubr.f32.mxu1 %v2839_v13  ;;  %3423 = vmatprep.mubr.f32.mxu0 %v2841_v12  ;;  %v9483_v7 = vadd.f32 %v10696_v19, %v10695_v43  ;;  %v3715_v12 = vsel %vm3713_vm2, %v3681_v2, 0  ;;  %v7590_v43 = vld [vmem:[%s10533_s6 + $0x28] sm:$0xff]   ;;  %v10706_v19 = vld [vmem:[#allocation52_spill] sm:$0xff] }
 0x2af   : > { %6553 = vmatprep.subr.bf16.mxu1 %v7582_v33  ;;  %6841 = vmatprep.subr.bf16.mxu0 %v10675_v47  ;;  %v2802_v33 = vmul.f32 %v9265_v24, %v9240_v32 }
 0x2b0   : > { %3356 = vmatmul.mubr.f32.gmra.mxu1 %v2838_v6  ;;  %3424 = vmatmul.mubr.f32.gmra.mxu0 %v2840_v59  ;;  %10697 = vst [vmem:[#allocation27_spill] sm:$0xff] %v9483_v7  ;;  %v2808_v13 = vmul.f32 %v9297_v36, %v9483_v7  ;;  %v10702_v6 = vld [vmem:[#allocation50_spill] sm:$0xff] }
 0x2b1   : > { %6554 = vmatpush3.bf16.msra.mxu1 %v7583_v50  ;;  %6842 = vmatpush3.bf16.msra.mxu0 %v7584_v11  ;;  %v10699_v50 = vld [vmem:[#allocation53_spill] sm:$0xff]  ;;  %v10700_v11 = vld [vmem:[#allocation43_spill] sm:$0xff]  ;;  %v2807_v59 = vmul.f32 %v9297_v36, %v10702_v6 }
 0x2b2   : > { %3461 = vmatprep.mubr.f32.mxu1 %v2801_v14  ;;  %6555 = vmatprep.subr.bf16.mxu1 %v7585_v53  ;;  %v9497_v9 = vadd.f32 %v10700_v11, %v10699_v50  ;;  %v2809_v53 = vmul.f32 %v9297_v36, %v9243_v5  ;;  %v7591_v11 = vld [vmem:[%s10533_s6 + $0x20] sm:$0xff]  }
 0x2b3   : > { %6843 = vmatprep.subr.bf16.mxu0 %v10675_v47  ;;  %6845 = vmatprep.mubr.msk.f32.mxu0 %vm7955_vm1, %v10675_v47 }
 0x2b4   : > { %10701 = vst [vmem:[#allocation30_spill] sm:$0xff] %v9497_v9  ;;  %v2815_v14 = vmul.f32 %v9294_v51, %v9497_v9 }
 0x2b5   : > { %6556 = vmatpush3.bf16.msra.mxu1 %v7586_v23  ;;  %6844 = vmatpush3.bf16.msra.mxu0 %v7587_v40  ;;  %v10703_v23 = vld [vmem:[#allocation55_spill] sm:$0xff]  ;;  %v10704_v40 = vld [vmem:[#allocation44_spill] sm:$0xff] }
 0x2b6   : > { %6866 = vmatprep.subr.bf16.mxu1 %v10675_v47  ;;  %7108 = vmatprep.subr.msk.bf16.mxu0 %vm3713_vm2, %v3681_v2  ;;  %v9513_v2 = vadd.f32 %v10704_v40, %v10703_v23  ;;  %v10711_v23 = vld [vmem:[#allocation59_spill] sm:$0xff]  ;;  %v10712_v40 = vld [vmem:[#allocation46_spill] sm:$0xff] }
 0x2b8   : > { %3462 = vmatmul.mubr.f32.vlgmr.msra.gmra.mxu1 %v2800_v46  ;;  %6846 = vmatmul.mubr.f32.vlgmr.msra.gmra.mxu0 %v2802_v33  ;;  %10705 = vst [vmem:[#allocation26_spill] sm:$0xff] %v9513_v2  ;;  %v2816_v46 = vmul.f32 %v9294_v51, %v9246_v35  ;;  %v2822_v33 = vmul.f32 %v9335_v29, %v9513_v2 }
 0x2b9   : > { %3466 = vmatprep.mubr.f32.mxu1 %v2808_v13  ;;  %6867 = vmatpush3.bf16.msra.mxu1 %v7588_v58  ;;  %v2814_v58 = vmul.f32 %v9294_v51, %v10706_v19  ;;  %v10707_v13 = vld [vmem:[#allocation57_spill] sm:$0xff] }
 0x2ba   : > { %6848 = vmatprep.mubr.msk.f32.mxu0 %vm7955_vm1, %v10675_v47  ;;  %6868 = vmatprep.subr.bf16.mxu1 %v10675_v47 }
 0x2bb   : > { %6904 = vmatpush3.bf16.msra.mxu0 %v3715_v12  ;;  %v10708_v12 = vld [vmem:[#allocation45_spill] sm:$0xff] }
 0x2bc   : > { %3467 = vmatmul.mubr.f32.gmra.mxu1 %v2807_v59  ;;  %6849 = vmatmul.mubr.f32.gmra.mxu0 %v2809_v53  ;;  %v9530_v50 = vadd.f32 %v10708_v12, %v10707_v13  ;;  %v2823_v53 = vmul.f32 %v9335_v29, %v9248_v28  ;;  %v2830_v13 = vmul.f32 %v9365_v8, %v9250_v48 }
 0x2bd   : > { %3471 = vmatprep.mubr.f32.mxu1 %v2815_v14  ;;  %6869 = vmatpush3.bf16.msra.mxu1 %v7589_v21  ;;  %v10710_v21 = vld [vmem:[#allocation54_spill] sm:$0xff] }
 0x2be   : > { %6851 = vmatprep.mubr.msk.f32.mxu0 %vm7955_vm1, %v10675_v47  ;;  %6870 = vmatprep.subr.bf16.mxu1 %v10675_v47  ;;  %10709 = vst [vmem:[#allocation62_spill] sm:$0xff] %v9530_v50  ;;  %v2821_v59 = vmul.f32 %v9335_v29, %v10710_v21  ;;  %v2829_v14 = vmul.f32 %v9365_v8, %v9530_v50 }
 0x2bf   : > { %6913 = vmatprep.subr.bf16.mxu0 %v10675_v47 }
 0x2c0   : > { %3472 = vmatmul.mubr.f32.gmra.mxu1 %v2814_v58  ;;  %6852 = vmatmul.mubr.f32.gmra.mxu0 %v2816_v46  ;;  %v7592_v58 = vld [vmem:[%s10533_s6 + $0x18] sm:$0xff]  }
 0x2c1   : > { %3476 = vmatprep.mubr.f32.mxu1 %v2822_v33  ;;  %6871 = vmatpush3.bf16.msra.mxu1 %v7590_v43  ;;  %v9546_v43 = vadd.f32 %v10712_v40, %v10711_v23  ;;  %v10714_v46 = vld [vmem:[#allocation56_spill] sm:$0xff]  ;;  %v10718_v23 = vld [vmem:[#allocation58_spill] sm:$0xff] }
 0x2c2   : > { %6854 = vmatprep.mubr.msk.f32.mxu0 %vm7955_vm1, %v10675_v47  ;;  %6872 = vmatprep.subr.bf16.mxu1 %v10675_v47  ;;  %v2828_v33 = vmul.f32 %v9365_v8, %v10714_v46  ;;  %v2835_v40 = vmul.f32 %v9395_v60, %v10718_v23 }
 0x2c3   : > { %10713 = vst [vmem:[#allocation35_spill] sm:$0xff] %v9546_v43  ;;  %v2836_v12 = vmul.f32 %v9395_v60, %v9546_v43 }
 0x2c4   : > { %3477 = vmatmul.mubr.f32.gmra.mxu1 %v2821_v59  ;;  %6855 = vmatmul.mubr.f32.gmra.mxu0 %v2823_v53  ;;  %v10716_v59 = vld [vmem:[#allocation47_spill] sm:$0xff] }
 0x2c5   : > { %3481 = vmatprep.mubr.f32.mxu1 %v2829_v14  ;;  %6873 = vmatpush3.bf16.msra.mxu1 %v7591_v11  ;;  %v10715_v11 = vld [vmem:[#allocation61_spill] sm:$0xff]  ;;  %v7593_v14 = vld [vmem:[%s10533_s6 + $0x10] sm:$0xff]  }
 0x2c6   : > { %6857 = vmatprep.mubr.msk.f32.mxu0 %vm7955_vm1, %v10675_v47  ;;  %6874 = vmatprep.subr.bf16.mxu1 %v10675_v47  ;;  %v9562_v53 = vadd.f32 %v10716_v59, %v10715_v11  ;;  %v10719_v11 = vld [vmem:[#allocation60_spill] sm:$0xff] }
 0x2c7   : > { %v2842_v59 = vmul.f32 %v9425_v25, %v10719_v11 }
 0x2c8   : > { %3482 = vmatmul.mubr.f32.gmra.mxu1 %v2828_v33  ;;  %6858 = vmatmul.mubr.f32.gmra.mxu0 %v2830_v13  ;;  %10717 = vst [vmem:[#allocation40_spill] sm:$0xff] %v9562_v53  ;;  %v2837_v33 = vmul.f32 %v9395_v60, %v9252_v62  ;;  %v2843_v13 = vmul.f32 %v9425_v25, %v9562_v53 }
 0x2c9   : > { %3486 = vmatprep.mubr.f32.mxu1 %v2836_v12  ;;  %6875 = vmatpush3.bf16.msra.mxu1 %v7592_v58  ;;  %v7594_v58 = vld [vmem:[%s10533_s6 + $0x8] sm:$0xff]   ;;  %v7595_v12 = vld [vmem:[%s8908_s10] sm:$0xff]   ;;  %v2844_v62 = vmul.f32 %v9425_v25, %v9254_v54 }
 0x2ca   : > { %6860 = vmatprep.mubr.msk.f32.mxu0 %vm7955_vm1, %v10675_v47  ;;  %6876 = vmatprep.subr.bf16.mxu1 %v10675_v47 }
 0x2cc   : > { %3487 = vmatmul.mubr.f32.gmra.mxu1 %v2835_v40  ;;  %6861 = vmatmul.mubr.f32.gmra.mxu0 %v2837_v33  ;;  %v7597_v40 = vld [vmem:[%s10533_s6] sm:$0xff]   ;;  %v7598_v33 = vld [vmem:[%s8908_s10 + $0x10] sm:$0xff]  }
 0x2cd   : > { %3491 = vmatprep.mubr.f32.mxu1 %v2843_v13  ;;  %6877 = vmatpush3.bf16.msra.mxu1 %v7593_v14  ;;  %v7596_v14 = vld [vmem:[%s8908_s10 + $0x8] sm:$0xff]  }
 0x2ce   : > { %6863 = vmatprep.mubr.msk.f32.mxu0 %vm7955_vm1, %v10675_v47  ;;  %6878 = vmatprep.subr.bf16.mxu1 %v10675_v47 }
 0x2d0   : > { %3492 = vmatmul.mubr.f32.gmra.mxu1 %v2842_v59  ;;  %6864 = vmatmul.mubr.f32.gmra.mxu0 %v2844_v62  ;;  %v10720_v62 = vld [vmem:[#allocation20_spill] sm:$0xff] }
 0x2d1   : > { %6879 = vmatpush3.bf16.msra.mxu1 %v7594_v58  ;;  %6905 = vmatprep.mubr.msk.bf16.mxu0 %vm3700_vm3, %v7595_v12  ;;  %v2773_v13 = vmul.f32 %v9265_v24, %v10720_v62  ;;  %v7599_v58 = vld [vmem:[%s8908_s10 + $0x18] ss:$0 sps:$4 sm:$0xff]   ;;  %v10721_v12 = vld [vmem:[#allocation22_spill] sm:$0xff]  ;;  %v10722_v24 = vld [vmem:[#allocation19_spill] sm:$0xff]  ;;  %s7873_s10 = scalar_lea.vmem %s7872_s9, 1792 }
 0x2d2   : > { %6880 = vmatprep.subr.bf16.mxu1 %v10675_v47  ;;  %6882 = vmatprep.mubr.msk.f32.mxu1 %vm7955_vm1, %v10675_v47  ;;  %v2774_v59 = vmul.f32 %v9297_v36, %v10721_v12  ;;  %v10724_v36 = vld [vmem:[#allocation24_spill] sm:$0xff] }
 0x2d4   : > { %6906 = vmatmul.mubr.msk.bf16.vlgmr.msra.gmra.mxu0 %vm3700_vm3, %v7596_v14  ;;  %v2775_v14 = vmul.f32 %v10722_v24, %v9294_v51 }
 0x2d5   : > { %6881 = vmatpush3.bf16.msra.mxu1 %v7597_v40  ;;  %6909 = vmatprep.mubr.msk.bf16.mxu0 %vm3700_vm3, %v7598_v33  ;;  %v10723_v40 = vld [vmem:[#allocation21_spill] sm:$0xff] }
 0x2d6   : > { %6936 = vmatprep.subr.bf16.mxu1 %v10675_v47  ;;  %v2776_v33 = vmul.f32 %v10723_v40, %v9335_v29  ;;  %v10726_v29 = vld [vmem:[#allocation23_spill] sm:$0xff] }
 0x2d8   : > { %6883 = vmatmul.mubr.f32.vlgmr.msra.gmra.mxu1 %v2773_v13  ;;  %v2777_v13 = vmul.f32 %v9365_v8, %v10724_v36 }
 0x2d9   : > { %6885 = vmatprep.mubr.msk.f32.mxu1 %vm7955_vm1, %v10675_v47 }
 0x2dc   : > { %6886 = vmatmul.mubr.f32.gmra.mxu1 %v2774_v59  ;;  %6910 = vmatmul.mubr.msk.bf16.gmra.mxu0 %vm3700_vm3, %v7599_v58  ;;  %v10725_v58 = vld [vmem:[#allocation25_spill] sm:$0xff]  ;;  %v2779_v59 = vmul.f32 %v10726_v29, %v9425_v25 }
 0x2dd   : > { %6888 = vmatprep.mubr.msk.f32.mxu1 %vm7955_vm1, %v10675_v47  ;;  %6915 = vmatprep.mubr.msk.f32.mxu0 %vm7955_vm1, %v10675_v47  ;;  %v2778_v51 = vmul.f32 %v9395_v60, %v10725_v58 }
 0x2e0   : > { %6889 = vmatmul.mubr.f32.gmra.mxu1 %v2775_v14 }
 0x2e1   : > { %6891 = vmatprep.mubr.msk.f32.mxu1 %vm7955_vm1, %v10675_v47 }
 0x2e4   : > { %6892 = vmatmul.mubr.f32.gmra.mxu1 %v2776_v33 }
 0x2e5   : > { %6894 = vmatprep.mubr.msk.f32.mxu1 %vm7955_vm1, %v10675_v47 }
 0x2e8   : > { %6895 = vmatmul.mubr.f32.gmra.mxu1 %v2777_v13 }
 0x2e9   : > { %6897 = vmatprep.mubr.msk.f32.mxu1 %vm7955_vm1, %v10675_v47 }
 0x2ec   : > { %6898 = vmatmul.mubr.f32.gmra.mxu1 %v2778_v51 }
 0x2ed   : > { %6900 = vmatprep.mubr.msk.f32.mxu1 %vm7955_vm1, %v10675_v47 }
 0x2f0   : > { %6901 = vmatmul.mubr.f32.gmra.mxu1 %v2779_v59 }
 0x2f1   : > { %6940 = vmatprep.mubr.msk.f32.mxu1 %vm7955_vm1, %v10675_v47 }
 0x358   : > { %v9631_v14 = vpop.f32.mrf.mxu1  ;;  %v9633_v8 = vpop.f32.mrf.mxu0 }
 0x35a   : > { %v9635_v33 = vpop.f32.mrf.mxu1  ;;  %v9637_v13 = vpop.f32.mrf.mxu0 }
 0x35c   : > { %v9639_v60 = vpop.f32.mrf.mxu1  ;;  %v9641_v51 = vpop.f32.mrf.mxu0 }
 0x35e   : > { %v9643_v54 = vpop.f32.mrf.mxu1  ;;  %v9645_v58 = vpop.f32.mrf.mxu0 }
 0x35f   : > { %v6488_v6 = vadd.f32 %v9643_v54, %v9639_v60  ;;  %v6525_v10 = vadd.f32 %v9645_v58, %v9641_v51 }
 0x360   : > { %v6489_v25 = vpop.f32.mrf.mxu1  ;;  %v6526_v59 = vpop.f32.mrf.mxu0 }
 0x362   : > { %v6490_v29 = vpop.f32.mrf.mxu1  ;;  %v6527_v36 = vpop.f32.mrf.mxu0 }
 0x363   : > { %v6491_v48 = vadd.f32 %v6490_v29, %v6489_v25  ;;  %v6528_v40 = vadd.f32 %v6527_v36, %v6526_v59 }
 0x364   : > { %v6492_v28 = vpop.f32.mrf.mxu1  ;;  %v6529_v24 = vpop.f32.mrf.mxu0 }
 0x365   : > { %v9647_v35 = vadd.f32 %v6528_v40, %v6491_v48 }
 0x366   : > { %v6493_v12 = vpop.f32.mrf.mxu1  ;;  %v6530_v5 = vpop.f32.mrf.mxu0 }
 0x367   : > { %v6494_v62 = vadd.f32 %v6493_v12, %v6492_v28  ;;  %v6531_v32 = vadd.f32 %v6530_v5, %v6529_v24 }
 0x368   : > { %v6495_v11 = vpop.f32.mrf.mxu1  ;;  %v6532_v53 = vpop.f32.mrf.mxu0 }
 0x369   : > { %v9649_v41 = vadd.f32 %v6531_v32, %v6494_v62 }
 0x36a   : > { %v6496_v57 = vpop.f32.mrf.mxu1  ;;  %v6533_v23 = vpop.f32.mrf.mxu0 }
 0x36b   : > { %v6497_v43 = vadd.f32 %v6496_v57, %v6495_v11  ;;  %v6534_v26 = vadd.f32 %v6533_v23, %v6532_v53 }
 0x36c   : > { %v6498_v61 = vpop.f32.mrf.mxu1  ;;  %v6535_v46 = vpop.f32.mrf.mxu0 }
 0x36d   : > { %v9651_v29 = vadd.f32 %v6534_v26, %v6497_v43 }
 0x36e   : > { %v6499_v36 = vpop.f32.mrf.mxu1  ;;  %v6536_v25 = vpop.f32.mrf.mxu0 }
 0x36f   : > { %v6500_v48 = vadd.f32 %v6499_v36, %v6498_v61  ;;  %v6537_v40 = vadd.f32 %v6536_v25, %v6535_v46 }
 0x370   : > { %v6501_v59 = vpop.f32.mrf.mxu1  ;;  %v6538_v50 = vpop.f32.mrf.mxu0 }
 0x371   : > { %v3421_v28 = vadd.f32 %v6537_v40, %v6500_v48 }
 0x372   : > { %v6502_v5 = vpop.f32.mrf.mxu1  ;;  %v6539_v12 = vpop.f32.mrf.mxu0 }
 0x373   : > { %v6503_v24 = vadd.f32 %v6502_v5, %v6501_v59  ;;  %v6540_v32 = vadd.f32 %v6539_v12, %v6538_v50 }
 0x375   : > { %v3426_v62 = vadd.f32 %v6540_v32, %v6503_v24 }
 0x378   : > { %v6557_v56 = vpop.f32.mrf.mxu1  ;;  %v3531_v16 = vpop.f32.mrf.mxu0 }
 0x37a   : > { %v6558_v57 = vpop.f32.mrf.mxu1  ;;  %v6847_v53 = vpop.f32.mrf.mxu0 }
 0x37b   : > { %v6559_v63 = vadd.f32 %v6558_v57, %v6557_v56 }
 0x37c   : > { %v6560_v23 = vpop.f32.mrf.mxu1  ;;  %v3536_v11 = vpop.f32.mrf.mxu0 }
 0x37e   : > { %v6561_v26 = vpop.f32.mrf.mxu1  ;;  %v6850_v43 = vpop.f32.mrf.mxu0 }
 0x37f   : > { %v6485_v43 = vadd.f32 %v9635_v33, %v9631_v14 }
 0x380   : > { %v9653_v21 = vpop.f32.mrf.mxu1  ;;  %v9655_v61 = vpop.f32.mrf.mxu0 }
 0x382   : > { %v9657_v46 = vpop.f32.mrf.mxu1  ;;  %v6853_v36 = vpop.f32.mrf.mxu0 }
 0x383   : > { %v6522_v36 = vadd.f32 %v9637_v13, %v9633_v8  ;;  %v3401_v13 = vadd.f32 %v6525_v10, %v6488_v6 }
 0x384   : > { %v9659_v25 = vpop.f32.mrf.mxu1  ;;  %v9661_v48 = vpop.f32.mrf.mxu0 }
 0x385   : > { %v3396_v20 = vadd.f32 %v6522_v36, %v6485_v43  ;;  %v6565_v36 = vadd.f32 %v9657_v46, %v9653_v21 }
 0x386   : > { %v9663_v50 = vpop.f32.mrf.mxu1  ;;  %v6856_v40 = vpop.f32.mrf.mxu0 }
 0x387   : > { %v3464_v14 = vadd.f32 %v6559_v63, %v3396_v20 }
 0x388   : > { %v9665_v59 = vpop.f32.mrf.mxu1  ;;  %v9667_v5 = vpop.f32.mrf.mxu0 }
 0x389   : > { %v3532_v57 = vadd.f32 %v3531_v16, %v3464_v14  ;;  %v3474_v14 = vadd.f32 %v6565_v36, %v9647_v35 }
 0x38a   : > { %v9669_v12 = vpop.f32.mrf.mxu1  ;;  %v6859_v24 = vpop.f32.mrf.mxu0 }
 0x38b   : > { %v3542_v21 = vadd.f32 %v9655_v61, %v3474_v14  ;;  %v6568_v61 = vadd.f32 %v9663_v50, %v9659_v25 }
 0x38c   : > { %v6572_v32 = vpop.f32.mrf.mxu1  ;;  %v3556_v53 = vpop.f32.mrf.mxu0 }
 0x38e   : > { %v6573_v2 = vpop.f32.mrf.mxu1  ;;  %v6862_v44 = vpop.f32.mrf.mxu0 }
 0x38f   : > { %v6574_v19 = vadd.f32 %v6573_v2, %v6572_v32  ;;  %v6562_v44 = vadd.f32 %v6561_v26, %v6560_v23 }
 0x390   : > { %v6575_v40 = vpop.f32.mrf.mxu1  ;;  %v3561_v9 = vpop.f32.mrf.mxu0 }
 0x391   : > { %v3489_v15 = vadd.f32 %v6574_v19, %v3421_v28  ;;  %v3469_v54 = vadd.f32 %v6562_v44, %v3401_v13 }
 0x392   : > { %v6576_v24 = vpop.f32.mrf.mxu1  ;;  %v6865_v7 = vpop.f32.mrf.mxu0 }
 0x393   : > { %v6577_v33 = vadd.f32 %v6576_v24, %v6575_v40  ;;  %v9679_v55 = vadd.f32 %v3556_v53, %v3489_v15  ;;  %v3998_v15 = vld [vmem:[%s10540_s13] sm:$0x3] }
 0x394   : > { %v9681_v8 = vpop.f32.mrf.mxu0  ;;  %v9694_v16 = vsel %vm4021_vm5, %v3998_v15, 0 }
 0x395   : > { %v3494_v56 = vadd.f32 %v6577_v33, %v3426_v62  ;;  %6914 = vmatpush3.bf16.msra.mxu0 %v9694_v16  ;;  %vm3783_vm8 = vcmp.eq.f32.partialorder %v9681_v8, 0.0  ;;  %v3479_v8 = vadd.f32 %v6568_v61, %v9649_v41 }
 0x396   : > { %v3751_v2 = vpop.f32.mrf.mxu0  ;;  %6961 = vmatprep.subr.bf16.mxu0 %v10675_v47 }
 0x397   : > { %v3562_v19 = vadd.f32 %v3561_v9, %v3494_v56  ;;  %vm3781_vm4 = vcmp.eq.f32.partialorder %v3751_v2, 0.0  ;;  %v3537_v9 = vadd.f32 %v3536_v11, %v3469_v54  ;;  %v3547_v54 = vadd.f32 %v9661_v48, %v3479_v8 }
 0x398   : > { %v3647_v28 = vpop.f32.mrf.mxu1  ;;  %v9683_v32 = vpop.f32.mrf.mxu0 }
 0x399   : > { %v3648_v7 = vadd.f32 %v3647_v28, %v3532_v57  ;;  %vm3784_vm9 = vcmp.eq.f32.partialorder %v9683_v32, 0.0 }
 0x39a   : > { %v6884_v60 = vpop.f32.mrf.mxu1  ;;  %v3754_v58 = vpop.f32.mrf.mxu0 }
 0x39b   : > { %v9685_v20 = vsel %vm3781_vm4, -1e+09, %v3648_v7  ;;  %vm3782_vm6 = vcmp.eq.f32.partialorder %v3754_v58, 0.0 }
 0x39c   : > { %v3652_v63 = vpop.f32.mrf.mxu1  ;;  %3830 = vrot.lane.b32.xlu0 %v9685_v20, %s7956_s16  ;;  %3802 = vrot.lane.b32.xlu1 %v9685_v20, %s7957_s4  ;;  %v6911_v10 = vpop.f32.mrf.mxu0 }
 0x39d   : > { %v3653_v62 = vadd.f32 %v3652_v63, %v3537_v9  ;;  %vm3787_vm7 = vcmp.eq.f32.partialorder %v6911_v10, 0.0 }
 0x39e   : > { %v6887_v6 = vpop.f32.mrf.mxu1  ;;  %v9697_v51 = vpop.f32.mrf.mxu0 }
 0x39f   : > { %v9704_v53 = vsel %vm3782_vm6, -1e+09, %v3653_v62  ;;  %vm3785_vm10 = vcmp.eq.f32.partialorder %v9697_v51, 0.0 }
 0x3a0   : > { %v3657_v23 = vpop.f32.mrf.mxu1  ;;  %3942 = vrot.lane.b32.xlu0 %v9685_v20, %s7958_s15  ;;  %3858 = vrot.lane.b32.xlu1 %v9685_v20, %s7959_s5  ;;  %v6912_v26 = vpop.f32.mrf.mxu0 }
 0x3a1   : > { %v3658_v56 = vadd.f32 %v3657_v23, %v3542_v21 }
 0x3a2   : > { %v6890_v11 = vpop.f32.mrf.mxu1 }
 0x3a3   : > { %v9727_v57 = vsel %vm3783_vm8, -1e+09, %v3658_v56 }
 0x3a4   : > { %v3662_v43 = vpop.f32.mrf.mxu1  ;;  %3804 = vrot.lane.b32.xlu0 %v9704_v53, %s7957_s4  ;;  %3886 = vrot.lane.b32.xlu1 %v9685_v20, %s7960_s26 }
 0x3a5   : > { %v3663_v25 = vadd.f32 %v3662_v43, %v3547_v54 }
 0x3a6   : > { %v6893_v40 = vpop.f32.mrf.mxu1 }
 0x3a7   : > { %v9755_v50 = vsel %vm3784_vm9, -1e+09, %v3663_v25 }
 0x3a8   : > { %v3667_v24 = vpop.f32.mrf.mxu1  ;;  %3832 = vrot.lane.b32.xlu0 %v9704_v53, %s7956_s16  ;;  %3914 = vrot.lane.b32.xlu1 %v9685_v20, %s7961_s25 }
 0x3aa   : > { %v6896_v33 = vpop.f32.mrf.mxu1 }
 0x3ac   : > { %v3672_v44 = vpop.f32.mrf.mxu1  ;;  %3888 = vrot.lane.b32.xlu0 %v9704_v53, %s7960_s26  ;;  %3970 = vrot.lane.b32.xlu1 %v9685_v20, %s7962_s29 }
 0x3ae   : > { %v6899_v46 = vpop.f32.mrf.mxu1 }
 0x3b0   : > { %v3677_v2 = vpop.f32.mrf.mxu1  ;;  %3916 = vrot.lane.b32.xlu0 %v9704_v53, %s7961_s25  ;;  %3860 = vrot.lane.b32.xlu1 %v9704_v53, %s7959_s5 }
 0x3b1   : > { %v3678_v35 = vadd.f32 %v3677_v2, %v3562_v19  ;;  %v6571_v19 = vadd.f32 %v9669_v12, %v9665_v59  ;;  %v3673_v12 = vadd.f32 %v3672_v44, %v9679_v55 }
 0x3b2   : > { %v6902_v13 = vpop.f32.mrf.mxu1 }
 0x3b3   : > { %v9729_v28 = vsel %vm3787_vm7, -1e+09, %v3678_v35  ;;  %v3484_v41 = vadd.f32 %v6571_v19, %v9651_v29 }
 0x3b4   : > { %3806 = vrot.lane.b32.xlu0 %v9727_v57, %s7957_s4  ;;  %3944 = vrot.lane.b32.xlu1 %v9704_v53, %s7958_s15 }
 0x3b5   : > { %v3552_v48 = vadd.f32 %v9667_v5, %v3484_v41  ;;  %v3770_v5 = vpop.f32.mrf.mxu0 }
 0x3b6   : > { %vm3786_vm11 = vcmp.eq.f32.partialorder %v3770_v5, 0.0 }
 0x3b7   : > { %v3668_v59 = vadd.f32 %v3667_v24, %v3552_v48  ;;  %v9790_v32 = vsel %vm3786_vm11, -1e+09, %v3673_v12 }
 0x3b8   : > { %3890 = vrot.lane.b32.xlu0 %v9727_v57, %s7960_s26  ;;  %3972 = vrot.lane.b32.xlu1 %v9704_v53, %s7962_s29 }
 0x3b9   : > { %v9767_v29 = vsel %vm3785_vm10, -1e+09, %v3668_v59 }
 0x3bc   : > { %3918 = vrot.lane.b32.xlu0 %v9727_v57, %s7961_s25  ;;  %3834 = vrot.lane.b32.xlu1 %v9727_v57, %s7956_s16 }
 0x3c0   : > { %3946 = vrot.lane.b32.xlu0 %v9727_v57, %s7958_s15  ;;  %3862 = vrot.lane.b32.xlu1 %v9727_v57, %s7959_s5 }
 0x3c4   : > { %3974 = vrot.lane.b32.xlu0 %v9727_v57, %s7962_s29  ;;  %3836 = vrot.lane.b32.xlu1 %v9755_v50, %s7956_s16 }
 0x3c8   : > { %3808 = vrot.lane.b32.xlu0 %v9755_v50, %s7957_s4  ;;  %3864 = vrot.lane.b32.xlu1 %v9755_v50, %s7959_s5 }
 0x3cc   : > { %3810 = vrot.lane.b32.xlu0 %v9767_v29, %s7957_s4  ;;  %3892 = vrot.lane.b32.xlu1 %v9755_v50, %s7960_s26 }
 0x3d0   : > { %3838 = vrot.lane.b32.xlu0 %v9767_v29, %s7956_s16  ;;  %3920 = vrot.lane.b32.xlu1 %v9755_v50, %s7961_s25 }
 0x3d4   : > { %3866 = vrot.lane.b32.xlu0 %v9767_v29, %s7959_s5  ;;  %3948 = vrot.lane.b32.xlu1 %v9755_v50, %s7958_s15 }
 0x3d8   : > { %3894 = vrot.lane.b32.xlu0 %v9767_v29, %s7960_s26  ;;  %3976 = vrot.lane.b32.xlu1 %v9755_v50, %s7962_s29 }
 0x3dc   : > { %3922 = vrot.lane.b32.xlu0 %v9767_v29, %s7961_s25  ;;  %3978 = vrot.lane.b32.xlu1 %v9767_v29, %s7962_s29 }
 0x3e0   : > { %3950 = vrot.lane.b32.xlu0 %v9767_v29, %s7958_s15  ;;  %3812 = vrot.lane.b32.xlu1 %v9790_v32, %s7957_s4 }
 0x3e4   : > { %3924 = vrot.lane.b32.xlu0 %v9790_v32, %s7961_s25  ;;  %3840 = vrot.lane.b32.xlu1 %v9790_v32, %s7956_s16 }
 0x3e8   : > { %3814 = vrot.lane.b32.xlu0 %v9729_v28, %s7957_s4  ;;  %3868 = vrot.lane.b32.xlu1 %v9790_v32, %s7959_s5 }
 0x3ec   : > { %3842 = vrot.lane.b32.xlu0 %v9729_v28, %s7956_s16  ;;  %3896 = vrot.lane.b32.xlu1 %v9790_v32, %s7960_s26  ;;  %s7111_s16 = smul.u32 56, %s8189_s23 }
 0x3ee   : > { %s10440_s4 = scalar_lea.vmem [#allocation11], %s7111_s16 }
 0x3f0   : > { %3898 = vrot.lane.b32.xlu0 %v9729_v28, %s7960_s26  ;;  %3952 = vrot.lane.b32.xlu1 %v9790_v32, %s7958_s15  ;;  %s10766_s26 = sld [smem:[#allocation79_spill]] }
 0x3f4   : > { %3926 = vrot.lane.b32.xlu0 %v9729_v28, %s7961_s25  ;;  %3870 = vrot.lane.b32.xlu1 %v9729_v28, %s7959_s5 }
 0x3f8   : > { %3954 = vrot.lane.b32.xlu0 %v9729_v28, %s7958_s15  ;;  %3980 = vrot.lane.b32.xlu1 %v9790_v32, %s7962_s29  ;;  %s5795_s15 = sshll.u32 %s10440_s4, 4  ;;  %s10482_s15 = int_to_ptr.vmem [resolvable:$true] %s5795_s15 }
 0x3f9   : > { %p7874_p0 = scmp.lt.s32.totalorder %s10482_s15, %s7872_s9 }
 0x3fc   : > { %3982 = vrot.lane.b32.xlu1 %v9729_v28, %s7962_s29  ;;  %s7867_s29 = scalar_lea.vmem %s10482_s15, 896 }
 0x3fd   : > { %p7868_p1 = scmp.ne.s32.totalorder %s10482_s15, %s7867_s29  ;;  %p7875_p5 = scmp.lt.s32.totalorder %s7873_s10, %s7867_s29 }
 0x3ff   : > { %p7869_p13 = pnand %p7868_p1, %p10767_p9  ;;  %p7876_p10 = por %p7875_p5, %p7874_p0 }
 0x401   : > { %p7870_p2 = pneg %p7869_p13 }
 0x403   : > { %p7877_p3 = pnand %p7876_p10, %p7870_p2 }
 0x40e   : > { %v3831_v55 = vpop.permute.xlu0 %3830  ;;  %v3803_v7 = vpop.permute.xlu1 %3802 }
 0x40f   : > { %v3823_v60 = vmax.f32 %v9685_v20, %v3803_v7 }
 0x411   : > { %v3851_v63 = vmax.f32 %v3823_v60, %v3831_v55 }
 0x412   : > { %v3943_v58 = vpop.permute.xlu0 %3942  ;;  %v3859_v15 = vpop.permute.xlu1 %3858 }
 0x413   : > { %v3879_v6 = vmax.f32 %v3851_v63, %v3859_v15 }
 0x416   : > { %v3805_v10 = vpop.permute.xlu0 %3804  ;;  %v3887_v9 = vpop.permute.xlu1 %3886 }
 0x417   : > { %v3907_v51 = vmax.f32 %v3879_v6, %v3887_v9  ;;  %v3824_v40 = vmax.f32 %v9704_v53, %v3805_v10 }
 0x41a   : > { %v3833_v62 = vpop.permute.xlu0 %3832  ;;  %v3915_v23 = vpop.permute.xlu1 %3914 }
 0x41b   : > { %v3935_v26 = vmax.f32 %v3907_v51, %v3915_v23  ;;  %v3852_v14 = vmax.f32 %v3824_v40, %v3833_v62 }
 0x41d   : > { %v3963_v11 = vmax.f32 %v3935_v26, %v3943_v58 }
 0x41e   : > { %v3889_v43 = vpop.permute.xlu0 %3888  ;;  %v3971_v36 = vpop.permute.xlu1 %3970 }
 0x41f   : > { %v3991_v24 = vmax.f32 %v3963_v11, %v3971_v36 }
 0x421   : > { %6916 = vmatmul.mubr.msk.f32.vlgmr.msra.gmra.mxu0 %vm3999_vm12, %v3991_v24 }
 0x422   : > { %v3917_v33 = vpop.permute.xlu0 %3916  ;;  %v3861_v44 = vpop.permute.xlu1 %3860  ;;  %6918 = vmatprep.mubr.msk.f32.mxu0 %vm7955_vm1, %v10675_v47  ;;  %6962 = vmatpush3.bf16.msra.mxu0 %v9694_v16 }
 0x423   : > { %v3880_v21 = vmax.f32 %v3852_v14, %v3861_v44 }
 0x425   : > { %v3908_v46 = vmax.f32 %v3880_v21, %v3889_v43 }
 0x426   : > { %v3807_v56 = vpop.permute.xlu0 %3806  ;;  %v3945_v2 = vpop.permute.xlu1 %3944 }
 0x427   : > { %v3936_v35 = vmax.f32 %v3908_v46, %v3917_v33  ;;  %v3825_v41 = vmax.f32 %v9727_v57, %v3807_v56 }
 0x429   : > { %v3964_v13 = vmax.f32 %v3936_v35, %v3945_v2 }
 0x42a   : > { %v3891_v61 = vpop.permute.xlu0 %3890  ;;  %v3973_v8 = vpop.permute.xlu1 %3972 }
 0x42b   : > { %v3992_v19 = vmax.f32 %v3964_v13, %v3973_v8 }
 0x42d   : > { %6919 = vmatmul.mubr.msk.f32.gmra.mxu0 %vm3999_vm12, %v3992_v19 }
 0x42e   : > { %v3919_v54 = vpop.permute.xlu0 %3918  ;;  %v3835_v25 = vpop.permute.xlu1 %3834  ;;  %6921 = vmatprep.mubr.msk.f32.mxu0 %vm7955_vm1, %v10675_v47 }
 0x42f   : > { %v3853_v48 = vmax.f32 %v3825_v41, %v3835_v25 }
 0x432   : > { %v3947_v16 = vpop.permute.xlu0 %3946  ;;  %v3863_v59 = vpop.permute.xlu1 %3862 }
 0x433   : > { %v3881_v5 = vmax.f32 %v3853_v48, %v3863_v59 }
 0x435   : > { %v3909_v12 = vmax.f32 %v3881_v5, %v3891_v61 }
 0x436   : > { %v3975_v55 = vpop.permute.xlu0 %3974  ;;  %v3837_v7 = vpop.permute.xlu1 %3836 }
 0x437   : > { %v3937_v60 = vmax.f32 %v3909_v12, %v3919_v54 }
 0x439   : > { %v3965_v58 = vmax.f32 %v3937_v60, %v3947_v16 }
 0x43a   : > { %v3809_v15 = vpop.permute.xlu0 %3808  ;;  %v3865_v63 = vpop.permute.xlu1 %3864 }
 0x43b   : > { %v3993_v10 = vmax.f32 %v3965_v58, %v3975_v55  ;;  %v3826_v9 = vmax.f32 %v9755_v50, %v3809_v15 }
 0x43d   : > { %v3854_v6 = vmax.f32 %v3826_v9, %v3837_v7  ;;  %6922 = vmatmul.mubr.msk.f32.gmra.mxu0 %vm3999_vm12, %v3993_v10 }
 0x43e   : > { %v3811_v51 = vpop.permute.xlu0 %3810  ;;  %v3893_v62 = vpop.permute.xlu1 %3892  ;;  %6924 = vmatprep.mubr.msk.f32.mxu0 %vm7955_vm1, %v10675_v47 }
 0x43f   : > { %v3882_v23 = vmax.f32 %v3854_v6, %v3865_v63  ;;  %v3827_v14 = vmax.f32 %v9767_v29, %v3811_v51 }
 0x441   : > { %v3910_v43 = vmax.f32 %v3882_v23, %v3893_v62 }
 0x442   : > { %v3839_v26 = vpop.permute.xlu0 %3838  ;;  %v3921_v11 = vpop.permute.xlu1 %3920 }
 0x443   : > { %v3938_v24 = vmax.f32 %v3910_v43, %v3921_v11  ;;  %v3855_v46 = vmax.f32 %v3827_v14, %v3839_v26 }
 0x446   : > { %v3867_v36 = vpop.permute.xlu0 %3866  ;;  %v3949_v40 = vpop.permute.xlu1 %3948 }
 0x447   : > { %v3966_v33 = vmax.f32 %v3938_v24, %v3949_v40  ;;  %v3883_v2 = vmax.f32 %v3855_v46, %v3867_v36  ;;  %v7600_v46 = vld [vmem:[%s10541_s14 + $0x8] sm:$0xff]  }
 0x448   : > { %6937 = vmatpush3.bf16.msra.mxu1 %v7600_v46 }
 0x449   : > { %6938 = vmatprep.subr.bf16.mxu1 %v10675_v47 }
 0x44a   : > { %v3895_v44 = vpop.permute.xlu0 %3894  ;;  %v3977_v21 = vpop.permute.xlu1 %3976 }
 0x44b   : > { %v3994_v56 = vmax.f32 %v3966_v33, %v3977_v21  ;;  %v3911_v61 = vmax.f32 %v3883_v2, %v3895_v44 }
 0x44d   : > { %6925 = vmatmul.mubr.msk.f32.gmra.mxu0 %vm3999_vm12, %v3994_v56  ;;  %v7601_v56 = vld [vmem:[%s10541_s14] sm:$0xff]  }
 0x44e   : > { %v3923_v35 = vpop.permute.xlu0 %3922  ;;  %v3979_v13 = vpop.permute.xlu1 %3978  ;;  %6927 = vmatprep.mubr.msk.f32.mxu0 %vm7955_vm1, %v10675_v47  ;;  %6939 = vmatpush3.bf16.msra.mxu1 %v7601_v56 }
 0x44f   : > { %v3939_v8 = vmax.f32 %v3911_v61, %v3923_v35  ;;  %6984 = vmatprep.subr.bf16.mxu1 %v10675_v47 }
 0x452   : > { %v3951_v19 = vpop.permute.xlu0 %3950  ;;  %v3813_v54 = vpop.permute.xlu1 %3812 }
 0x453   : > { %v3967_v25 = vmax.f32 %v3939_v8, %v3951_v19  ;;  %v3828_v12 = vmax.f32 %v9790_v32, %v3813_v54 }
 0x455   : > { %v3995_v41 = vmax.f32 %v3967_v25, %v3979_v13 }
 0x456   : > { %v3925_v48 = vpop.permute.xlu0 %3924  ;;  %v3841_v16 = vpop.permute.xlu1 %3840 }
 0x457   : > { %6928 = vmatmul.mubr.msk.f32.gmra.mxu0 %vm3999_vm12, %v3995_v41  ;;  %v3856_v55 = vmax.f32 %v3828_v12, %v3841_v16 }
 0x458   : > { %6930 = vmatprep.mubr.msk.f32.mxu0 %vm7955_vm1, %v10675_v47 }
 0x45a   : > { %v3815_v59 = vpop.permute.xlu0 %3814  ;;  %v3869_v5 = vpop.permute.xlu1 %3868 }
 0x45b   : > { %v3884_v58 = vmax.f32 %v3856_v55, %v3869_v5  ;;  %v3829_v9 = vmax.f32 %v9729_v28, %v3815_v59 }
 0x45e   : > { %v3843_v7 = vpop.permute.xlu0 %3842  ;;  %v3897_v60 = vpop.permute.xlu1 %3896 }
 0x45f   : > { %v3912_v15 = vmax.f32 %v3884_v58, %v3897_v60  ;;  %v3857_v6 = vmax.f32 %v3829_v9, %v3843_v7 }
 0x461   : > { %v3940_v51 = vmax.f32 %v3912_v15, %v3925_v48 }
 0x462   : > { %v3899_v63 = vpop.permute.xlu0 %3898  ;;  %v3953_v10 = vpop.permute.xlu1 %3952 }
 0x463   : > { %v3968_v11 = vmax.f32 %v3940_v51, %v3953_v10 }
 0x466   : > { %v3927_v62 = vpop.permute.xlu0 %3926  ;;  %v3871_v23 = vpop.permute.xlu1 %3870 }
 0x467   : > { %v3885_v26 = vmax.f32 %v3857_v6, %v3871_v23 }
 0x469   : > { %v3913_v43 = vmax.f32 %v3885_v26, %v3899_v63 }
 0x46a   : > { %v3981_v36 = vpop.permute.xlu1 %3980  ;;  %v3955_v14 = vpop.permute.xlu0 %3954 }
 0x46b   : > { %v3941_v40 = vmax.f32 %v3913_v43, %v3927_v62  ;;  %v3996_v24 = vmax.f32 %v3968_v11, %v3981_v36 }
 0x46d   : > { %v3969_v33 = vmax.f32 %v3941_v40, %v3955_v14  ;;  %6931 = vmatmul.mubr.msk.f32.gmra.mxu0 %vm3999_vm12, %v3996_v24 }
 0x46e   : > { %v3983_v44 = vpop.permute.xlu1 %3982  ;;  %6933 = vmatprep.mubr.msk.f32.mxu0 %vm7955_vm1, %v10675_v47 }
 0x46f   : > { %v3997_v21 = vmax.f32 %v3969_v33, %v3983_v44 }
 0x471   : > { %6934 = vmatmul.mubr.msk.f32.gmra.mxu0 %vm3999_vm12, %v3997_v21 }
 0x472   : > { %6963 = vmatprep.mubr.msk.f32.mxu0 %vm7955_vm1, %v10675_v47 }
 0x4e1   : > { %v4059_v2 = vpop.f32.mrf.mxu0 }
 0x4e2   : > { %v4093_v35 = vsub.f32 %v9685_v20, %v4059_v2 }
 0x4e3   : > { %v6917_v13 = vpop.f32.mrf.mxu0 }
 0x4e4   : > { %v4100_v61 = vmul.f32 1.442695, %v4093_v35 }
 0x4e6   : > { %7691 = vpow2.f32 %v4100_v61  ;;  %v7602_v61 = vld [vmem:[#allocation10 + $0x38] ss:$28 sps:$4 sm:$0xff]  }
 0x4ed   : > { %v4064_v8 = vpop.f32.mrf.mxu0 }
 0x4ee   : > { %v4094_v19 = vsub.f32 %v9704_v53, %v4064_v8  ;;  %v7604_v8 = vld [vmem:[#allocation10 + $0x3c] ss:$28 sps:$4 sm:$0xff]  }
 0x4ef   : > { %v6920_v54 = vpop.f32.mrf.mxu0  ;;  %4528 = vmatprep.subr.bf16.mxu0 %v7604_v8  ;;  %v7626_v8 = vld [vmem:[%s10538_s11 + $0x70] sm:$0xff]  }
 0x4f0   : > { %v4102_v25 = vmul.f32 1.442695, %v4094_v19  ;;  %v7605_v19 = vld [vmem:[#allocation8 + $0x8] sm:$0xff]  }
 0x4f2   : > { %7693 = vpow2.f32 %v4102_v25  ;;  %v7608_v25 = vld [vmem:[#allocation10 + $0x4] ss:$28 sps:$4 sm:$0xff]  }
 0x4f3   : > { %v9861_v41 = vpop.eup %7691 }
 0x4f4   : > { %6941 = vmatmul.mubr.msk.f32.vlgmr.msra.gmra.mxu1 %vm4130_vm13, %v9861_v41 }
 0x4f5   : > { %6943 = vmatprep.mubr.msk.f32.mxu1 %vm7955_vm1, %v10675_v47  ;;  %6985 = vmatpush3.bf16.msra.mxu1 %v7605_v19  ;;  %v7623_v19 = vld [vmem:[#allocation10 + $0x18] ss:$28 sps:$4 sm:$0xff]  }
 0x4f6   : > { %6986 = vmatprep.subr.bf16.mxu1 %v10675_v47 }
 0x4fd   : > { %v4069_v48 = vpop.f32.mrf.mxu0 }
 0x4fe   : > { %v4095_v20 = vsub.f32 %v9727_v57, %v4069_v48  ;;  %v7606_v48 = vld [vmem:[#allocation10] ss:$28 sps:$4 sm:$0xff]  }
 0x4ff   : > { %v9868_v16 = vpop.eup %7693  ;;  %v6923_v59 = vpop.f32.mrf.mxu0 }
 0x500   : > { %v4104_v5 = vmul.f32 1.442695, %v4095_v20  ;;  %6944 = vmatmul.mubr.msk.f32.gmra.mxu1 %vm4130_vm13, %v9868_v16  ;;  %v7609_v20 = vld [vmem:[#allocation8] sm:$0xff]   ;;  %v7612_v59 = vld [vmem:[#allocation10 + $0x44] ss:$28 sps:$4 sm:$0xff]  }
 0x501   : > { %6946 = vmatprep.mubr.msk.f32.mxu1 %vm7955_vm1, %v10675_v47  ;;  %6987 = vmatpush3.bf16.msra.mxu1 %v7609_v20  ;;  %v7630_v20 = vld [vmem:[%s10538_s11 + $0x60] sm:$0xff]  }
 0x502   : > { %7695 = vpow2.f32 %v4104_v5  ;;  %v7615_v5 = vld [vmem:[#allocation10 + $0x4c] ss:$28 sps:$4 sm:$0xff]   ;;  %4603 = vmatprep.subr.bf16.mxu1 %v7612_v59  ;;  %v7631_v59 = vld [vmem:[%s10538_s11 + $0x20] sm:$0xff]  }
 0x50d   : > { %v4074_v53 = vpop.f32.mrf.mxu0 }
 0x50e   : > { %v4096_v12 = vsub.f32 %v9755_v50, %v4074_v53 }
 0x50f   : > { %v9875_v55 = vpop.eup %7695  ;;  %v6926_v7 = vpop.f32.mrf.mxu0 }
 0x510   : > { %v4106_v60 = vmul.f32 1.442695, %v4096_v12  ;;  %6947 = vmatmul.mubr.msk.f32.gmra.mxu1 %vm4130_vm13, %v9875_v55 }
 0x511   : > { %6949 = vmatprep.mubr.msk.f32.mxu1 %vm7955_vm1, %v10675_v47 }
 0x512   : > { %7697 = vpow2.f32 %v4106_v60 }
 0x517   : > { %v4079_v57 = vpop.f32.mrf.mxu0 }
 0x518   : > { %v4097_v58 = vsub.f32 %v9767_v29, %v4079_v57 }
 0x519   : > { %v6929_v15 = vpop.f32.mrf.mxu0 }
 0x51a   : > { %v4108_v63 = vmul.f32 1.442695, %v4097_v58  ;;  %v7610_v15 = vld [vmem:[#allocation10 + $0x40] ss:$28 sps:$4 sm:$0xff]  }
 0x51c   : > { %7699 = vpow2.f32 %v4108_v63  ;;  %v7613_v63 = vld [vmem:[#allocation10 + $0x48] ss:$28 sps:$4 sm:$0xff]  }
 0x51f   : > { %v9882_v10 = vpop.eup %7697 }
 0x520   : > { %6950 = vmatmul.mubr.msk.f32.gmra.mxu1 %vm4130_vm13, %v9882_v10 }
 0x521   : > { %6952 = vmatprep.mubr.msk.f32.mxu1 %vm7955_vm1, %v10675_v47 }
 0x529   : > { %v9888_v50 = vpop.eup %7699 }
 0x52a   : > { %6953 = vmatmul.mubr.msk.f32.gmra.mxu1 %vm4130_vm13, %v9888_v50 }
 0x52b   : > { %6955 = vmatprep.mubr.msk.f32.mxu1 %vm7955_vm1, %v10675_v47 }
 0x52d   : > { %v4084_v29 = vpop.f32.mrf.mxu0 }
 0x52e   : > { %v4098_v9 = vsub.f32 %v9790_v32, %v4084_v29  ;;  %v7618_v29 = vld [vmem:[#allocation10 + $0xc] ss:$28 sps:$4 sm:$0xff]  }
 0x52f   : > { %v6932_v6 = vpop.f32.mrf.mxu0 }
 0x530   : > { %v4110_v51 = vmul.f32 1.442695, %v4098_v9  ;;  %v7621_v9 = vld [vmem:[#allocation10 + $0x14] ss:$28 sps:$4 sm:$0xff]  }
 0x531   : > { %v4089_v62 = vpop.f32.mrf.mxu0  ;;  %v7619_v6 = vld [vmem:[#allocation10 + $0x10] ss:$28 sps:$4 sm:$0xff]  }
 0x532   : > { %7701 = vpow2.f32 %v4110_v51  ;;  %v4099_v23 = vsub.f32 %v9729_v28, %v4089_v62 }
 0x533   : > { %v6935_v26 = vpop.f32.mrf.mxu0 }
 0x534   : > { %v4112_v11 = vmul.f32 1.442695, %v4099_v23 }
 0x536   : > { %7703 = vpow2.f32 %v4112_v11 }
 0x53f   : > { %v9896_v43 = vpop.eup %7701 }
 0x540   : > { %6956 = vmatmul.mubr.msk.f32.gmra.mxu1 %vm4130_vm13, %v9896_v43 }
 0x541   : > { %6958 = vmatprep.mubr.msk.f32.mxu1 %vm7955_vm1, %v10675_v47 }
 0x543   : > { %v9902_v36 = vpop.eup %7703 }
 0x544   : > { %6959 = vmatmul.mubr.msk.f32.gmra.mxu1 %vm4130_vm13, %v9902_v36 }
 0x545   : > { %6988 = vmatprep.mubr.msk.f32.mxu1 %vm7955_vm1, %v10675_v47 }
 0x5b4   : > { %v4186_v28 = vpop.f32.mrf.mxu1 }
 0x5b5   : > { %6964 = vmatmul.mubr.msk.f32.vlgmr.msra.gmra.mxu0 %vm3999_vm12, %v4186_v28 }
 0x5b6   : > { %v6942_v32 = vpop.f32.mrf.mxu1  ;;  %6966 = vmatprep.mubr.msk.f32.mxu0 %vm7955_vm1, %v10675_v47  ;;  %4529 = vmatpush1.bf16.msra.mxu0 %v7602_v61 }
 0x5b7   : > { %4530 = vmatprep.subr.bf16.mxu0 %v7608_v25  ;;  %v7628_v25 = vld [vmem:[%s10538_s11 + $0x68] sm:$0xff]  }
 0x5ba   : > { %4531 = vmatpush1.bf16.msra.mxu0 %v7606_v48  ;;  %v7629_v48 = vld [vmem:[%s10538_s11 + $0x28] sm:$0xff]  }
 0x5bb   : > { %4678 = vmatprep.subr.bf16.mxu0 %v7615_v5  ;;  %v7632_v5 = vld [vmem:[%s10538_s11 + $0x58] sm:$0xff]  }
 0x5c0   : > { %v4191_v40 = vpop.f32.mrf.mxu1 }
 0x5c1   : > { %6967 = vmatmul.mubr.msk.f32.gmra.mxu0 %vm3999_vm12, %v4191_v40 }
 0x5c2   : > { %v6945_v24 = vpop.f32.mrf.mxu1  ;;  %6969 = vmatprep.mubr.msk.f32.mxu0 %vm7955_vm1, %v10675_v47 }
 0x5d0   : > { %v4196_v14 = vpop.f32.mrf.mxu1 }
 0x5d1   : > { %6970 = vmatmul.mubr.msk.f32.gmra.mxu0 %vm3999_vm12, %v4196_v14 }
 0x5d2   : > { %v6948_v33 = vpop.f32.mrf.mxu1  ;;  %6972 = vmatprep.mubr.msk.f32.mxu0 %vm7955_vm1, %v10675_v47 }
 0x5e0   : > { %v4201_v44 = vpop.f32.mrf.mxu1 }
 0x5e1   : > { %6973 = vmatmul.mubr.msk.f32.gmra.mxu0 %vm3999_vm12, %v4201_v44 }
 0x5e2   : > { %v6951_v21 = vpop.f32.mrf.mxu1  ;;  %6975 = vmatprep.mubr.msk.f32.mxu0 %vm7955_vm1, %v10675_v47 }
 0x5ea   : > { %v4206_v46 = vpop.f32.mrf.mxu1 }
 0x5eb   : > { %6976 = vmatmul.mubr.msk.f32.gmra.mxu0 %vm3999_vm12, %v4206_v46 }
 0x5ec   : > { %v6954_v56 = vpop.f32.mrf.mxu1  ;;  %6978 = vmatprep.mubr.msk.f32.mxu0 %vm7955_vm1, %v10675_v47 }
 0x600   : > { %v4211_v2 = vpop.f32.mrf.mxu1 }
 0x601   : > { %6979 = vmatmul.mubr.msk.f32.gmra.mxu0 %vm3999_vm12, %v4211_v2 }
 0x602   : > { %v6957_v35 = vpop.f32.mrf.mxu1  ;;  %6981 = vmatprep.mubr.msk.f32.mxu0 %vm7955_vm1, %v10675_v47 }
 0x604   : > { %v4216_v13 = vpop.f32.mrf.mxu1 }
 0x605   : > { %6982 = vmatmul.mubr.msk.f32.gmra.mxu0 %vm3999_vm12, %v4216_v13 }
 0x606   : > { %v6960_v54 = vpop.f32.mrf.mxu1  ;;  %4548 = vmatprep.mubr.f32.mxu0 %v10675_v47 }
 0x607   : > { %v7627_v54 = vld [vmem:[%s10538_s11 + $0x30] sm:$0xff]  }
 0x675   : > { %v4275_v53 = vpop.f32.mrf.mxu0 }
 0x676   : > { %7705 = vrcp.f32 %v4275_v53  ;;  %v7633_v53 = vld [vmem:[%s10538_s11 + $0x18] sm:$0xff]  }
 0x677   : > { %v6965_v12 = vpop.f32.mrf.mxu0 }
 0x678   : > { %v7634_v12 = vld [vmem:[%s10538_s11 + $0x50] sm:$0xff]  }
 0x681   : > { %v4280_v7 = vpop.f32.mrf.mxu0 }
 0x682   : > { %7707 = vrcp.f32 %v4280_v7  ;;  %v7635_v7 = vld [vmem:[%s10538_s11 + $0x10] sm:$0xff]  }
 0x683   : > { %v7706_v60 = vpop.eup %7705  ;;  %v6968_v57 = vpop.f32.mrf.mxu0 }
 0x684   : > { %v9930_v58 = vmul.f32 %v7706_v60, %v9861_v41  ;;  %v7616_v41 = vld [vmem:[#allocation10 + $0x8] ss:$28 sps:$4 sm:$0xff]   ;;  %v7636_v60 = vld [vmem:[%s10538_s11 + $0x48] sm:$0xff]  }
 0x685   : > { %v7637_v57 = vld [vmem:[%s10538_s11 + $0x8] sm:$0xff]  }
 0x686   : > { %5738 = vrot.lane.b32.xlu0 %v9930_v58, %s7954_s30  ;;  %6989 = vmatmul.mubr.msk.f32.vlgmr.msra.gmra.mxu1 %vm4130_vm13, %v9930_v58 }
 0x687   : > { %6312 = vmatmul.mubr.msk.f32.vlgmr.msra.gmra.mxu0 %vm4130_vm13, %v9930_v58  ;;  %6991 = vmatprep.mubr.msk.f32.mxu1 %vm7955_vm1, %v10675_v47 }
 0x688   : > { %4554 = vmatprep.mubr.f32.mxu0 %v10675_v47  ;;  %4604 = vmatpush1.bf16.msra.mxu1 %v7610_v15  ;;  %v7638_v15 = vld [vmem:[%s10538_s11 + $0x40] sm:$0xff]  }
 0x689   : > { %4679 = vmatpush1.bf16.msra.mxu0 %v7613_v63  ;;  %4605 = vmatprep.subr.bf16.mxu1 %v7618_v29  ;;  %v7639_v63 = vld [vmem:[%s10538_s11] sm:$0xff]   ;;  %v7641_v29 = vld [vmem:[%s10538_s11 + $0x178] sm:$0xff]  }
 0x68a   : > { %4680 = vmatprep.subr.bf16.mxu0 %v7621_v9  ;;  %v7642_v9 = vld [vmem:[%s10538_s11 + $0xb8] sm:$0xff]  }
 0x68c   : > { %4606 = vmatpush1.bf16.msra.mxu1 %v7616_v41  ;;  %v7644_v41 = vld [vmem:[%s10538_s11 + $0xf0] sm:$0xff]  }
 0x68d   : > { %4681 = vmatpush1.bf16.msra.mxu0 %v7619_v6  ;;  %7009 = vmatprep.subr.bf16.mxu1 %v10675_v47  ;;  %v7646_v6 = vld [vmem:[%s10538_s11 + $0xb0] sm:$0xff]  }
 0x68f   : > { %v7708_v51 = vpop.eup %7707 }
 0x690   : > { %v9943_v62 = vmul.f32 %v7708_v51, %v9868_v16  ;;  %v7648_v51 = vld [vmem:[%s10538_s11 + $0xe8] sm:$0xff]  }
 0x691   : > { %v4285_v23 = vpop.f32.mrf.mxu0 }
 0x692   : > { %7709 = vrcp.f32 %v4285_v23  ;;  %5740 = vrot.lane.b32.xlu1 %v9943_v62, %s7954_s30  ;;  %6992 = vmatmul.mubr.msk.f32.gmra.mxu1 %vm4130_vm13, %v9943_v62  ;;  %v7652_v23 = vld [vmem:[%s10538_s11 + $0xe0] sm:$0xff]  }
 0x693   : > { %6313 = vmatmul.mubr.msk.f32.gmra.mxu0 %vm4130_vm13, %v9943_v62  ;;  %v6971_v26 = vpop.f32.mrf.mxu0  ;;  %6994 = vmatprep.mubr.msk.f32.mxu1 %vm7955_vm1, %v10675_v47 }
 0x694   : > { %4560 = vmatprep.mubr.f32.mxu0 %v10675_v47  ;;  %v7654_v26 = vld [vmem:[%s10538_s11 + $0xa0] sm:$0xff]  }
 0x69f   : > { %v7710_v11 = vpop.eup %7709 }
 0x6a0   : > { %v9955_v16 = vmul.f32 %v7710_v11, %v9875_v55  ;;  %v7624_v55 = vld [vmem:[%s10538_s11 + $0x78] sm:$0xff]  }
 0x6a1   : > { %v4290_v28 = vpop.f32.mrf.mxu0  ;;  %6656 = vmatprep.subr.bf16.mxu0 %v7624_v55  ;;  %v7656_v11 = vld [vmem:[%s10538_s11 + $0xd8] sm:$0xff]   ;;  %v7664_v55 = vld [vmem:[%s10538_s11 + $0xc8] sm:$0xff]  }
 0x6a2   : > { %7711 = vrcp.f32 %v4290_v28  ;;  %5742 = vrot.lane.b32.xlu0 %v9955_v16, %s7954_s30  ;;  %6995 = vmatmul.mubr.msk.f32.gmra.mxu1 %vm4130_vm13, %v9955_v16  ;;  %v7660_v28 = vld [vmem:[%s10538_s11 + $0xd0] sm:$0xff]  }
 0x6a3   : > { %6314 = vmatmul.mubr.msk.f32.gmra.mxu0 %vm4130_vm13, %v9955_v16  ;;  %v6974_v32 = vpop.f32.mrf.mxu0  ;;  %6997 = vmatprep.mubr.msk.f32.mxu1 %vm7955_vm1, %v10675_v47 }
 0x6a4   : > { %4566 = vmatprep.mubr.f32.mxu0 %v10675_v47  ;;  %v7662_v32 = vld [vmem:[%s10538_s11 + $0x90] sm:$0xff]  }
 0x6ab   : > { %v4295_v40 = vpop.f32.mrf.mxu0 }
 0x6ac   : > { %7713 = vrcp.f32 %v4295_v40  ;;  %v7666_v40 = vld [vmem:[%s10538_s11 + $0x88] sm:$0xff]  }
 0x6ad   : > { %v6977_v24 = vpop.f32.mrf.mxu0 }
 0x6ae   : > { %v7668_v24 = vld [vmem:[%s10538_s11 + $0xc0] sm:$0xff]  }
 0x6af   : > { %v7712_v14 = vpop.eup %7711 }
 0x6b0   : > { %v9970_v33 = vmul.f32 %v7712_v14, %v9882_v10  ;;  %v7670_v14 = vld [vmem:[%s10538_s11 + $0x80] sm:$0xff]  }
 0x6b2   : > { %5744 = vrot.lane.b32.xlu1 %v9970_v33, %s7954_s30  ;;  %6998 = vmatmul.mubr.msk.f32.gmra.mxu1 %vm4130_vm13, %v9970_v33 }
 0x6b3   : > { %6315 = vmatmul.mubr.msk.f32.gmra.mxu0 %vm4130_vm13, %v9970_v33  ;;  %7000 = vmatprep.mubr.msk.f32.mxu1 %vm7955_vm1, %v10675_v47 }
 0x6b4   : > { %4572 = vmatprep.mubr.f32.mxu0 %v10675_v47 }
 0x6b9   : > { %v7714_v44 = vpop.eup %7713 }
 0x6ba   : > { %v9982_v21 = vmul.f32 %v7714_v44, %v9888_v50 }
 0x6bc   : > { %5746 = vrot.lane.b32.xlu0 %v9982_v21, %s7954_s30  ;;  %7001 = vmatmul.mubr.msk.f32.gmra.mxu1 %vm4130_vm13, %v9982_v21 }
 0x6bd   : > { %6316 = vmatmul.mubr.msk.f32.gmra.mxu0 %vm4130_vm13, %v9982_v21  ;;  %7003 = vmatprep.mubr.msk.f32.mxu1 %vm7955_vm1, %v10675_v47 }
 0x6be   : > { %4578 = vmatprep.mubr.f32.mxu0 %v10675_v47 }
 0x6c1   : > { %v4300_v10 = vpop.f32.mrf.mxu0 }
 0x6c2   : > { %7715 = vrcp.f32 %v4300_v10 }
 0x6c3   : > { %v6980_v46 = vpop.f32.mrf.mxu0 }
 0x6c5   : > { %v4305_v56 = vpop.f32.mrf.mxu0 }
 0x6c6   : > { %7717 = vrcp.f32 %v4305_v56  ;;  %v7643_v56 = vld [vmem:[%s10538_s11 + $0x138] sm:$0xff]  }
 0x6c7   : > { %v6983_v50 = vpop.f32.mrf.mxu0 }
 0x6cf   : > { %v7716_v2 = vpop.eup %7715 }
 0x6d0   : > { %v9994_v35 = vmul.f32 %v7716_v2, %v9896_v43  ;;  %v7622_v43 = vld [vmem:[#allocation10 + $0x50] ss:$28 sps:$4 sm:$0xff]   ;;  %v7645_v2 = vld [vmem:[%s10538_s11 + $0x170] sm:$0xff]  }
 0x6d2   : > { %5748 = vrot.lane.b32.xlu1 %v9994_v35, %s7954_s30  ;;  %7004 = vmatmul.mubr.msk.f32.gmra.mxu1 %vm4130_vm13, %v9994_v35 }
 0x6d3   : > { %v7718_v13 = vpop.eup %7717  ;;  %6317 = vmatmul.mubr.msk.f32.gmra.mxu0 %vm4130_vm13, %v9994_v35  ;;  %7006 = vmatprep.mubr.msk.f32.mxu1 %vm7955_vm1, %v10675_v47 }
 0x6d4   : > { %v10005_v61 = vmul.f32 %v7718_v13, %v9902_v36  ;;  %4584 = vmatprep.mubr.f32.mxu0 %v10675_v47  ;;  %v7625_v36 = vld [vmem:[%s10538_s11 + $0x38] sm:$0xff]  }
 0x6d6   : > { %5750 = vrot.lane.b32.xlu0 %v10005_v61, %s7954_s30  ;;  %7007 = vmatmul.mubr.msk.f32.gmra.mxu1 %vm4130_vm13, %v10005_v61 }
 0x6d7   : > { %6318 = vmatmul.mubr.msk.f32.gmra.mxu0 %vm4130_vm13, %v10005_v61  ;;  %4623 = vmatprep.mubr.f32.mxu1 %v10675_v47 }
 0x6d8   : > { %4698 = vmatprep.mubr.f32.mxu0 %v10675_v47 }
 0x6da   : > { %6319 = vmatmul.mubr.msk.f32.vlgmr.msra.gmra.mxu1 %vm4130_vm13, %v9930_v58 }
 0x6db   : > { %6326 = vmatmul.mubr.msk.f32.vlgmr.msra.gmra.mxu0 %vm4130_vm13, %v9930_v58  ;;  %4629 = vmatprep.mubr.f32.mxu1 %v10675_v47 }
 0x6dc   : > { %4704 = vmatprep.mubr.f32.mxu0 %v10675_v47  ;;  %7010 = vmatpush3.bf16.msra.mxu1 %v7622_v43  ;;  %v7653_v43 = vld [vmem:[%s10538_s11 + $0x160] sm:$0xff]  }
 0x6dd   : > { %7011 = vmatprep.subr.bf16.mxu1 %v10675_v47  ;;  %6657 = vmatpush3.bf16.msra.mxu0 %v7625_v36 }
 0x6de   : > { %6320 = vmatmul.mubr.msk.f32.gmra.mxu1 %vm4130_vm13, %v9943_v62  ;;  %6658 = vmatprep.subr.bf16.mxu0 %v7626_v8 }
 0x6df   : > { %6327 = vmatmul.mubr.msk.f32.gmra.mxu0 %vm4130_vm13, %v9943_v62  ;;  %4635 = vmatprep.mubr.f32.mxu1 %v10675_v47 }
 0x6e0   : > { %4710 = vmatprep.mubr.f32.mxu0 %v10675_v47  ;;  %7012 = vmatpush3.bf16.msra.mxu1 %v7623_v19 }
 0x6e1   : > { %6659 = vmatpush3.bf16.msra.mxu0 %v7627_v54  ;;  %v7655_v54 = vld [vmem:[%s10538_s11 + $0x120] sm:$0xff]  }
 0x6e2   : > { %6321 = vmatmul.mubr.msk.f32.gmra.mxu1 %vm4130_vm13, %v9955_v16  ;;  %6660 = vmatprep.subr.bf16.mxu0 %v7628_v25 }
 0x6e3   : > { %6328 = vmatmul.mubr.msk.f32.gmra.mxu0 %vm4130_vm13, %v9955_v16  ;;  %4641 = vmatprep.mubr.f32.mxu1 %v10675_v47 }
 0x6e4   : > { %4716 = vmatprep.mubr.f32.mxu0 %v10675_v47 }
 0x6e5   : > { %6661 = vmatpush3.bf16.msra.mxu0 %v7629_v48  ;;  %v7657_v48 = vld [vmem:[%s10538_s11 + $0x158] sm:$0xff]  }
 0x6e6   : > { %6322 = vmatmul.mubr.msk.f32.gmra.mxu1 %vm4130_vm13, %v9970_v33  ;;  %6662 = vmatprep.subr.bf16.mxu0 %v7630_v20  ;;  %v7659_v20 = vld [vmem:[%s10538_s11 + $0x118] sm:$0xff]  }
 0x6e7   : > { %6329 = vmatmul.mubr.msk.f32.gmra.mxu0 %vm4130_vm13, %v9970_v33  ;;  %4647 = vmatprep.mubr.f32.mxu1 %v10675_v47 }
 0x6e8   : > { %4722 = vmatprep.mubr.f32.mxu0 %v10675_v47 }
 0x6e9   : > { %6663 = vmatpush3.bf16.msra.mxu0 %v7631_v59  ;;  %v7665_v59 = vld [vmem:[%s10538_s11 + $0x148] sm:$0xff]  }
 0x6ea   : > { %6323 = vmatmul.mubr.msk.f32.gmra.mxu1 %vm4130_vm13, %v9982_v21  ;;  %6664 = vmatprep.subr.bf16.mxu0 %v7632_v5 }
 0x6eb   : > { %6330 = vmatmul.mubr.msk.f32.gmra.mxu0 %vm4130_vm13, %v9982_v21  ;;  %4653 = vmatprep.mubr.f32.mxu1 %v10675_v47 }
 0x6ec   : > { %4728 = vmatprep.mubr.f32.mxu0 %v10675_v47 }
 0x6ed   : > { %6665 = vmatpush3.bf16.msra.mxu0 %v7633_v53  ;;  %v7667_v53 = vld [vmem:[%s10538_s11 + $0x108] sm:$0xff]  }
 0x6ee   : > { %6324 = vmatmul.mubr.msk.f32.gmra.mxu1 %vm4130_vm13, %v9994_v35  ;;  %6666 = vmatprep.subr.bf16.mxu0 %v7634_v12 }
 0x6ef   : > { %6331 = vmatmul.mubr.msk.f32.gmra.mxu0 %vm4130_vm13, %v9994_v35  ;;  %4659 = vmatprep.mubr.f32.mxu1 %v10675_v47 }
 0x6f0   : > { %4734 = vmatprep.mubr.f32.mxu0 %v10675_v47 }
 0x6f1   : > { %6667 = vmatpush3.bf16.msra.mxu0 %v7635_v7  ;;  %v7669_v7 = vld [vmem:[%s10538_s11 + $0x140] sm:$0xff]  }
 0x6f2   : > { %6325 = vmatmul.mubr.msk.f32.gmra.mxu1 %vm4130_vm13, %v10005_v61  ;;  %6668 = vmatprep.subr.bf16.mxu0 %v7636_v60 }
 0x6f3   : > { %6332 = vmatmul.mubr.msk.f32.gmra.mxu0 %vm4130_vm13, %v10005_v61  ;;  %7013 = vmatprep.mubr.msk.f32.mxu1 %vm7955_vm1, %v10675_v47 }
 0x6f5   : > { %6669 = vmatpush3.bf16.msra.mxu0 %v7637_v57 }
 0x6f6   : > { %7014 = vmatmul.mubr.msk.f32.vlgmr.msra.gmra.mxu1 %vm4130_vm13, %v9930_v58  ;;  %6670 = vmatprep.subr.bf16.mxu0 %v7638_v15  ;;  %v7640_v58 = vld [vmem:[%s10538_s11 + $0xf8] sm:$0xff]  }
 0x6f7   : > { %7016 = vmatprep.mubr.msk.f32.mxu1 %vm7955_vm1, %v10675_v47  ;;  %6693 = vmatprep.subr.bf16.mxu1 %v7640_v58 }
 0x6f8   : > { %6694 = vmatpush3.bf16.msra.mxu1 %v7642_v9 }
 0x6f9   : > { %6671 = vmatpush3.bf16.msra.mxu0 %v7639_v63  ;;  %6695 = vmatprep.subr.bf16.mxu1 %v7644_v41  ;;  %v7671_v63 = vld [vmem:[%s10538_s11 + $0x100] sm:$0xff]  }
 0x6fa   : > { %7017 = vmatmul.mubr.msk.f32.gmra.mxu1 %vm4130_vm13, %v9943_v62  ;;  %6730 = vmatprep.subr.bf16.mxu0 %v7641_v29  ;;  %v7650_v62 = vld [vmem:[%s10538_s11 + $0xa8] sm:$0xff]  }
 0x6fb   : > { %7019 = vmatprep.mubr.msk.f32.mxu1 %vm7955_vm1, %v10675_v47 }
 0x6fc   : > { %6696 = vmatpush3.bf16.msra.mxu1 %v7646_v6 }
 0x6fd   : > { %6697 = vmatprep.subr.bf16.mxu1 %v7648_v51 }
 0x6fe   : > { %7020 = vmatmul.mubr.msk.f32.gmra.mxu1 %vm4130_vm13, %v9955_v16  ;;  %v7658_v16 = vld [vmem:[%s10538_s11 + $0x98] sm:$0xff]  }
 0x6ff   : > { %7022 = vmatprep.mubr.msk.f32.mxu1 %vm7955_vm1, %v10675_v47 }
 0x700   : > { %6698 = vmatpush3.bf16.msra.mxu1 %v7650_v62 }
 0x701   : > { %6699 = vmatprep.subr.bf16.mxu1 %v7652_v23 }
 0x702   : > { %7023 = vmatmul.mubr.msk.f32.gmra.mxu1 %vm4130_vm13, %v9970_v33 }
 0x703   : > { %7025 = vmatprep.mubr.msk.f32.mxu1 %vm7955_vm1, %v10675_v47 }
 0x704   : > { %6700 = vmatpush3.bf16.msra.mxu1 %v7654_v26 }
 0x705   : > { %6701 = vmatprep.subr.bf16.mxu1 %v7656_v11 }
 0x706   : > { %7026 = vmatmul.mubr.msk.f32.gmra.mxu1 %vm4130_vm13, %v9982_v21 }
 0x707   : > { %7028 = vmatprep.mubr.msk.f32.mxu1 %vm7955_vm1, %v10675_v47 }
 0x708   : > { %6702 = vmatpush3.bf16.msra.mxu1 %v7658_v16 }
 0x709   : > { %6703 = vmatprep.subr.bf16.mxu1 %v7660_v28 }
 0x70a   : > { %7029 = vmatmul.mubr.msk.f32.gmra.mxu1 %vm4130_vm13, %v9994_v35  ;;  %v7647_v35 = vld [vmem:[%s10538_s11 + $0x130] sm:$0xff]  }
 0x70b   : > { %7031 = vmatprep.mubr.msk.f32.mxu1 %vm7955_vm1, %v10675_v47 }
 0x70c   : > { %6704 = vmatpush3.bf16.msra.mxu1 %v7662_v32 }
 0x70d   : > { %6705 = vmatprep.subr.bf16.mxu1 %v7664_v55 }
 0x70e   : > { %7032 = vmatmul.mubr.msk.f32.gmra.mxu1 %vm4130_vm13, %v10005_v61 }
 0x710   : > { %6706 = vmatpush3.bf16.msra.mxu1 %v7666_v40 }
 0x711   : > { %6707 = vmatprep.subr.bf16.mxu1 %v7668_v24 }
 0x714   : > { %6708 = vmatpush3.bf16.msra.mxu1 %v7670_v14 }
 0x715   : > { %7034 = vmatprep.subr.bf16.mxu1 %v10675_v47 }
 0x746   : > { %v10182_v33 = vpop.f32.mrf.mxu1 }
 0x747   : > { %v4550_v44 = vpop.f32.mrf.mxu0 }
 0x748   : > { %v6990_v21 = vpop.f32.mrf.mxu1  ;;  %v4832_v50 = vmul.f32 %v4550_v44, %v9002_v34  ;;  %v7651_v34 = vld [vmem:[%s10538_s11 + $0x128] sm:$0xff]  }
 0x749   : > { %v4552_v10 = vpop.f32.mrf.mxu0 }
 0x74a   : > { %v4833_v46 = vmul.f32 %v4552_v10, %v9258_v45  ;;  %v7649_v45 = vld [vmem:[%s10538_s11 + $0x168] sm:$0xff]  }
 0x74c   : > { %5361 = vmatprep.mubr.f32.mxu0 %v4833_v46 }
 0x74d   : > { %5362 = vmatmul.mubr.f32.vlgmr.msra.gmra.mxu0 %v4832_v50 }
 0x74e   : > { %6731 = vmatpush3.bf16.msra.mxu0 %v7643_v56 }
 0x74f   : > { %6732 = vmatprep.subr.bf16.mxu0 %v7645_v2 }
 0x752   : > { %v10198_v13 = vpop.f32.mrf.mxu1  ;;  %6733 = vmatpush3.bf16.msra.mxu0 %v7647_v35 }
 0x753   : > { %v4556_v61 = vpop.f32.mrf.mxu0  ;;  %6734 = vmatprep.subr.bf16.mxu0 %v7649_v45 }
 0x754   : > { %v6993_v36 = vpop.f32.mrf.mxu1  ;;  %v4839_v25 = vmul.f32 %v4556_v61, %v9006_v38  ;;  %v7663_v38 = vld [vmem:[%s10538_s11 + $0x110] sm:$0xff]   ;;  %v10728_v61 = vld [vmem:[#allocation70_spill] sm:$0xff] }
 0x755   : > { %v4558_v8 = vpop.f32.mrf.mxu0 }
 0x756   : > { %v4840_v19 = vmul.f32 %v4558_v8, %v9286_v52  ;;  %6735 = vmatpush3.bf16.msra.mxu0 %v7651_v34  ;;  %v7661_v52 = vld [vmem:[%s10538_s11 + $0x150] sm:$0xff]  }
 0x757   : > { %6736 = vmatprep.subr.bf16.mxu0 %v7653_v43 }
 0x758   : > { %5366 = vmatprep.mubr.f32.mxu0 %v4840_v19  ;;  %v10730_v19 = vld [vmem:[#allocation27_spill] sm:$0xff] }
 0x759   : > { %5367 = vmatmul.mubr.f32.gmra.mxu0 %v4839_v25  ;;  %v7675_v25 = vld [vmem:[%s10727_s27 + $0x30] sm:$0xff]  }
 0x75a   : > { %6737 = vmatpush3.bf16.msra.mxu0 %v7655_v54 }
 0x75b   : > { %6738 = vmatprep.subr.bf16.mxu0 %v7657_v48  ;;  %v10731_v48 = vld [vmem:[#allocation50_spill] sm:$0xff] }
 0x75e   : > { %6739 = vmatpush3.bf16.msra.mxu0 %v7659_v20 }
 0x75f   : > { %6740 = vmatprep.subr.bf16.mxu0 %v7661_v52 }
 0x762   : > { %v10226_v5 = vpop.f32.mrf.mxu1  ;;  %6741 = vmatpush3.bf16.msra.mxu0 %v7663_v38 }
 0x763   : > { %v4562_v12 = vpop.f32.mrf.mxu0  ;;  %6742 = vmatprep.subr.bf16.mxu0 %v7665_v59  ;;  %v10732_v59 = vld [vmem:[#allocation71_spill] sm:$0xff] }
 0x764   : > { %v6996_v60 = vpop.f32.mrf.mxu1  ;;  %v4846_v58 = vmul.f32 %v4562_v12, %v9010_v39 }
 0x765   : > { %v4564_v57 = vpop.f32.mrf.mxu0  ;;  %v10733_v60 = vld [vmem:[#allocation32_spill] sm:$0xff] }
 0x766   : > { %v4847_v15 = vmul.f32 %v4564_v57, %v9313_v4  ;;  %6743 = vmatpush3.bf16.msra.mxu0 %v7667_v53 }
 0x767   : > { %6744 = vmatprep.subr.bf16.mxu0 %v7669_v7  ;;  %v7676_v7 = vld [vmem:[%s10538_s11 + $0x1a8] sm:$0xff]  }
 0x768   : > { %5371 = vmatprep.mubr.f32.mxu0 %v4847_v15  ;;  %v10734_v15 = vld [vmem:[#allocation30_spill] sm:$0xff] }
 0x769   : > { %5372 = vmatmul.mubr.f32.gmra.mxu0 %v4846_v58 }
 0x76a   : > { %6745 = vmatpush3.bf16.msra.mxu0 %v7671_v63 }
 0x76b   : > { %7071 = vmatprep.subr.bf16.mxu0 %v10675_v47 }
 0x772   : > { %v10240_v29 = vpop.f32.mrf.mxu1 }
 0x773   : > { %v4568_v9 = vpop.f32.mrf.mxu0 }
 0x774   : > { %v6999_v41 = vpop.f32.mrf.mxu1  ;;  %v4853_v51 = vmul.f32 %v4568_v9, %v9014_v42  ;;  %v7677_v9 = vld [vmem:[%s10727_s27 + $0x28] sm:$0xff]  }
 0x775   : > { %v4570_v6 = vpop.f32.mrf.mxu0  ;;  %v10735_v41 = vld [vmem:[#allocation52_spill] sm:$0xff] }
 0x776   : > { %v4854_v4 = vmul.f32 %v4570_v6, %v9331_v0 }
 0x778   : > { %5376 = vmatprep.mubr.f32.mxu0 %v4854_v4 }
 0x779   : > { %5377 = vmatmul.mubr.f32.gmra.mxu0 %v4853_v51 }
 0x77c   : > { %v10244_v62 = vpop.f32.mrf.mxu1 }
 0x77d   : > { %v4574_v39 = vpop.f32.mrf.mxu0 }
 0x77e   : > { %v7002_v23 = vpop.f32.mrf.mxu1  ;;  %v4860_v16 = vmul.f32 %v4574_v39, %v10681_v49  ;;  %v10736_v39 = vld [vmem:[#allocation72_spill] sm:$0xff] }
 0x77f   : > { %v4576_v26 = vpop.f32.mrf.mxu0 }
 0x780   : > { %v4861_v11 = vmul.f32 %v4576_v26, %v9361_v37 }
 0x782   : > { %5381 = vmatprep.mubr.f32.mxu0 %v4861_v11  ;;  %v7678_v11 = vld [vmem:[%s10538_s11 + $0x1a0] sm:$0xff]  }
 0x783   : > { %5382 = vmatmul.mubr.f32.gmra.mxu0 %v4860_v16  ;;  %v10737_v16 = vld [vmem:[#allocation34_spill] sm:$0xff] }
 0x792   : > { %v10248_v28 = vpop.f32.mrf.mxu1 }
 0x793   : > { %v4580_v32 = vpop.f32.mrf.mxu0 }
 0x794   : > { %v7005_v55 = vpop.f32.mrf.mxu1  ;;  %v4867_v24 = vmul.f32 %v4580_v32, %v10689_v1  ;;  %v7672_v1 = vld [vmem:[%s10538_s11 + $0x1b8] sm:$0xff]  }
 0x795   : > { %v4582_v0 = vpop.f32.mrf.mxu0  ;;  %v10738_v55 = vld [vmem:[#allocation26_spill] sm:$0xff] }
 0x796   : > { %v4868_v42 = vmul.f32 %v4582_v0, %v9391_v27  ;;  %v10251_v40 = vpop.f32.mrf.mxu1 }
 0x797   : > { %v4586_v14 = vpop.f32.mrf.mxu0 }
 0x798   : > { %5386 = vmatprep.mubr.f32.mxu0 %v4868_v42  ;;  %v7008_v44 = vpop.f32.mrf.mxu1  ;;  %v4874_v10 = vmul.f32 %v4586_v14, %v10693_v30  ;;  %v10739_v14 = vld [vmem:[#allocation54_spill] sm:$0xff] }
 0x799   : > { %v4588_v21 = vpop.f32.mrf.mxu0  ;;  %5387 = vmatmul.mubr.f32.gmra.mxu0 %v4867_v24  ;;  %v7679_v24 = vld [vmem:[%s10727_s27 + $0x20] sm:$0xff]  }
 0x79a   : > { %v4875_v37 = vmul.f32 %v4588_v21, %v9421_v31  ;;  %v4625_v49 = vpop.f32.mrf.mxu1  ;;  %v7673_v31 = vld [vmem:[%s10727_s27 + $0x38] sm:$0xff]  }
 0x79b   : > { %v4700_v46 = vpop.f32.mrf.mxu0  ;;  %v4834_v2 = vmul.f32 %v4625_v49, %v9038_v3  ;;  %v7674_v3 = vld [vmem:[%s10538_s11 + $0x1b0] sm:$0xff]   ;;  %v10740_v49 = vld [vmem:[#allocation73_spill] sm:$0xff] }
 0x79c   : > { %5391 = vmatprep.mubr.f32.mxu0 %v4875_v37  ;;  %v4627_v56 = vpop.f32.mrf.mxu1  ;;  %v4836_v30 = vmul.f32 %v4700_v46, %v10698_v18 }
 0x79d   : > { %v4835_v50 = vmul.f32 %v4627_v56, %v9262_v22  ;;  %v4702_v27 = vpop.f32.mrf.mxu0  ;;  %5392 = vmatmul.mubr.f32.gmra.mxu0 %v4874_v10  ;;  %v7680_v56 = vld [vmem:[%s10538_s11 + $0x198] sm:$0xff]  }
 0x79e   : > { %v4837_v35 = vmul.f32 %v4702_v27, %v9457_v17  ;;  %v4631_v45 = vpop.f32.mrf.mxu1  ;;  %v10729_v17 = vld [vmem:[#allocation31_spill] sm:$0xff] }
 0x79f   : > { %v4706_v34 = vpop.f32.mrf.mxu0  ;;  %5429 = vmatprep.mubr.f32.mxu1 %v4835_v50  ;;  %v4841_v8 = vmul.f32 %v4631_v45, %v10729_v17  ;;  %v10741_v50 = vld [vmem:[#allocation36_spill] sm:$0xff]  ;;  %v10745_v17 = vld [vmem:[#allocation37_spill] sm:$0xff] }
 0x7a0   : > { %5497 = vmatprep.mubr.f32.mxu0 %v4837_v35  ;;  %v4633_v22 = vpop.f32.mrf.mxu1  ;;  %5430 = vmatmul.mubr.f32.vlgmr.msra.gmra.mxu1 %v4834_v2  ;;  %v4843_v20 = vmul.f32 %v4706_v34, %v10731_v48  ;;  %v7681_v45 = vld [vmem:[%s10727_s27 + $0x18] sm:$0xff]   ;;  %v10747_v48 = vld [vmem:[#allocation58_spill] sm:$0xff] }
 0x7a1   : > { %v4842_v43 = vmul.f32 %v4633_v22, %v10728_v61  ;;  %v4708_v36 = vpop.f32.mrf.mxu0  ;;  %5498 = vmatmul.mubr.f32.vlgmr.msra.gmra.mxu0 %v4836_v30  ;;  %7035 = vmatpush3.bf16.msra.mxu1 %v7672_v1  ;;  %v10742_v1 = vld [vmem:[#allocation62_spill] sm:$0xff]  ;;  %v10744_v61 = vld [vmem:[#allocation33_spill] sm:$0xff] }
 0x7a2   : > { %v4844_v54 = vmul.f32 %v4708_v36, %v10730_v19  ;;  %7072 = vmatpush3.bf16.msra.mxu0 %v7673_v31  ;;  %v4637_v18 = vpop.f32.mrf.mxu1  ;;  %7036 = vmatprep.subr.bf16.mxu1 %v10675_v47  ;;  %v10743_v31 = vld [vmem:[#allocation56_spill] sm:$0xff]  ;;  %v10746_v19 = vld [vmem:[#allocation35_spill] sm:$0xff] }
 0x7a3   : > { %v4712_v52 = vpop.f32.mrf.mxu0  ;;  %5434 = vmatprep.mubr.f32.mxu1 %v4842_v43  ;;  %7073 = vmatprep.subr.bf16.mxu0 %v10675_v47  ;;  %v4848_v57 = vmul.f32 %v4637_v18, %v10733_v60  ;;  %v10749_v60 = vld [vmem:[#allocation39_spill] sm:$0xff] }
 0x7a4   : > { %5502 = vmatprep.mubr.f32.mxu0 %v4844_v54  ;;  %v4639_v38 = vpop.f32.mrf.mxu1  ;;  %5435 = vmatmul.mubr.f32.gmra.mxu1 %v4841_v8  ;;  %v4850_v6 = vmul.f32 %v4712_v52, %v10735_v41  ;;  %v10751_v41 = vld [vmem:[#allocation60_spill] sm:$0xff] }
 0x7a5   : > { %v4849_v53 = vmul.f32 %v4639_v38, %v10732_v59  ;;  %v4714_v12 = vpop.f32.mrf.mxu0  ;;  %5503 = vmatmul.mubr.f32.gmra.mxu0 %v4843_v20  ;;  %7037 = vmatpush3.bf16.msra.mxu1 %v7674_v3  ;;  %v7682_v3 = vld [vmem:[%s10538_s11 + $0x190] sm:$0xff]   ;;  %v10748_v59 = vld [vmem:[#allocation38_spill] sm:$0xff] }
 0x7a6   : > { %v4851_v63 = vmul.f32 %v4714_v12, %v10734_v15  ;;  %7074 = vmatpush3.bf16.msra.mxu0 %v7675_v25  ;;  %v4643_v58 = vpop.f32.mrf.mxu1  ;;  %7038 = vmatprep.subr.bf16.mxu1 %v10675_v47  ;;  %v7683_v25 = vld [vmem:[%s10727_s27 + $0x10] sm:$0xff]   ;;  %v10750_v15 = vld [vmem:[#allocation40_spill] sm:$0xff] }
 0x7a7   : > { %v4718_v4 = vpop.f32.mrf.mxu0  ;;  %5439 = vmatprep.mubr.f32.mxu1 %v4849_v53  ;;  %7075 = vmatprep.subr.bf16.mxu0 %v10675_v47  ;;  %v4855_v32 = vmul.f32 %v4643_v58, %v10737_v16 }
 0x7a8   : > { %5507 = vmatprep.mubr.f32.mxu0 %v4851_v63  ;;  %v4645_v51 = vpop.f32.mrf.mxu1  ;;  %5440 = vmatmul.mubr.f32.gmra.mxu1 %v4848_v57  ;;  %v4857_v44 = vmul.f32 %v4718_v4, %v10739_v14 }
 0x7a9   : > { %v4856_v23 = vmul.f32 %v4645_v51, %v10736_v39  ;;  %v4720_v26 = vpop.f32.mrf.mxu0  ;;  %5508 = vmatmul.mubr.f32.gmra.mxu0 %v4850_v6  ;;  %7039 = vmatpush3.bf16.msra.mxu1 %v7676_v7  ;;  %v7684_v7 = vld [vmem:[%s10538_s11 + $0x188] sm:$0xff]   ;;  %v7686_v51 = vld [vmem:[%s10538_s11 + $0x180] sm:$0xff]  }
 0x7aa   : > { %v4858_v0 = vmul.f32 %v4720_v26, %v10738_v55  ;;  %7076 = vmatpush3.bf16.msra.mxu0 %v7677_v9  ;;  %v4649_v42 = vpop.f32.mrf.mxu1  ;;  %7040 = vmatprep.subr.bf16.mxu1 %v10675_v47  ;;  %v7685_v9 = vld [vmem:[%s10727_s27 + $0x8] sm:$0xff]   ;;  %v10753_v55 = vld [vmem:[#allocation20_spill] sm:$0xff] }
 0x7ab   : > { %v4724_v21 = vpop.f32.mrf.mxu0  ;;  %5444 = vmatprep.mubr.f32.mxu1 %v4856_v23  ;;  %7077 = vmatprep.subr.bf16.mxu0 %v10675_v47  ;;  %v4862_v27 = vmul.f32 %v4649_v42, %v10741_v50  ;;  %v7687_v23 = vld [vmem:[%s10727_s27] sm:$0xff]  }
 0x7ac   : > { %5512 = vmatprep.mubr.f32.mxu0 %v4858_v0  ;;  %v4651_v37 = vpop.f32.mrf.mxu1  ;;  %5445 = vmatmul.mubr.f32.gmra.mxu1 %v4855_v32  ;;  %v4864_v30 = vmul.f32 %v4724_v21, %v10743_v31  ;;  %v4809_v0 = vmul.f32 %v10182_v33, %v10753_v55  ;;  %v10755_v21 = vld [vmem:[#allocation22_spill] sm:$0xff]  ;;  %v10756_v33 = vld [vmem:[#allocation65_spill] sm:$0xff] }
 0x7ad   : > { %v4863_v10 = vmul.f32 %v4651_v37, %v10740_v49  ;;  %v4726_v46 = vpop.f32.mrf.mxu0  ;;  %5513 = vmatmul.mubr.f32.gmra.mxu0 %v4857_v44  ;;  %7041 = vmatpush3.bf16.msra.mxu1 %v7678_v11  ;;  %v10752_v11 = vld [vmem:[#allocation63_spill] sm:$0xff]  ;;  %v4810_v37 = vmul.f32 %v10198_v13, %v10755_v21  ;;  %v10758_v13 = vld [vmem:[#allocation66_spill] sm:$0xff] }
 0x7ae   : > { %v4865_v2 = vmul.f32 %v4726_v46, %v10742_v1  ;;  %7078 = vmatpush3.bf16.msra.mxu0 %v7679_v24  ;;  %v4655_v35 = vpop.f32.mrf.mxu1  ;;  %7042 = vmatprep.subr.bf16.mxu1 %v10675_v47  ;;  %v10754_v24 = vld [vmem:[#allocation64_spill] sm:$0xff] }
 0x7af   : > { %v4730_v34 = vpop.f32.mrf.mxu0  ;;  %5449 = vmatprep.mubr.f32.mxu1 %v4863_v10  ;;  %7079 = vmatprep.subr.bf16.mxu0 %v10675_v47  ;;  %v4869_v8 = vmul.f32 %v4655_v35, %v10745_v17  ;;  %v10759_v35 = vld [vmem:[#allocation21_spill] sm:$0xff] }
 0x7b0   : > { %5517 = vmatprep.mubr.f32.mxu0 %v4865_v2  ;;  %v4657_v22 = vpop.f32.mrf.mxu1  ;;  %5450 = vmatmul.mubr.f32.gmra.mxu1 %v4862_v27  ;;  %v4871_v20 = vmul.f32 %v4730_v34, %v10747_v48 }
 0x7b1   : > { %v4870_v43 = vmul.f32 %v4657_v22, %v10744_v61  ;;  %v4732_v36 = vpop.f32.mrf.mxu0  ;;  %5518 = vmatmul.mubr.f32.gmra.mxu0 %v4864_v30  ;;  %7043 = vmatpush3.bf16.msra.mxu1 %v7680_v56  ;;  %v10757_v56 = vld [vmem:[#allocation19_spill] sm:$0xff]  ;;  %v10761_v22 = vld [vmem:[#allocation24_spill] sm:$0xff] }
 0x7b2   : > { %v4872_v54 = vmul.f32 %v4732_v36, %v10746_v19  ;;  %7080 = vmatpush3.bf16.msra.mxu0 %v7681_v45  ;;  %v4661_v18 = vpop.f32.mrf.mxu1  ;;  %7044 = vmatprep.subr.bf16.mxu1 %v10675_v47  ;;  %v4811_v50 = vmul.f32 %v10757_v56, %v10226_v5  ;;  %v4812_v45 = vmul.f32 %v10759_v35, %v10240_v29  ;;  %v10760_v5 = vld [vmem:[#allocation67_spill] sm:$0xff]  ;;  %v10762_v29 = vld [vmem:[#allocation68_spill] sm:$0xff] }
 0x7b3   : > { %v4736_v52 = vpop.f32.mrf.mxu0  ;;  %5454 = vmatprep.mubr.f32.mxu1 %v4870_v43  ;;  %7081 = vmatprep.subr.bf16.mxu0 %v10675_v47  ;;  %v4876_v57 = vmul.f32 %v4661_v18, %v10749_v60  ;;  %v4813_v61 = vmul.f32 %v10244_v62, %v10761_v22  ;;  %v10764_v62 = vld [vmem:[#allocation69_spill] sm:$0xff]  ;;  %v10765_v19 = vld [vmem:[#allocation23_spill] sm:$0xff] }
 0x7b4   : > { %5522 = vmatprep.mubr.f32.mxu0 %v4872_v54  ;;  %v4663_v38 = vpop.f32.mrf.mxu1  ;;  %5455 = vmatmul.mubr.f32.gmra.mxu1 %v4869_v8  ;;  %v4878_v6 = vmul.f32 %v4736_v52, %v10751_v41  ;;  %v4815_v54 = vmul.f32 %v10765_v19, %v10251_v40 }
 0x7b5   : > { %v4877_v53 = vmul.f32 %v4663_v38, %v10748_v59  ;;  %v4738_v12 = vpop.f32.mrf.mxu0  ;;  %5523 = vmatmul.mubr.f32.gmra.mxu0 %v4871_v20  ;;  %7045 = vmatpush3.bf16.msra.mxu1 %v7682_v3  ;;  %v10763_v3 = vld [vmem:[#allocation25_spill] sm:$0xff] }
 0x7b6   : > { %v4879_v63 = vmul.f32 %v4738_v12, %v10750_v15  ;;  %7082 = vmatpush3.bf16.msra.mxu0 %v7683_v25  ;;  %v4775_v58 = vpop.f32.mrf.mxu1  ;;  %7046 = vmatprep.subr.bf16.mxu1 %v10675_v47  ;;  %v4814_v17 = vmul.f32 %v10248_v28, %v10763_v3 }
 0x7b7   : > { %5459 = vmatprep.mubr.f32.mxu1 %v4877_v53  ;;  %7083 = vmatprep.subr.bf16.mxu0 %v10675_v47  ;;  %v4838_v16 = vmul.f32 %v4775_v58, %v10752_v11 }
 0x7b8   : > { %5527 = vmatprep.mubr.f32.mxu0 %v4879_v63  ;;  %v7015_v4 = vpop.f32.mrf.mxu1  ;;  %5460 = vmatmul.mubr.f32.gmra.mxu1 %v4876_v57 }
 0x7b9   : > { %5528 = vmatmul.mubr.f32.gmra.mxu0 %v4878_v6  ;;  %7047 = vmatpush3.bf16.msra.mxu1 %v7684_v7 }
 0x7ba   : > { %7084 = vmatpush3.bf16.msra.mxu0 %v7685_v9  ;;  %v4780_v39 = vpop.f32.mrf.mxu1  ;;  %7048 = vmatprep.subr.bf16.mxu1 %v10675_v47 }
 0x7bb   : > { %7085 = vmatprep.subr.bf16.mxu0 %v10675_v47  ;;  %7050 = vmatprep.mubr.msk.f32.mxu1 %vm7955_vm1, %v10675_v47  ;;  %v4845_v14 = vmul.f32 %v4780_v39, %v10754_v24 }
 0x7bc   : > { %v7018_v26 = vpop.f32.mrf.mxu1  ;;  %7087 = vmatprep.mubr.msk.f32.mxu0 %vm7955_vm1, %v10675_v47 }
 0x7bd   : > { %7049 = vmatpush3.bf16.msra.mxu1 %v7686_v51 }
 0x7be   : > { %7086 = vmatpush3.bf16.msra.mxu0 %v7687_v23  ;;  %v4785_v32 = vpop.f32.mrf.mxu1 }
 0x7bf   : > { %v4852_v10 = vmul.f32 %v4785_v32, %v10756_v33 }
 0x7c0   : > { %7051 = vmatmul.mubr.f32.vlgmr.msra.gmra.mxu1 %v4838_v16  ;;  %v7021_v42 = vpop.f32.mrf.mxu1 }
 0x7c1   : > { %7088 = vmatmul.mubr.f32.vlgmr.msra.gmra.mxu0 %v4809_v0  ;;  %7053 = vmatprep.mubr.msk.f32.mxu1 %vm7955_vm1, %v10675_v47 }
 0x7c2   : > { %v4790_v44 = vpop.f32.mrf.mxu1  ;;  %7090 = vmatprep.mubr.msk.f32.mxu0 %vm7955_vm1, %v10675_v47 }
 0x7c3   : > { %v4859_v1 = vmul.f32 %v4790_v44, %v10758_v13  ;;  %v7731_v13 = vld [vmem:[%s8231_s24] sm:$0xff]  }
 0x7c4   : > { %7054 = vmatmul.mubr.f32.gmra.mxu1 %v4845_v14  ;;  %v7024_v49 = vpop.f32.mrf.mxu1  ;;  %v5718_v22 = vunpack.c.h.bf16 %v7731_v13 }
 0x7c5   : > { %7091 = vmatmul.mubr.f32.gmra.mxu0 %v4810_v37  ;;  %7056 = vmatprep.mubr.msk.f32.mxu1 %vm7955_vm1, %v10675_v47 }
 0x7c6   : > { %v4795_v46 = vpop.f32.mrf.mxu1  ;;  %7093 = vmatprep.mubr.msk.f32.mxu0 %vm7955_vm1, %v10675_v47 }
 0x7c7   : > { %v4866_v30 = vmul.f32 %v4795_v46, %v10760_v5 }
 0x7c8   : > { %7057 = vmatmul.mubr.f32.gmra.mxu1 %v4852_v10  ;;  %v7027_v27 = vpop.f32.mrf.mxu1 }
 0x7c9   : > { %7094 = vmatmul.mubr.f32.gmra.mxu0 %v4811_v50  ;;  %7059 = vmatprep.mubr.msk.f32.mxu1 %vm7955_vm1, %v10675_v47 }
 0x7ca   : > { %v4800_v2 = vpop.f32.mrf.mxu1  ;;  %7096 = vmatprep.mubr.msk.f32.mxu0 %vm7955_vm1, %v10675_v47 }
 0x7cb   : > { %v4873_v36 = vmul.f32 %v4800_v2, %v10762_v29 }
 0x7cc   : > { %7060 = vmatmul.mubr.f32.gmra.mxu1 %v4859_v1  ;;  %v7030_v31 = vpop.f32.mrf.mxu1  ;;  %v5717_v1 = vunpack.c.l.bf16 %v7731_v13  ;;  %v5741_v13 = vpop.permute.xlu1 %5740 }
 0x7cd   : > { %7097 = vmatmul.mubr.f32.gmra.mxu0 %v4812_v45  ;;  %7062 = vmatprep.mubr.msk.f32.mxu1 %vm7955_vm1, %v10675_v47 }
 0x7ce   : > { %v4805_v34 = vpop.f32.mrf.mxu1  ;;  %7099 = vmatprep.mubr.msk.f32.mxu0 %vm7955_vm1, %v10675_v47 }
 0x7cf   : > { %v4880_v8 = vmul.f32 %v4805_v34, %v10764_v62 }
 0x7d0   : > { %7063 = vmatmul.mubr.f32.gmra.mxu1 %v4866_v30  ;;  %v7033_v43 = vpop.f32.mrf.mxu1 }
 0x7d1   : > { %7100 = vmatmul.mubr.f32.gmra.mxu0 %v4813_v61  ;;  %7065 = vmatprep.mubr.msk.f32.mxu1 %vm7955_vm1, %v10675_v47  ;;  %v5724_v43 = vmul.f32 0.5, %v5717_v1 }
 0x7d2   : > { %7102 = vmatprep.mubr.msk.f32.mxu0 %vm7955_vm1, %v10675_v47 }
 0x7d4   : > { %7066 = vmatmul.mubr.f32.gmra.mxu1 %v4873_v36 }
 0x7d5   : > { %7103 = vmatmul.mubr.f32.gmra.mxu0 %v4814_v17  ;;  %7068 = vmatprep.mubr.msk.f32.mxu1 %vm7955_vm1, %v10675_v47 }
 0x7d6   : > { %7105 = vmatprep.mubr.msk.f32.mxu0 %vm7955_vm1, %v10675_v47 }
 0x7d8   : > { %7069 = vmatmul.mubr.f32.gmra.mxu1 %v4880_v8 }
 0x7d9   : > { %7106 = vmatmul.mubr.f32.gmra.mxu0 %v4815_v54 }
 0x80d   : > { %v6672_v18 = vpop.f32.mrf.mxu0 }
 0x80f   : > { %v6673_v25 = vpop.f32.mrf.mxu0 }
 0x810   : > { %v6674_v10 = vadd.f32 %v6673_v25, %v6672_v18 }
 0x819   : > { %v6675_v48 = vpop.f32.mrf.mxu0 }
 0x81b   : > { %v6676_v20 = vpop.f32.mrf.mxu0 }
 0x81c   : > { %v6677_v2 = vadd.f32 %v6676_v20, %v6675_v48  ;;  %v5725_v48 = vmul.f32 0.5, %v5718_v22  ;;  %v7733_v22 = vld [vmem:[%s8231_s24 + $0x10] sm:$0xff]  }
 0x829   : > { %v6678_v28 = vpop.f32.mrf.mxu0 }
 0x82b   : > { %v6679_v52 = vpop.f32.mrf.mxu0 }
 0x82c   : > { %v6680_v29 = vadd.f32 %v6679_v52, %v6678_v28 }
 0x839   : > { %v10395_v38 = vpop.f32.mrf.mxu0 }
 0x83b   : > { %v10397_v59 = vpop.f32.mrf.mxu0 }
 0x843   : > { %v10399_v53 = vpop.f32.mrf.mxu0 }
 0x845   : > { %v10401_v12 = vpop.f32.mrf.mxu0 }
 0x859   : > { %v10403_v47 = vpop.f32.mrf.mxu0 }
 0x85b   : > { %v10405_v7 = vpop.f32.mrf.mxu0 }
 0x85d   : > { %v10407_v40 = vpop.f32.mrf.mxu0 }
 0x85f   : > { %v10409_v60 = vpop.f32.mrf.mxu0 }
 0x860   : > { %v6709_v57 = vpop.f32.mrf.mxu1 }
 0x861   : > { %v6746_v15 = vpop.f32.mrf.mxu0 }
 0x862   : > { %v6710_v63 = vpop.f32.mrf.mxu1 }
 0x863   : > { %v6747_v58 = vpop.f32.mrf.mxu0  ;;  %v6711_v49 = vadd.f32 %v6710_v63, %v6709_v57  ;;  %v7732_v57 = vld [vmem:[%s8231_s24 + $0x8] sm:$0xff]   ;;  %v6683_v63 = vadd.f32 %v10397_v59, %v10395_v38 }
 0x864   : > { %v6712_v9 = vpop.f32.mrf.mxu1  ;;  %v6748_v35 = vadd.f32 %v6747_v58, %v6746_v15  ;;  %v5719_v15 = vunpack.c.l.bf16 %v7732_v57 }
 0x865   : > { %v6749_v41 = vpop.f32.mrf.mxu0  ;;  %v5432_v56 = vadd.f32 %v6711_v49, %v6674_v10  ;;  %v6686_v10 = vadd.f32 %v10401_v12, %v10399_v53 }
 0x866   : > { %v6713_v6 = vpop.f32.mrf.mxu1  ;;  %v5726_v38 = vmul.f32 0.5, %v5719_v15 }
 0x867   : > { %v6750_v4 = vpop.f32.mrf.mxu0  ;;  %v6714_v50 = vadd.f32 %v6713_v6, %v6712_v9  ;;  %v5500_v34 = vadd.f32 %v6748_v35, %v5432_v56 }
 0x868   : > { %v6715_v51 = vpop.f32.mrf.mxu1  ;;  %v6751_v36 = vadd.f32 %v6750_v4, %v6749_v41  ;;  %v5739_v41 = vpop.permute.xlu0 %5738 }
 0x869   : > { %v6752_v39 = vpop.f32.mrf.mxu0  ;;  %v5437_v31 = vadd.f32 %v6714_v50, %v6677_v2 }
 0x86a   : > { %v6716_v23 = vpop.f32.mrf.mxu1 }
 0x86b   : > { %v6753_v26 = vpop.f32.mrf.mxu0  ;;  %v6717_v5 = vadd.f32 %v6716_v23, %v6715_v51  ;;  %v5505_v25 = vadd.f32 %v6751_v36, %v5437_v31 }
 0x86c   : > { %v6718_v11 = vpop.f32.mrf.mxu1  ;;  %v6754_v58 = vadd.f32 %v6753_v26, %v6752_v39 }
 0x86d   : > { %v6755_v16 = vpop.f32.mrf.mxu0  ;;  %v5442_v8 = vadd.f32 %v6717_v5, %v6680_v29 }
 0x86e   : > { %v6719_v32 = vpop.f32.mrf.mxu1 }
 0x86f   : > { %v6756_v55 = vpop.f32.mrf.mxu0  ;;  %v6720_v19 = vadd.f32 %v6719_v32, %v6718_v11  ;;  %v5510_v49 = vadd.f32 %v6754_v58, %v5442_v8 }
 0x870   : > { %v6721_v0 = vpop.f32.mrf.mxu1  ;;  %v6757_v59 = vadd.f32 %v6756_v55, %v6755_v16 }
 0x871   : > { %v10411_v42 = vpop.f32.mrf.mxu0  ;;  %v5447_v51 = vadd.f32 %v6720_v19, %v6683_v63 }
 0x872   : > { %v6722_v24 = vpop.f32.mrf.mxu1 }
 0x873   : > { %v10413_v14 = vpop.f32.mrf.mxu0  ;;  %v6723_v6 = vadd.f32 %v6722_v24, %v6721_v0  ;;  %v5720_v24 = vunpack.c.h.bf16 %v7732_v57  ;;  %v5515_v55 = vadd.f32 %v6757_v59, %v5447_v51 }
 0x874   : > { %v10415_v44 = vpop.f32.mrf.mxu1  ;;  %v6760_v31 = vadd.f32 %v10413_v14, %v10411_v42 }
 0x875   : > { %v10417_v21 = vpop.f32.mrf.mxu0  ;;  %v5452_v1 = vadd.f32 %v6723_v6, %v6686_v10 }
 0x876   : > { %v10419_v37 = vpop.f32.mrf.mxu1 }
 0x877   : > { %v10421_v33 = vpop.f32.mrf.mxu0  ;;  %v6726_v53 = vadd.f32 %v10419_v37, %v10415_v44  ;;  %v5727_v37 = vmul.f32 0.5, %v5720_v24 }
 0x878   : > { %v10423_v46 = vpop.f32.mrf.mxu1 }
 0x879   : > { %v10425_v27 = vpop.f32.mrf.mxu0 }
 0x87a   : > { %v10428_v45 = vpop.f32.mrf.mxu1 }
 0x87b   : > { %v10430_v30 = vpop.f32.mrf.mxu0  ;;  %v6729_v42 = vadd.f32 %v10428_v45, %v10423_v46  ;;  %v5745_v45 = vpop.permute.xlu1 %5744 }
 0x87f   : > { %v5749_v24 = vpop.permute.xlu1 %5748 }
 0x880   : > { %v5567_v61 = vpop.f32.mrf.mxu1 }
 0x881   : > { %v5568_v3 = vadd.f32 %v5567_v61, %v5500_v34  ;;  %v5683_v17 = vpop.f32.mrf.mxu0  ;;  %v5721_v61 = vunpack.c.l.bf16 %v7733_v22 }
 0x882   : > { %v7052_v62 = vpop.f32.mrf.mxu1 }
 0x883   : > { %v5684_v54 = vadd.f32 %v5683_v17, %v5568_v3  ;;  %v7089_v18 = vpop.f32.mrf.mxu0  ;;  %v5743_v3 = vpop.permute.xlu0 %5742  ;;  %v5520_v62 = vadd.f32 %v6760_v31, %v5452_v1 }
 0x884   : > { %v5572_v20 = vpop.f32.mrf.mxu1 }
 0x885   : > { %v5731_v28 = vadd.f32 %v5724_v43, %v5684_v54  ;;  %v5573_v52 = vadd.f32 %v5572_v20, %v5505_v25  ;;  %v5688_v9 = vpop.f32.mrf.mxu0  ;;  %v6689_v43 = vadd.f32 %v10405_v7, %v10403_v47  ;;  %v5728_v7 = vmul.f32 0.5, %v5721_v61 }
 0x886   : > { %v7055_v4 = vpop.f32.mrf.mxu1  ;;  %v5722_v25 = vunpack.c.h.bf16 %v7733_v22  ;;  %v6763_v20 = vadd.f32 %v10421_v33, %v10417_v21  ;;  %v6766_v21 = vadd.f32 %v10430_v30, %v10425_v27 }
 0x887   : > { %v5759_v23 = vsel %vm697_vm0, %v5731_v28, %v5739_v41  ;;  %v5689_v11 = vadd.f32 %v5688_v9, %v5573_v52  ;;  %v7092_v32 = vpop.f32.mrf.mxu0  ;;  %v5457_v8 = vadd.f32 %v6726_v53, %v6689_v43 }
 0x888   : > { %v5767_v56 = vsel %vm5766_vm14, %v5759_v23, 0.0  ;;  %v5577_v50 = vpop.f32.mrf.mxu1  ;;  %v7734_v23 = vld [vmem:[%s8231_s24 + $0x18] sm:$0xf]  ;;  %v5747_v32 = vpop.permute.xlu0 %5746  ;;  %s6409_s24 = smul.u32 896, %s8067_s22  ;;  %s5782_s22 = scalar_lea.sflag [#allocation4], %s8189_s23 }
 0x889   : > { %5774 = vst [vmem:[%s10440_s4] sm:$0xff] %v5767_v56  ;;  %v5732_v39 = vadd.f32 %v5725_v48, %v5689_v11  ;;  %v5578_v26 = vadd.f32 %v5577_v50, %v5510_v49  ;;  %v5693_v0 = vpop.f32.mrf.mxu0  ;;  %v6692_v48 = vadd.f32 %v10409_v60, %v10407_v40  ;;  %v5525_v41 = vadd.f32 %v6763_v20, %v5457_v8 }
 0x88a   : > { %v7058_v2 = vpop.f32.mrf.mxu1  ;;  %v5729_v60 = vmul.f32 0.5, %v5722_v25  ;;  %v5723_v11 = vunpack.c.l.bf16 %v7734_v23  ;;  %s10479_s25 = scalar_lea.hbm %s10766_s26, %s6409_s24 }
 0x88b   : > { %v5760_v12 = vsel %vm697_vm0, %v5732_v39, %v5741_v13  ;;  %v5694_v35 = vadd.f32 %v5693_v0, %v5578_v26  ;;  %v7095_v16 = vpop.f32.mrf.mxu0  ;;  %v5462_v58 = vadd.f32 %v6729_v42, %v6692_v48 }
 0x88c   : > { %v5768_v5 = vsel %vm5766_vm14, %v5760_v12, 0.0  ;;  %v5582_v34 = vpop.f32.mrf.mxu1  ;;  %v5730_v0 = vmul.f32 0.5, %v5723_v11  ;;  %v5751_v16 = vpop.permute.xlu0 %5750 }
 0x88d   : > { %5775 = vst [vmem:[%s10440_s4 + $0x8] sm:$0xff] %v5768_v5  ;;  %v5733_v29 = vadd.f32 %v5726_v38, %v5694_v35  ;;  %v5583_v36 = vadd.f32 %v5582_v34, %v5515_v55  ;;  %v5698_v44 = vpop.f32.mrf.mxu0  ;;  %v5530_v38 = vadd.f32 %v6766_v21, %v5462_v58 }
 0x88e   : > { %v7061_v17 = vpop.f32.mrf.mxu1 }
 0x88f   : > { %v5761_v14 = vsel %vm697_vm0, %v5733_v29, %v5743_v3  ;;  %v5699_v19 = vadd.f32 %v5698_v44, %v5583_v36  ;;  %v7098_v54 = vpop.f32.mrf.mxu0 }
 0x890   : > { %v5769_v18 = vsel %vm5766_vm14, %v5761_v14, 0.0  ;;  %v5587_v47 = vpop.f32.mrf.mxu1 }
 0x891   : > { %5776 = vst [vmem:[%s10440_s4 + $0x10] sm:$0xff] %v5769_v18  ;;  %v5734_v57 = vadd.f32 %v5727_v37, %v5699_v19  ;;  %v5588_v15 = vadd.f32 %v5587_v47, %v5520_v62  ;;  %v5703_v46 = vpop.f32.mrf.mxu0 }
 0x892   : > { %v7064_v63 = vpop.f32.mrf.mxu1 }
 0x893   : > { %v5762_v28 = vsel %vm697_vm0, %v5734_v57, %v5745_v45  ;;  %v5704_v52 = vadd.f32 %v5703_v46, %v5588_v15  ;;  %v7101_v9 = vpop.f32.mrf.mxu0 }
 0x894   : > { %v5770_v6 = vsel %vm5766_vm14, %v5762_v28, 0.0  ;;  %v5592_v40 = vpop.f32.mrf.mxu1 }
 0x895   : > { %5777 = vst [vmem:[%s10440_s4 + $0x18] sm:$0xff] %v5770_v6  ;;  %v5735_v33 = vadd.f32 %v5728_v7, %v5704_v52  ;;  %v5593_v4 = vadd.f32 %v5592_v40, %v5525_v41  ;;  %v5708_v51 = vpop.f32.mrf.mxu0 }
 0x896   : > { %v7067_v49 = vpop.f32.mrf.mxu1 }
 0x897   : > { %v5763_v10 = vsel %vm697_vm0, %v5735_v33, %v5747_v32  ;;  %v5709_v56 = vadd.f32 %v5708_v51, %v5593_v4  ;;  %v7104_v50 = vpop.f32.mrf.mxu0 }
 0x898   : > { %v5771_v59 = vsel %vm5766_vm14, %v5763_v10, 0.0  ;;  %v5597_v39 = vpop.f32.mrf.mxu1 }
 0x899   : > { %5778 = vst [vmem:[%s10440_s4 + $0x20] sm:$0xff] %v5771_v59  ;;  %v5736_v27 = vadd.f32 %v5729_v60, %v5709_v56  ;;  %v5598_v30 = vadd.f32 %v5597_v39, %v5530_v38  ;;  %v5713_v26 = vpop.f32.mrf.mxu0 }
 0x89a   : > { %v7070_v13 = vpop.f32.mrf.mxu1 }
 0x89b   : > { %v5764_v1 = vsel %vm697_vm0, %v5736_v27, %v5749_v24  ;;  %v5714_v2 = vadd.f32 %v5713_v26, %v5598_v30  ;;  %v7107_v53 = vpop.f32.mrf.mxu0 }
 0x89c   : > { %v5772_v12 = vsel %vm5766_vm14, %v5764_v1, 0.0 }
 0x89d   : > { %5779 = vst [vmem:[%s10440_s4 + $0x28] sm:$0xff] %v5772_v12  ;;  %v5737_v35 = vadd.f32 %v5730_v0, %v5714_v2 }
 0x89f   : > { %v5765_v55 = vsel %vm697_vm0, %v5737_v35, %v5751_v16 }
 0x8a0   : > { %v5773_v31 = vsel %vm5766_vm14, %v5765_v55, 0.0 }
 0x8a1   : > { %5780 = vst [vmem:[%s10440_s4 + $0x30] sm:$0xff] %v5773_v31 }
 0x8a2   : > { %7880 = shalt.err (!%p7877_p3)
}
 0x8a3   : > { %s7881_s8 = scalar_lea.hbm %s10479_s25, 896  ;;  %s7885_s24 = scalar_lea.hbm %s10766_s26, 1792 }
 0x8a4   : > { %p7882_p8 = scmp.ne.s32.totalorder %s10479_s25, %s7881_s8  ;;  %p7886_p4 = scmp.lt.s32.totalorder %s10479_s25, %s10766_s26 }
 0x8a5   : > { %p7887_p7 = scmp.lt.s32.totalorder %s7885_s24, %s7881_s8 }
 0x8a6   : > { %p7883_p6 = pnand %p7882_p8, %p10767_p9 }
 0x8a7   : > { %p7888_p12 = por %p7887_p7, %p7886_p4 }
 0x8a8   : > { %p7884_p11 = pneg %p7883_p6 }
 0x8aa   : > { %p7889_p1 = pnand %p7888_p12, %p7884_p11 }
 0x8ac   : > { %7892 = shalt.err (!%p7889_p1)
}
 0x8ad   : > { %s7964_s29 = smov 128   ;;  %s7965_s28 = smov 8  }
 0x8ae   : > { %7130 = dma.vmem_to_hbm [thread:$0]  (%p10767_p9), %s10482_s15, 896, %s10479_s25, %s5782_s22, %s7964_s29, %s7964_s29, %s7965_s28  }
 0x8af PF: > { %s10768_s9 = sld [smem:[#allocation16_spill]]  ;;  %p10771_p2 = scmp.ge.s32.totalorder %s7939_s21, 2 }
 0x8b0   : > { %s10769_s10 = sld [smem:[#allocation17_spill]] }
 0x8b5   : > { %s5810_s16 = sand.u32 1, %s10768_s9  }
 0x8b6   : > { %p10770_p13 = scmp.ne.s32.totalorder %s10769_s10, 0  ;;  %s5811_s8 = scalar_lea.sflag [#allocation4], %s5810_s16 }
 0x8b8   : > { %p7150_p0 = pnand %p10771_p2, %p10770_p13 }
 0x8ba   : > { %p7151_p5 = pneg %p7150_p0 }
 0x8bc   : > { %7922 = dma.done.wait (%p7151_p5), %s5811_s8, 896  }
 0x8bd   : > { %7924 = vsyncadd (%p7151_p5), %s5811_s8, 4294966400  ;;  %s10772_s4 = sld [smem:[#allocation18_spill]]  ;;  %s10773_s24 = smov %s8134_s18 }
 0x8be   : > { %p30_p10 = scmp.ge.s32.totalorder %s8134_s18, 4   ;;  %s10774_s18 = smov %s7931_s19 }
 0x8bf   : > { %s10775_s19 = smov %s7935_s20  ;;  %s10777_s21 = smov %s10773_s24 }
 0x8c0   :  { %32 = sbr.rel (!%p30_p10) target bundleno = 14 (0xe), region = 147 }
 0x8c3   : > { %s10776_s20 = smov %s10772_s4 }
 0x8c5   :  { %5816 = vsyncpa [#allocation3], 1 }
 0x8c6   :  { %5818 = vsyncpa [#allocation3 + $0x1], 1 }
 0x8c7   :  { %5819 = vsyncpa [#allocation6], 1 }
 0x8c8   :  { %5820 = vsyncpa [#allocation9], 1 }
 0x8c9   :  { %5821 = vsyncpa [#allocation4], 1 }
 0x8ca   :  { %5823 = vsyncpa [#allocation4 + $0x1], 1 }

</bundles_post_ra>
